<compile_context>
chip_gen: v6e
topology: v6e:2x2x1
jax: 0.10.0
libtpu: 0.0.40
codegen_flags: <defaults>
</compile_context>

<pallas_src>
import jax
import jax.numpy as jnp
from jax.experimental import pallas as pl
from jax.experimental.pallas import tpu as pltpu

D = 512    # embedding_dim == token_dim == channel_dim == expert_dim (heads are Linear(512, 1))
A = 16     # adapt_dim (kept small so the demo's D*D x A adaptation params stay modest)
E = 4      # num_experts
TM = 256   # token-row tile (good MXU row fill on v5e/v6e/v7x)


# ----------------------------------------------------------------------------
# Pallas kernel: fused per-token pipeline for a tile of TM token rows.
# ----------------------------------------------------------------------------
def _lfm_kernel(x_ref, gate_ref,
                wtok_ref, btok_ref,
                wchan_ref, bchan_ref,
                wall_ref, ball_ref, bfin_ref,
                head_ref):
    # adaptive token mixing (adaptation already folded into the weight)
    h = jnp.dot(x_ref[...], wtok_ref[...],
                preferred_element_type=jnp.float32) + btok_ref[...]
    # adaptive channel mixing
    h = jnp.dot(h.astype(jnp.bfloat16), wchan_ref[...],
                preferred_element_type=jnp.float32) + bchan_ref[...]
    # collapsed MoE -> output linear -> (mem, time) heads: one [TM,D]x[D,2E]
    y = jnp.dot(h.astype(jnp.bfloat16), wall_ref[...],
                preferred_element_type=jnp.float32) + ball_ref[...]      # [TM, 2E]

    # gated sum over experts (per-row gates), 2-wide column pair per expert
    g = gate_ref[...]                                                    # [TM, E]
    acc = jnp.zeros((y.shape[0], 2), jnp.float32)
    for e in range(E):                                                   # E small & static
        acc = acc + g[:, e:e + 1] * y[:, 2 * e:2 * e + 2]
    head_ref[...] = acc + bfin_ref[...]                                  # [TM, 2]


# ----------------------------------------------------------------------------
# Glue: effective (adapted) weights, gates, and the algebraic tail collapse.
# ----------------------------------------------------------------------------
def _prepare(x, p):
    B, S, _ = x.shape
    M = B * S

    adapt_in = jnp.mean(x, axis=1) @ p['w_feat'].T + p['b_feat']         # [B, A]
    a_bar = jnp.mean(adapt_in, axis=0)                                   # [A] (batch-mean adapt vector)

    def eff_w(base_w, adapt_w, adapt_b):
        return base_w + (adapt_w @ a_bar + adapt_b).reshape(D, D)        # [out, in]

    w_tok = eff_w(p['tok_w'], p['tok_aw'], p['tok_ab'])
    w_chan = eff_w(p['chan_w'], p['chan_aw'], p['chan_ab'])
    w_exp = jnp.stack([eff_w(p['exp_w'][e], p['exp_aw'][e], p['exp_ab'][e])
                       for e in range(E)])                               # [E, D, D]

    gate = jax.nn.softmax(adapt_in @ p['gate_w'].T + p['gate_b'], axis=-1)   # [B, E]
    gate_rows = jnp.repeat(gate, S, axis=0)                              # [M, E]

    # ---- collapse MoE -> output linear -> heads into a single [D, 2E] matmul ----
    whead = jnp.stack([p['mem_w'][0], p['time_w'][0]], axis=1)           # [D, 2]
    bhead = jnp.stack([p['mem_b'][0], p['time_b'][0]])                   # [2]
    w_fuse = p['out_w'].T @ whead                                        # [D, 2]   (Wout^T @ Whead)
    b_fin = (p['out_b'] @ whead + bhead)[None, :]                        # [1, 2]
    w_all = jnp.concatenate([w_exp[e].T @ w_fuse for e in range(E)], axis=1)          # [D, 2E]
    b_all = jnp.concatenate([p['exp_b'][e] @ w_fuse for e in range(E)])[None, :]      # [1, 2E]

    return dict(x2d=x.reshape(M, D), gate_rows=gate_rows,
                w_tok=w_tok, w_chan=w_chan, w_exp=w_exp,
                w_all=w_all, b_all=b_all, b_fin=b_fin)


def _kernel_operands(x, p):
    """bf16-cast, row-padded operand set shared by the kernel and the tight reference."""
    pr = _prepare(x, p)
    M = pr['x2d'].shape[0]
    m_pad = pl.cdiv(M, TM) * TM
    pad = m_pad - M
    x2d = jnp.pad(pr['x2d'], ((0, pad), (0, 0)))
    gate_rows = jnp.pad(pr['gate_rows'], ((0, pad), (0, 0)))
    ops = dict(
        x=x2d.astype(jnp.bfloat16),
        gate=gate_rows,
        w_tok_t=pr['w_tok'].T.astype(jnp.bfloat16),
        b_tok=p['tok_b'][None, :],
        w_chan_t=pr['w_chan'].T.astype(jnp.bfloat16),
        b_chan=p['chan_b'][None, :],
        w_all=pr['w_all'].astype(jnp.bfloat16),
        b_all=pr['b_all'],
        b_fin=pr['b_fin'],
    )
    return ops, M, m_pad


def lfm_predictor_forward(x, p):
    B, S, _ = x.shape
    ops, M, m_pad = _kernel_operands(x, p)

    head = pl.pallas_call(
        _lfm_kernel,
        out_shape=jax.ShapeDtypeStruct((m_pad, 2), jnp.float32),
        grid=(m_pad // TM,),
        in_specs=[
            pl.BlockSpec((TM, D), lambda i: (i, 0)),        # x rows (bf16)
            pl.BlockSpec((TM, E), lambda i: (i, 0)),        # per-row gates (f32)
            pl.BlockSpec((D, D), lambda i: (0, 0)),         # W_tok^T (bf16)
            pl.BlockSpec((1, D), lambda i: (0, 0)),         # b_tok
            pl.BlockSpec((D, D), lambda i: (0, 0)),         # W_chan^T (bf16)
            pl.BlockSpec((1, D), lambda i: (0, 0)),         # b_chan
            pl.BlockSpec((D, 2 * E), lambda i: (0, 0)),     # fused expert/out/head weights
            pl.BlockSpec((1, 2 * E), lambda i: (0, 0)),     # fused per-expert biases
            pl.BlockSpec((1, 2), lambda i: (0, 0)),         # fused output+head bias
        ],
        out_specs=pl.BlockSpec((TM, 2), lambda i: (i, 0)),
        compiler_params=pltpu.CompilerParams(
            dimension_semantics=("parallel",),               # independent row tiles -> v7x megacore
            vmem_limit_bytes=32 << 20),                      # working set ~3 MiB; legal on v7x (64 MiB)
    )(ops['x'], ops['gate'], ops['w_tok_t'], ops['b_tok'], ops['w_chan_t'],
      ops['b_chan'], ops['w_all'], ops['b_all'], ops['b_fin'])

    head = head[:M]
    mem_pred = head[:, 0].reshape(B, S)
    time_pred = head[:, 1].reshape(B, S)
    return mem_pred, time_pred


# ----------------------------------------------------------------------------
# Pure-JAX references for correctness checking
# ----------------------------------------------------------------------------
def reference_fused_bf16(x, p):
    """Same bf16 operands and same math order as the kernel (tight check)."""
    B, S, _ = x.shape
    ops, M, _ = _kernel_operands(x, p)
    h = jnp.dot(ops['x'], ops['w_tok_t'], preferred_element_type=jnp.float32) + ops['b_tok']
    h = jnp.dot(h.astype(jnp.bfloat16), ops['w_chan_t'],
                preferred_element_type=jnp.float32) + ops['b_chan']
    y = jnp.dot(h.astype(jnp.bfloat16), ops['w_all'],
                preferred_element_type=jnp.float32) + ops['b_all']
    g = ops['gate']
    acc = jnp.zeros((y.shape[0], 2), jnp.float32)
    for e in range(E):
        acc = acc + g[:, e:e + 1] * y[:, 2 * e:2 * e + 2]
    head = (acc + ops['b_fin'])[:M]
    return head[:, 0].reshape(B, S), head[:, 1].reshape(B, S)


def reference_f32_unfused(x, p):
    """Full-precision, un-fused layer structure (checks the algebraic collapse)."""
    B, S, _ = x.shape
    pr = _prepare(x, p)
    h = pr['x2d'] @ pr['w_tok'].T + p['tok_b']
    h = h @ pr['w_chan'].T + p['chan_b']
    moe = jnp.zeros_like(h)
    for e in range(E):
        moe = moe + pr['gate_rows'][:, e:e + 1] * (h @ pr['w_exp'][e].T + p['exp_b'][e])
    o = moe @ p['out_w'].T + p['out_b']
    mem = o @ p['mem_w'][0] + p['mem_b'][0]
    tim = o @ p['time_w'][0] + p['time_b'][0]
    return mem.reshape(B, S), tim.reshape(B, S)


# ----------------------------------------------------------------------------
# Deterministic synthetic parameters (shapes from the module __init__)
# ----------------------------------------------------------------------------
def init_params(key):
    ks = iter(jax.random.split(key, 32))

    def n(shape, scale=0.02):
        return scale * jax.random.normal(next(ks), shape, jnp.float32)

    return dict(
        w_feat=n((A, D)), b_feat=n((A,)),                    # featurizer: Linear(D, A)
        tok_w=n((D, D)), tok_b=n((D,)),                      # token mixing AdaptiveLinear
        tok_aw=n((D * D, A)), tok_ab=n((D * D,)),
        chan_w=n((D, D)), chan_b=n((D,)),                    # channel mixing AdaptiveLinear
        chan_aw=n((D * D, A)), chan_ab=n((D * D,)),
        exp_w=n((E, D, D)), exp_b=n((E, D)),                 # expert AdaptiveLinears
        exp_aw=n((E, D * D, A)), exp_ab=n((E, D * D)),
        gate_w=n((E, A)), gate_b=n((E,)),                    # MoE gating: Linear(A, E)
        out_w=n((D, D)), out_b=n((D,)),                      # LFModel output layer
        mem_w=n((1, D)), mem_b=n((1,)),                      # mem_pred_layer: Linear(512, 1)
        time_w=n((1, D)), time_b=n((1,)),                    # time_pred_layer: Linear(512, 1)
    )


if __name__ == "__main__":
    key = jax.random.PRNGKey(0)
    kp, kx = jax.random.split(key)
    params = init_params(kp)

    B, S = 2, 8                                              # small demo shapes; D fixed at 512 by the heads
    x = jax.random.normal(kx, (B, S, D), jnp.float32)

    mem_pred, time_pred = lfm_predictor_forward(x, params)
    jax.block_until_ready((mem_pred, time_pred))

    assert mem_pred.shape == (B, S) and time_pred.shape == (B, S)

    # tight check: identical bf16 operands, identical math order
    mem_t, time_t = reference_fused_bf16(x, params)
    assert jnp.allclose(mem_pred, mem_t, atol=2e-4, rtol=1e-3)
    assert jnp.allclose(time_pred, time_t, atol=2e-4, rtol=1e-3)

    # loose check: full-precision, un-fused math (validates the algebraic fusion)
    mem_r, time_r = reference_f32_unfused(x, params)
    assert jnp.allclose(mem_pred, mem_r, atol=1e-2, rtol=1e-1)
    assert jnp.allclose(time_pred, time_r, atol=1e-2, rtol=1e-1)

    print("KERNEL_OK")
</pallas_src>

<mosaic_0001>
module attributes {stable_mosaic.version = 11 : i64} {
  func.func @_lfm_kernel(%arg0: i32, %arg1: memref<256x512xbf16, #tpu.memory_space<vmem>>, %arg2: memref<256x4xf32, #tpu.memory_space<vmem>>, %arg3: memref<512x512xbf16, #tpu.memory_space<vmem>>, %arg4: memref<1x512xf32, #tpu.memory_space<vmem>>, %arg5: memref<512x512xbf16, #tpu.memory_space<vmem>>, %arg6: memref<1x512xf32, #tpu.memory_space<vmem>>, %arg7: memref<512x8xbf16, #tpu.memory_space<vmem>>, %arg8: memref<1x8xf32, #tpu.memory_space<vmem>>, %arg9: memref<1x2xf32, #tpu.memory_space<vmem>>, %arg10: memref<256x2xf32, #tpu.memory_space<vmem>>) attributes {dimension_semantics = [#tpu.dimension_semantics<parallel>], iteration_bounds = array<i64: 1>, scalar_prefetch = 0 : i64, scratch_operands = 0 : i64, tpu.core_type = #tpu.core_type<tc>, window_params = [{transform_indices = @transform_0, window_bounds = array<i64: 256, 512>}, {transform_indices = @transform_1, window_bounds = array<i64: 256, 4>}, {pipeline_mode = #tpu.pipeline_mode<synchronous>, transform_indices = @transform_2, window_bounds = array<i64: 512, 512>}, {pipeline_mode = #tpu.pipeline_mode<synchronous>, transform_indices = @transform_3, window_bounds = array<i64: 1, 512>}, {pipeline_mode = #tpu.pipeline_mode<synchronous>, transform_indices = @transform_4, window_bounds = array<i64: 512, 512>}, {pipeline_mode = #tpu.pipeline_mode<synchronous>, transform_indices = @transform_5, window_bounds = array<i64: 1, 512>}, {pipeline_mode = #tpu.pipeline_mode<synchronous>, transform_indices = @transform_6, window_bounds = array<i64: 512, 8>}, {pipeline_mode = #tpu.pipeline_mode<synchronous>, transform_indices = @transform_7, window_bounds = array<i64: 1, 8>}, {pipeline_mode = #tpu.pipeline_mode<synchronous>, transform_indices = @transform_8, window_bounds = array<i64: 1, 2>}, {transform_indices = @transform_9, window_bounds = array<i64: 256, 2>}]} {
    %c0 = arith.constant 0 : index
    %c0_0 = arith.constant 0 : index
    %0 = vector.load %arg1[%c0, %c0_0] : memref<256x512xbf16, #tpu.memory_space<vmem>>, vector<256x512xbf16>
    %c0_1 = arith.constant 0 : index
    %c0_2 = arith.constant 0 : index
    %1 = vector.load %arg3[%c0_1, %c0_2] : memref<512x512xbf16, #tpu.memory_space<vmem>>, vector<512x512xbf16>
    %cst = arith.constant dense<0.000000e+00> : vector<256x512xf32>
    %2 = tpu.matmul %0, %1, %cst {dimension_numbers = #tpu.dot_dimension_numbers<[1], [0], [0], [1], [0, 0, 1, 1], [], []>} : vector<256x512xbf16>, vector<512x512xbf16>, vector<256x512xf32> -> vector<256x512xf32>
    %c0_3 = arith.constant 0 : index
    %c0_4 = arith.constant 0 : index
    %3 = vector.load %arg4[%c0_3, %c0_4] : memref<1x512xf32, #tpu.memory_space<vmem>>, vector<1x512xf32>
    %4 = vector.broadcast %3 : vector<1x512xf32> to vector<256x512xf32>
    %5 = arith.addf %2, %4 : vector<256x512xf32>
    %6 = arith.truncf %5 : vector<256x512xf32> to vector<256x512xbf16>
    %c0_5 = arith.constant 0 : index
    %c0_6 = arith.constant 0 : index
    %7 = vector.load %arg5[%c0_5, %c0_6] : memref<512x512xbf16, #tpu.memory_space<vmem>>, vector<512x512xbf16>
    %cst_7 = arith.constant dense<0.000000e+00> : vector<256x512xf32>
    %8 = tpu.matmul %6, %7, %cst_7 {dimension_numbers = #tpu.dot_dimension_numbers<[1], [0], [0], [1], [0, 0, 1, 1], [], []>} : vector<256x512xbf16>, vector<512x512xbf16>, vector<256x512xf32> -> vector<256x512xf32>
    %c0_8 = arith.constant 0 : index
    %c0_9 = arith.constant 0 : index
    %9 = vector.load %arg6[%c0_8, %c0_9] : memref<1x512xf32, #tpu.memory_space<vmem>>, vector<1x512xf32>
    %10 = vector.broadcast %9 : vector<1x512xf32> to vector<256x512xf32>
    %11 = arith.addf %8, %10 : vector<256x512xf32>
    %12 = arith.truncf %11 : vector<256x512xf32> to vector<256x512xbf16>
    %c0_10 = arith.constant 0 : index
    %c0_11 = arith.constant 0 : index
    %13 = vector.load %arg7[%c0_10, %c0_11] : memref<512x8xbf16, #tpu.memory_space<vmem>>, vector<512x8xbf16>
    %cst_12 = arith.constant dense<0.000000e+00> : vector<256x8xf32>
    %14 = tpu.matmul %12, %13, %cst_12 {dimension_numbers = #tpu.dot_dimension_numbers<[1], [0], [0], [1], [0, 0, 1, 1], [], []>} : vector<256x512xbf16>, vector<512x8xbf16>, vector<256x8xf32> -> vector<256x8xf32>
    %c0_13 = arith.constant 0 : index
    %c0_14 = arith.constant 0 : index
    %15 = vector.load %arg8[%c0_13, %c0_14] : memref<1x8xf32, #tpu.memory_space<vmem>>, vector<1x8xf32>
    %16 = vector.broadcast %15 : vector<1x8xf32> to vector<256x8xf32>
    %17 = arith.addf %14, %16 : vector<256x8xf32>
    %c0_15 = arith.constant 0 : index
    %c0_16 = arith.constant 0 : index
    %18 = vector.load %arg2[%c0_15, %c0_16] : memref<256x4xf32, #tpu.memory_space<vmem>>, vector<256x4xf32>
    %cst_17 = arith.constant 0.000000e+00 : f32
    %19 = vector.broadcast %cst_17 : f32 to vector<256x2xf32>
    %20 = vector.extract_strided_slice %18 {offsets = [0, 0], sizes = [256, 1], strides = [1, 1]} : vector<256x4xf32> to vector<256x1xf32>
    %21 = vector.extract_strided_slice %17 {offsets = [0, 0], sizes = [256, 2], strides = [1, 1]} : vector<256x8xf32> to vector<256x2xf32>
    %22 = vector.broadcast %20 : vector<256x1xf32> to vector<256x2xf32>
    %23 = arith.mulf %22, %21 : vector<256x2xf32>
    %24 = arith.addf %19, %23 : vector<256x2xf32>
    %25 = vector.extract_strided_slice %18 {offsets = [0, 1], sizes = [256, 1], strides = [1, 1]} : vector<256x4xf32> to vector<256x1xf32>
    %26 = vector.extract_strided_slice %17 {offsets = [0, 2], sizes = [256, 2], strides = [1, 1]} : vector<256x8xf32> to vector<256x2xf32>
    %27 = vector.broadcast %25 : vector<256x1xf32> to vector<256x2xf32>
    %28 = arith.mulf %27, %26 : vector<256x2xf32>
    %29 = arith.addf %24, %28 : vector<256x2xf32>
    %30 = vector.extract_strided_slice %18 {offsets = [0, 2], sizes = [256, 1], strides = [1, 1]} : vector<256x4xf32> to vector<256x1xf32>
    %31 = vector.extract_strided_slice %17 {offsets = [0, 4], sizes = [256, 2], strides = [1, 1]} : vector<256x8xf32> to vector<256x2xf32>
    %32 = vector.broadcast %30 : vector<256x1xf32> to vector<256x2xf32>
    %33 = arith.mulf %32, %31 : vector<256x2xf32>
    %34 = arith.addf %29, %33 : vector<256x2xf32>
    %35 = vector.extract_strided_slice %18 {offsets = [0, 3], sizes = [256, 1], strides = [1, 1]} : vector<256x4xf32> to vector<256x1xf32>
    %36 = vector.extract_strided_slice %17 {offsets = [0, 6], sizes = [256, 2], strides = [1, 1]} : vector<256x8xf32> to vector<256x2xf32>
    %37 = vector.broadcast %35 : vector<256x1xf32> to vector<256x2xf32>
    %38 = arith.mulf %37, %36 : vector<256x2xf32>
    %39 = arith.addf %34, %38 : vector<256x2xf32>
    %c0_18 = arith.constant 0 : index
    %c0_19 = arith.constant 0 : index
    %40 = vector.load %arg9[%c0_18, %c0_19] : memref<1x2xf32, #tpu.memory_space<vmem>>, vector<1x2xf32>
    %41 = vector.broadcast %40 : vector<1x2xf32> to vector<256x2xf32>
    %42 = arith.addf %39, %41 : vector<256x2xf32>
    %c0_20 = arith.constant 0 : index
    %c0_21 = arith.constant 0 : index
    %43 = vector.load %arg10[%c0_20, %c0_21] : memref<256x2xf32, #tpu.memory_space<vmem>>, vector<256x2xf32>
    tpu.vector_store %arg10[%c0_20, %c0_21], %42 {strides = array<i32>} : memref<256x2xf32, #tpu.memory_space<vmem>>, vector<256x2xf32>,
    return
  }
  func.func @transform_0(%arg0: i32) -> (i32, i32) {
    %c0_i32 = arith.constant 0 : i32
    %c0_i32_0 = arith.constant 0 : i32
    return %arg0, %c0_i32 : i32, i32
  }
  func.func @transform_1(%arg0: i32) -> (i32, i32) {
    %c0_i32 = arith.constant 0 : i32
    %c0_i32_0 = arith.constant 0 : i32
    return %arg0, %c0_i32 : i32, i32
  }
  func.func @transform_2(%arg0: i32) -> (i32, i32) {
    %c0_i32 = arith.constant 0 : i32
    %c0_i32_0 = arith.constant 0 : i32
    %c0_i32_1 = arith.constant 0 : i32
    return %c0_i32, %c0_i32_0 : i32, i32
  }
  func.func @transform_3(%arg0: i32) -> (i32, i32) {
    %c0_i32 = arith.constant 0 : i32
    %c0_i32_0 = arith.constant 0 : i32
    %c0_i32_1 = arith.constant 0 : i32
    return %c0_i32, %c0_i32_0 : i32, i32
  }
  func.func @transform_4(%arg0: i32) -> (i32, i32) {
    %c0_i32 = arith.constant 0 : i32
    %c0_i32_0 = arith.constant 0 : i32
    %c0_i32_1 = arith.constant 0 : i32
    return %c0_i32, %c0_i32_0 : i32, i32
  }
  func.func @transform_5(%arg0: i32) -> (i32, i32) {
    %c0_i32 = arith.constant 0 : i32
    %c0_i32_0 = arith.constant 0 : i32
    %c0_i32_1 = arith.constant 0 : i32
    return %c0_i32, %c0_i32_0 : i32, i32
  }
  func.func @transform_6(%arg0: i32) -> (i32, i32) {
    %c0_i32 = arith.constant 0 : i32
    %c0_i32_0 = arith.constant 0 : i32
    %c0_i32_1 = arith.constant 0 : i32
    return %c0_i32, %c0_i32_0 : i32, i32
  }
  func.func @transform_7(%arg0: i32) -> (i32, i32) {
    %c0_i32 = arith.constant 0 : i32
    %c0_i32_0 = arith.constant 0 : i32
    %c0_i32_1 = arith.constant 0 : i32
    return %c0_i32, %c0_i32_0 : i32, i32
  }
  func.func @transform_8(%arg0: i32) -> (i32, i32) {
    %c0_i32 = arith.constant 0 : i32
    %c0_i32_0 = arith.constant 0 : i32
    %c0_i32_1 = arith.constant 0 : i32
    return %c0_i32, %c0_i32_0 : i32, i32
  }
  func.func @transform_9(%arg0: i32) -> (i32, i32) {
    %c0_i32 = arith.constant 0 : i32
    %c0_i32_0 = arith.constant 0 : i32
    return %arg0, %c0_i32 : i32, i32
  }
}

</mosaic_0001>

<bundles_post_ra>
// kernel: tpu_custom_call.1
= control target key start
LH: loop header
LB: loop body
LE: loop exit
PB: predicated region body
PF: predicated region fallthrough
CT: control target
= control target key end

     0   :  { %14 = vsyncpa [#allocation3], 0  ;;  %s10065_s0 = inlined_call_operand.vmem [shape: bf16[256,512], index: 0, kind: input, shape index: {}]   ;;  %s10066_s1 = inlined_call_operand.vmem [shape: f32[256,4], index: 1, kind: input, shape index: {}]   ;;  %s10067_s2 = inlined_call_operand.hbm [shape: bf16[512,512], index: 2, kind: input, shape index: {}]   ;;  %s10068_s3 = inlined_call_operand.vmem [shape: f32[1,512], index: 3, kind: input, shape index: {}]   ;;  %s10069_s4 = inlined_call_operand.hbm [shape: bf16[512,512], index: 4, kind: input, shape index: {}]   ;;  %s10070_s5 = inlined_call_operand.vmem [shape: f32[1,512], index: 5, kind: input, shape index: {}]   ;;  %s10071_s6 = inlined_call_operand.vmem [shape: bf16[512,8], index: 6, kind: input, shape index: {}]   ;;  %s10072_s7 = inlined_call_operand.vmem [shape: f32[1,8], index: 7, kind: input, shape index: {}]   ;;  %s10073_s8 = inlined_call_operand.vmem [shape: f32[1,2], index: 8, kind: input, shape index: {}]   ;;  %s10074_s9 = inlined_call_operand.vmem [shape: f32[256,2], index: 9, kind: output, shape index: {}]  }
   0x1   :  { %15 = vsyncpa [#allocation5], 0  ;;  %s6776_s30 = smov [#allocation2]  }
   0x2   :  { %s25_s10 = sshll.u32 %s6776_s30, 4  ;;  %s26_s10 = int_to_ptr.vmem [resolvable:$true] %s25_s10 }
   0x3   :  { %s6740_s11 = scalar_lea.vmem %s26_s10, 16384  ;;  %p6745_p1 = scmp.lt.s32.totalorder %s26_s10, %s26_s10 }
   0x4   :  { %p6741_p0 = scmp.ne.s32.totalorder %s26_s10, %s6740_s11  ;;  %p6746_p2 = scmp.lt.s32.totalorder %s6740_s11, %s6740_s11 }
   0x6   :  { %p6747_p3 = por %p6746_p2, %p6745_p1 }
   0x8   :  { %p6748_p4 = pnand %p6747_p3, %p6741_p0 }
   0xa   :  { %6751 = shalt.err (!%p6748_p4)
}
   0xb   :  { %s6777_s12 = smov 256   ;;  %s6778_s13 = smov 16  }
   0xc   :  { %31 = dma.hbm_to_vmem [thread:$0]  %s10067_s2, 16384, %s26_s10, [#allocation3], %s6777_s12, %s6777_s12, %s6778_s13  }
   0xd   :  { %s6779_s16 = smov [#allocation4]  }
   0xe   :  { %s39_s17 = sshll.u32 %s6779_s16, 4  ;;  %s40_s17 = int_to_ptr.vmem [resolvable:$true] %s39_s17 }
   0xf   :  { %s6760_s18 = scalar_lea.vmem %s40_s17, 16384  ;;  %p6765_p6 = scmp.lt.s32.totalorder %s40_s17, %s40_s17 }
  0x10   :  { %p6761_p5 = scmp.ne.s32.totalorder %s40_s17, %s6760_s18  ;;  %p6766_p7 = scmp.lt.s32.totalorder %s6760_s18, %s6760_s18 }
  0x12   :  { %p6767_p8 = por %p6766_p7, %p6765_p6 }
  0x14   :  { %p6768_p9 = pnand %p6767_p8, %p6761_p5 }
  0x16   :  { %6771 = shalt.err (!%p6768_p9)
}
  0x17   :  { %45 = dma.hbm_to_vmem [thread:$0]  %s10069_s4, 16384, %s40_s17, [#allocation5], %s6777_s12, %s6777_s12, %s6778_s13  }
  0x18   :  { %6772 = dma.done.wait [#allocation3], 16384  }
  0x19   :  { %6773 = vsyncadd [#allocation3], 4294950912 }
  0x1a   :  { %6774 = dma.done.wait [#allocation5], 16384  }
  0x1b   :  { %6775 = vsyncadd [#allocation5], 4294950912  ;;  %v6173_v0 = vld [vmem:[#allocation2 + $0xe4] ss:$16 sps:$4 sm:$0xff]   ;;  %v6177_v2 = vld [vmem:[#allocation2 + $0xe0] ss:$16 sps:$4 sm:$0xff]  }
  0x1c   :  { %v6175_v1 = vld [vmem:[#allocation2 + $0x2e4] ss:$16 sps:$4 sm:$0xff]   ;;  %1235 = vmatprep.subr.bf16.mxu0 %v6173_v0  ;;  %v6178_v3 = vld [vmem:[#allocation2 + $0x2e0] ss:$16 sps:$4 sm:$0xff]   ;;  %v6274_v51 = vld [vmem:[%s10065_s0 + $0xc] ss:$16 sps:$4 sm:$0xff]  }
  0x1d   :  { %1428 = vmatprep.subr.bf16.mxu1 %v6175_v1  ;;  %v6179_v4 = vld [vmem:[#allocation2 + $0xc4] ss:$16 sps:$4 sm:$0xff]   ;;  %1236 = vmatpush1.bf16.msra.mxu0 %v6177_v2  ;;  %v6183_v6 = vld [vmem:[#allocation2 + $0xc0] ss:$16 sps:$4 sm:$0xff]   ;;  %v6277_v2 = vld [vmem:[#allocation2 + $0xec] ss:$16 sps:$4 sm:$0xff]  }
  0x1e   :  { %1429 = vmatpush1.bf16.msra.mxu1 %v6178_v3  ;;  %v6181_v5 = vld [vmem:[#allocation2 + $0x2c4] ss:$16 sps:$4 sm:$0xff]   ;;  %1237 = vmatprep.subr.bf16.mxu0 %v6179_v4  ;;  %v6184_v7 = vld [vmem:[#allocation2 + $0x2c0] ss:$16 sps:$4 sm:$0xff]   ;;  %v6280_v3 = vld [vmem:[#allocation2 + $0x2ec] ss:$16 sps:$4 sm:$0xff]  }
  0x1f   :  { %1430 = vmatprep.subr.bf16.mxu1 %v6181_v5  ;;  %v6185_v8 = vld [vmem:[#allocation2 + $0xa4] ss:$16 sps:$4 sm:$0xff]   ;;  %v6189_v10 = vld [vmem:[#allocation2 + $0xa0] ss:$16 sps:$4 sm:$0xff]   ;;  %1460 = vmatprep.mubr.bf16.mxu1 %v6274_v51  ;;  %v6272_v5 = vld [vmem:[%s10065_s0 + $0x8] ss:$16 sps:$4 sm:$0xff]  }
  0x20   :  { %v6187_v9 = vld [vmem:[#allocation2 + $0x2a4] ss:$16 sps:$4 sm:$0xff]   ;;  %v6190_v11 = vld [vmem:[#allocation2 + $0x2a0] ss:$16 sps:$4 sm:$0xff]   ;;  %v6362_v51 = vld [vmem:[#allocation2 + $0x208] ss:$16 sps:$4 sm:$0xff]  }
  0x21   :  { %1238 = vmatpush1.bf16.msra.mxu0 %v6183_v6  ;;  %v6191_v12 = vld [vmem:[#allocation2 + $0x84] ss:$16 sps:$4 sm:$0xff]   ;;  %v6195_v14 = vld [vmem:[#allocation2 + $0x80] ss:$16 sps:$4 sm:$0xff]   ;;  %v6275_v6 = vld [vmem:[#allocation2 + $0xe8] ss:$16 sps:$4 sm:$0xff]  }
  0x22   :  { %1431 = vmatpush1.bf16.msra.mxu1 %v6184_v7  ;;  %1239 = vmatprep.subr.bf16.mxu0 %v6185_v8  ;;  %v6193_v13 = vld [vmem:[#allocation2 + $0x284] ss:$16 sps:$4 sm:$0xff]   ;;  %v6196_v15 = vld [vmem:[#allocation2 + $0x280] ss:$16 sps:$4 sm:$0xff]   ;;  %v6278_v7 = vld [vmem:[#allocation2 + $0x2e8] ss:$16 sps:$4 sm:$0xff]  }
  0x23   :  { %1432 = vmatprep.subr.bf16.mxu1 %v6187_v9  ;;  %v6197_v16 = vld [vmem:[#allocation2 + $0x64] ss:$16 sps:$4 sm:$0xff]   ;;  %v6201_v18 = vld [vmem:[#allocation2 + $0x60] ss:$16 sps:$4 sm:$0xff]   ;;  %v6861_v9 = vld [vmem:[%s10065_s0 + $0x2c] ss:$16 sps:$4 sm:$0xff]  }
  0x24   :  { %v6199_v17 = vld [vmem:[#allocation2 + $0x264] ss:$16 sps:$4 sm:$0xff]   ;;  %v6202_v19 = vld [vmem:[#allocation2 + $0x260] ss:$16 sps:$4 sm:$0xff]   ;;  %s6784_s28 = smov 124   ;;  %s6785_s29 = smov 126  }
  0x25   :  { %1240 = vmatpush1.bf16.msra.mxu0 %v6189_v10  ;;  %v6203_v20 = vld [vmem:[#allocation2 + $0x44] ss:$16 sps:$4 sm:$0xff]   ;;  %v6207_v22 = vld [vmem:[#allocation2 + $0x40] ss:$16 sps:$4 sm:$0xff]   ;;  %v6289_v10 = vld [vmem:[#allocation2 + $0xcc] ss:$16 sps:$4 sm:$0xff]  }
  0x26   :  { %1433 = vmatpush1.bf16.msra.mxu1 %v6190_v11  ;;  %1241 = vmatprep.subr.bf16.mxu0 %v6191_v12  ;;  %v6205_v21 = vld [vmem:[#allocation2 + $0x244] ss:$16 sps:$4 sm:$0xff]   ;;  %v6208_v23 = vld [vmem:[#allocation2 + $0x240] ss:$16 sps:$4 sm:$0xff]   ;;  %v6292_v11 = vld [vmem:[#allocation2 + $0x2cc] ss:$16 sps:$4 sm:$0xff]  }
  0x27   :  { %1434 = vmatprep.subr.bf16.mxu1 %v6193_v13  ;;  %v6209_v24 = vld [vmem:[#allocation2 + $0x24] ss:$16 sps:$4 sm:$0xff]   ;;  %v6213_v26 = vld [vmem:[#allocation2 + $0x20] ss:$16 sps:$4 sm:$0xff]   ;;  %v6287_v12 = vld [vmem:[#allocation2 + $0xc8] ss:$16 sps:$4 sm:$0xff]  }
  0x28   :  { %v6211_v25 = vld [vmem:[#allocation2 + $0x224] ss:$16 sps:$4 sm:$0xff]   ;;  %v6214_v27 = vld [vmem:[#allocation2 + $0x220] ss:$16 sps:$4 sm:$0xff]   ;;  %v6290_v13 = vld [vmem:[#allocation2 + $0x2c8] ss:$16 sps:$4 sm:$0xff]  }
  0x29   :  { %1242 = vmatpush1.bf16.msra.mxu0 %v6195_v14  ;;  %v6215_v28 = vld [vmem:[#allocation2 + $0x4] ss:$16 sps:$4 sm:$0xff]   ;;  %v6219_v30 = vld [vmem:[#allocation2] ss:$16 sps:$4 sm:$0xff]   ;;  %v6301_v14 = vld [vmem:[#allocation2 + $0xac] ss:$16 sps:$4 sm:$0xff]  }
  0x2a   :  { %1435 = vmatpush1.bf16.msra.mxu1 %v6196_v15  ;;  %1243 = vmatprep.subr.bf16.mxu0 %v6197_v16  ;;  %v6217_v29 = vld [vmem:[#allocation2 + $0x204] ss:$16 sps:$4 sm:$0xff]   ;;  %v6220_v31 = vld [vmem:[#allocation2 + $0x200] ss:$16 sps:$4 sm:$0xff]   ;;  %v6304_v15 = vld [vmem:[#allocation2 + $0x2ac] ss:$16 sps:$4 sm:$0xff]  }
  0x2b   :  { %1436 = vmatprep.subr.bf16.mxu1 %v6199_v17  ;;  %v6221_v32 = vld [vmem:[#allocation2 + $0x1e4] ss:$16 sps:$4 sm:$0xff]   ;;  %v6225_v34 = vld [vmem:[#allocation2 + $0x1e0] ss:$16 sps:$4 sm:$0xff]   ;;  %v6286_v17 = vld [vmem:[%s10065_s0 + $0x28] ss:$16 sps:$4 sm:$0xff]  }
  0x2c   :  { %v6223_v33 = vld [vmem:[#allocation2 + $0x3e4] ss:$16 sps:$4 sm:$0xff]   ;;  %v6226_v35 = vld [vmem:[#allocation2 + $0x3e0] ss:$16 sps:$4 sm:$0xff]   ;;  %s6786_s30 = smov 122   ;;  %vm5537_vm0 = vcmask 15360  }
  0x2d   :  { %1244 = vmatpush1.bf16.msra.mxu0 %v6201_v18  ;;  %v6227_v36 = vld [vmem:[#allocation2 + $0x1c4] ss:$16 sps:$4 sm:$0xff]   ;;  %v6231_v38 = vld [vmem:[#allocation2 + $0x1c0] ss:$16 sps:$4 sm:$0xff]  }
  0x2e   :  { %1437 = vmatpush1.bf16.msra.mxu1 %v6202_v19  ;;  %1245 = vmatprep.subr.bf16.mxu0 %v6203_v20  ;;  %v6229_v37 = vld [vmem:[#allocation2 + $0x3c4] ss:$16 sps:$4 sm:$0xff]   ;;  %v6232_v39 = vld [vmem:[#allocation2 + $0x3c0] ss:$16 sps:$4 sm:$0xff]   ;;  %v6295_v19 = vld [vmem:[%s10065_s0 + $0x4c] ss:$16 sps:$4 sm:$0xff]  }
  0x2f   :  { %1438 = vmatprep.subr.bf16.mxu1 %v6205_v21  ;;  %v6233_v40 = vld [vmem:[#allocation2 + $0x1a4] ss:$16 sps:$4 sm:$0xff]   ;;  %v6237_v42 = vld [vmem:[#allocation2 + $0x1a0] ss:$16 sps:$4 sm:$0xff]   ;;  %v6299_v20 = vld [vmem:[#allocation2 + $0xa8] ss:$16 sps:$4 sm:$0xff]  }
  0x30   :  { %v6235_v41 = vld [vmem:[#allocation2 + $0x3a4] ss:$16 sps:$4 sm:$0xff]   ;;  %v6238_v43 = vld [vmem:[#allocation2 + $0x3a0] ss:$16 sps:$4 sm:$0xff]   ;;  %v6302_v21 = vld [vmem:[#allocation2 + $0x2a8] ss:$16 sps:$4 sm:$0xff]  }
  0x31   :  { %1246 = vmatpush1.bf16.msra.mxu0 %v6207_v22  ;;  %v6239_v44 = vld [vmem:[#allocation2 + $0x184] ss:$16 sps:$4 sm:$0xff]   ;;  %v6243_v46 = vld [vmem:[#allocation2 + $0x180] ss:$16 sps:$4 sm:$0xff]   ;;  %v6313_v22 = vld [vmem:[#allocation2 + $0x8c] ss:$16 sps:$4 sm:$0xff]  }
  0x32   :  { %1439 = vmatpush1.bf16.msra.mxu1 %v6208_v23  ;;  %1247 = vmatprep.subr.bf16.mxu0 %v6209_v24  ;;  %v6241_v45 = vld [vmem:[#allocation2 + $0x384] ss:$16 sps:$4 sm:$0xff]   ;;  %v6244_v47 = vld [vmem:[#allocation2 + $0x380] ss:$16 sps:$4 sm:$0xff]   ;;  %v6316_v23 = vld [vmem:[#allocation2 + $0x28c] ss:$16 sps:$4 sm:$0xff]  }
  0x33   :  { %1440 = vmatprep.subr.bf16.mxu1 %v6211_v25  ;;  %v6245_v48 = vld [vmem:[#allocation2 + $0x164] ss:$16 sps:$4 sm:$0xff]   ;;  %v6249_v52 = vld [vmem:[#allocation2 + $0x160] ss:$16 sps:$4 sm:$0xff]   ;;  %v6311_v24 = vld [vmem:[#allocation2 + $0x88] ss:$16 sps:$4 sm:$0xff]  }
  0x34   :  { %v6271_v49 = vld [vmem:[%s10065_s0 + $0x4] ss:$16 sps:$4 sm:$0xff]   ;;  %v6250_v53 = vld [vmem:[#allocation2 + $0x360] ss:$16 sps:$4 sm:$0xff]  }
  0x35   :  { %1248 = vmatpush1.bf16.msra.mxu0 %v6213_v26  ;;  %v6247_v50 = vld [vmem:[#allocation2 + $0x364] ss:$16 sps:$4 sm:$0xff]   ;;  %1267 = vmatprep.mubr.bf16.mxu0 %v6271_v49  ;;  %v6255_v56 = vld [vmem:[#allocation2 + $0x140] ss:$16 sps:$4 sm:$0xff]   ;;  %v6298_v26 = vld [vmem:[%s10065_s0 + $0x48] ss:$16 sps:$4 sm:$0xff]  }
  0x36   :  { %1441 = vmatpush1.bf16.msra.mxu1 %v6214_v27  ;;  %1249 = vmatprep.subr.bf16.mxu0 %v6215_v28  ;;  %v6251_v54 = vld [vmem:[#allocation2 + $0x144] ss:$16 sps:$4 sm:$0xff]   ;;  %v6256_v57 = vld [vmem:[#allocation2 + $0x340] ss:$16 sps:$4 sm:$0xff]   ;;  %v6314_v27 = vld [vmem:[#allocation2 + $0x288] ss:$16 sps:$4 sm:$0xff]  }
  0x37   :  { %1442 = vmatprep.subr.bf16.mxu1 %v6217_v29  ;;  %v6253_v55 = vld [vmem:[#allocation2 + $0x344] ss:$16 sps:$4 sm:$0xff]   ;;  %v6261_v60 = vld [vmem:[#allocation2 + $0x120] ss:$16 sps:$4 sm:$0xff]   ;;  %v6325_v28 = vld [vmem:[#allocation2 + $0x6c] ss:$16 sps:$4 sm:$0xff]  }
  0x38   :  { %v6257_v58 = vld [vmem:[#allocation2 + $0x124] ss:$16 sps:$4 sm:$0xff]   ;;  %v6262_v61 = vld [vmem:[#allocation2 + $0x320] ss:$16 sps:$4 sm:$0xff]   ;;  %v6328_v29 = vld [vmem:[#allocation2 + $0x26c] ss:$16 sps:$4 sm:$0xff]  }
  0x39   :  { %1250 = vmatpush1.bf16.msra.mxu0 %v6219_v30  ;;  %v6259_v59 = vld [vmem:[#allocation2 + $0x324] ss:$16 sps:$4 sm:$0xff]   ;;  %v6267_v0 = vld [vmem:[#allocation2 + $0x100] ss:$16 sps:$4 sm:$0xff]  }
  0x3a   :  { %1443 = vmatpush1.bf16.msra.mxu1 %v6220_v31  ;;  %1251 = vmatprep.subr.bf16.mxu0 %v6221_v32  ;;  %v6263_v62 = vld [vmem:[#allocation2 + $0x104] ss:$16 sps:$4 sm:$0xff]   ;;  %v6268_v1 = vld [vmem:[#allocation2 + $0x300] ss:$16 sps:$4 sm:$0xff]   ;;  %v6307_v31 = vld [vmem:[%s10065_s0 + $0x6c] ss:$16 sps:$4 sm:$0xff]  }
  0x3b   :  { %1444 = vmatprep.subr.bf16.mxu1 %v6223_v33  ;;  %v6265_v63 = vld [vmem:[#allocation2 + $0x304] ss:$16 sps:$4 sm:$0xff]   ;;  %v6269_v4 = vld [vmem:[%s10065_s0] ss:$16 sps:$4 sm:$0xff]   ;;  %v6323_v32 = vld [vmem:[#allocation2 + $0x68] ss:$16 sps:$4 sm:$0xff]  }
  0x3c   :  { %v6281_v8 = vld [vmem:[%s10065_s0 + $0x24] ss:$16 sps:$4 sm:$0xff]   ;;  %v6285_v16 = vld [vmem:[%s10065_s0 + $0x20] ss:$16 sps:$4 sm:$0xff]   ;;  %v6326_v33 = vld [vmem:[#allocation2 + $0x268] ss:$16 sps:$4 sm:$0xff]  }
  0x3d   :  { %1252 = vmatpush2.bf16.msra.mxu0 %v6225_v34  ;;  %v6293_v18 = vld [vmem:[%s10065_s0 + $0x44] ss:$16 sps:$4 sm:$0xff]   ;;  %v6297_v25 = vld [vmem:[%s10065_s0 + $0x40] ss:$16 sps:$4 sm:$0xff]   ;;  %v6337_v34 = vld [vmem:[#allocation2 + $0x4c] ss:$16 sps:$4 sm:$0xff]  }
  0x3e   :  { %1445 = vmatpush2.bf16.msra.mxu1 %v6226_v35  ;;  %1253 = vmatprep.subr.bf16.mxu0 %v6227_v36  ;;  %v6305_v30 = vld [vmem:[%s10065_s0 + $0x64] ss:$16 sps:$4 sm:$0xff]   ;;  %v6340_v35 = vld [vmem:[#allocation2 + $0x24c] ss:$16 sps:$4 sm:$0xff]   ;;  %v6335_v36 = vld [vmem:[#allocation2 + $0x48] ss:$16 sps:$4 sm:$0xff]  }
  0x3f   :  { %1446 = vmatprep.subr.bf16.mxu1 %v6229_v37  ;;  %v6338_v37 = vld [vmem:[#allocation2 + $0x248] ss:$16 sps:$4 sm:$0xff]   ;;  %v6912_v49 = vld [vmem:[%s10065_s0 + $0x80] ss:$16 sps:$4 sm:$0xff]  }
  0x41   :  { %1254 = vmatpush2.bf16.msra.mxu0 %v6231_v38  ;;  %v6309_v38 = vld [vmem:[%s10065_s0 + $0x60] ss:$16 sps:$4 sm:$0xff]  }
  0x42   :  { %1447 = vmatpush2.bf16.msra.mxu1 %v6232_v39  ;;  %1255 = vmatprep.subr.bf16.mxu0 %v6233_v40  ;;  %v6349_v39 = vld [vmem:[#allocation2 + $0x2c] ss:$16 sps:$4 sm:$0xff]  }
  0x43   :  { %1448 = vmatprep.subr.bf16.mxu1 %v6235_v41  ;;  %v6352_v40 = vld [vmem:[#allocation2 + $0x22c] ss:$16 sps:$4 sm:$0xff]   ;;  %v6894_v41 = vld [vmem:[%s10065_s0 + $0x68] ss:$16 sps:$4 sm:$0xff]  }
  0x45   :  { %1256 = vmatpush2.bf16.msra.mxu0 %v6237_v42  ;;  %v6899_v42 = vld [vmem:[%s10065_s0 + $0x84] ss:$16 sps:$4 sm:$0xff]  }
  0x46   :  { %1449 = vmatpush2.bf16.msra.mxu1 %v6238_v43  ;;  %1257 = vmatprep.subr.bf16.mxu0 %v6239_v44  ;;  %v6904_v43 = vld [vmem:[%s10065_s0 + $0x8c] ss:$16 sps:$4 sm:$0xff]   ;;  %v6347_v44 = vld [vmem:[#allocation2 + $0x28] ss:$16 sps:$4 sm:$0xff]  }
  0x47   :  { %1450 = vmatprep.subr.bf16.mxu1 %v6241_v45  ;;  %v6350_v45 = vld [vmem:[#allocation2 + $0x228] ss:$16 sps:$4 sm:$0xff]  }
  0x49   :  { %1258 = vmatpush2.bf16.msra.mxu0 %v6243_v46  ;;  %v6361_v46 = vld [vmem:[#allocation2 + $0xc] ss:$16 sps:$4 sm:$0xff]  }
  0x4a   :  { %1451 = vmatpush2.bf16.msra.mxu1 %v6244_v47  ;;  %1259 = vmatprep.subr.bf16.mxu0 %v6245_v48  ;;  %v6364_v47 = vld [vmem:[#allocation2 + $0x20c] ss:$16 sps:$4 sm:$0xff]   ;;  %v6359_v48 = vld [vmem:[#allocation2 + $0x8] ss:$16 sps:$4 sm:$0xff]  }
  0x4b   :  { %1452 = vmatprep.subr.bf16.mxu1 %v6247_v50  ;;  %v6917_v50 = vld [vmem:[%s10065_s0 + $0x88] ss:$16 sps:$4 sm:$0xff]  }
  0x4d   :  { %1260 = vmatpush2.bf16.msra.mxu0 %v6249_v52  ;;  %v6373_v52 = vld [vmem:[#allocation2 + $0x1ec] ss:$16 sps:$4 sm:$0xff]  }
  0x4e   :  { %1453 = vmatpush2.bf16.msra.mxu1 %v6250_v53  ;;  %1261 = vmatprep.subr.bf16.mxu0 %v6251_v54  ;;  %v6376_v53 = vld [vmem:[#allocation2 + $0x3ec] ss:$16 sps:$4 sm:$0xff]   ;;  %v6922_v54 = vld [vmem:[%s10065_s0 + $0xa4] ss:$16 sps:$4 sm:$0xff]  }
  0x4f   :  { %1454 = vmatprep.subr.bf16.mxu1 %v6253_v55  ;;  %v6927_v55 = vld [vmem:[%s10065_s0 + $0xac] ss:$16 sps:$4 sm:$0xff]  }
  0x51   :  { %1262 = vmatpush2.bf16.msra.mxu0 %v6255_v56  ;;  %v6371_v56 = vld [vmem:[#allocation2 + $0x1e8] ss:$16 sps:$4 sm:$0xff]  }
  0x52   :  { %1455 = vmatpush2.bf16.msra.mxu1 %v6256_v57  ;;  %1263 = vmatprep.subr.bf16.mxu0 %v6257_v58  ;;  %v6374_v57 = vld [vmem:[#allocation2 + $0x3e8] ss:$16 sps:$4 sm:$0xff]   ;;  %v6385_v58 = vld [vmem:[#allocation2 + $0x1cc] ss:$16 sps:$4 sm:$0xff]  }
  0x53   :  { %1456 = vmatprep.subr.bf16.mxu1 %v6259_v59  ;;  %v6388_v59 = vld [vmem:[#allocation2 + $0x3cc] ss:$16 sps:$4 sm:$0xff]  }
  0x55   :  { %1264 = vmatpush2.bf16.msra.mxu0 %v6261_v60  ;;  %v6383_v60 = vld [vmem:[#allocation2 + $0x1c8] ss:$16 sps:$4 sm:$0xff]  }
  0x56   :  { %1457 = vmatpush2.bf16.msra.mxu1 %v6262_v61  ;;  %1265 = vmatprep.subr.bf16.mxu0 %v6263_v62  ;;  %v6386_v61 = vld [vmem:[#allocation2 + $0x3c8] ss:$16 sps:$4 sm:$0xff]   ;;  %v6936_v62 = vld [vmem:[%s10065_s0 + $0xa0] ss:$16 sps:$4 sm:$0xff]  }
  0x57   :  { %1458 = vmatprep.subr.bf16.mxu1 %v6265_v63  ;;  %v6397_v63 = vld [vmem:[#allocation2 + $0x1ac] ss:$16 sps:$4 sm:$0xff]  }
  0x59   :  { %1266 = vmatpush2.bf16.msra.mxu0 %v6267_v0  ;;  %v6400_v0 = vld [vmem:[#allocation2 + $0x3ac] ss:$16 sps:$4 sm:$0xff]  }
  0x5a   :  { %1459 = vmatpush2.bf16.msra.mxu1 %v6268_v1  ;;  %1621 = vmatprep.subr.bf16.mxu0 %v6277_v2  ;;  %v6941_v1 = vld [vmem:[%s10065_s0 + $0xa8] ss:$16 sps:$4 sm:$0xff]   ;;  %v6946_v2 = vld [vmem:[%s10065_s0 + $0xc4] ss:$16 sps:$4 sm:$0xff]  }
  0x5b   :  { %1814 = vmatprep.subr.bf16.mxu1 %v6280_v3  ;;  %v6951_v3 = vld [vmem:[%s10065_s0 + $0xcc] ss:$16 sps:$4 sm:$0xff]  }
  0x5c   :  { %1268 = vmatmul.mubr.bf16.vlgmr.msra.gmra.mxu0 %v6269_v4  ;;  %v6395_v4 = vld [vmem:[#allocation2 + $0x1a8] ss:$16 sps:$4 sm:$0xff]  }
  0x5d   :  { %1461 = vmatmul.mubr.bf16.vlgmr.msra.gmra.mxu1 %v6272_v5  ;;  %1622 = vmatpush1.bf16.msra.mxu0 %v6275_v6  ;;  %v6398_v5 = vld [vmem:[#allocation2 + $0x3a8] ss:$16 sps:$4 sm:$0xff]   ;;  %v6409_v6 = vld [vmem:[#allocation2 + $0x18c] ss:$16 sps:$4 sm:$0xff]  }
  0x5e   :  { %1815 = vmatpush1.bf16.msra.mxu1 %v6278_v7  ;;  %1277 = vmatprep.mubr.bf16.mxu0 %v6281_v8  ;;  %v6412_v7 = vld [vmem:[#allocation2 + $0x38c] ss:$16 sps:$4 sm:$0xff]   ;;  %v6407_v8 = vld [vmem:[#allocation2 + $0x188] ss:$16 sps:$4 sm:$0xff]  }
  0x5f   :  { %1470 = vmatprep.mubr.bf16.mxu1 %v6861_v9  ;;  %1623 = vmatprep.subr.bf16.mxu0 %v6289_v10  ;;  %v6960_v10 = vld [vmem:[%s10065_s0 + $0xc0] ss:$16 sps:$4 sm:$0xff]  }
  0x60   :  { %1816 = vmatprep.subr.bf16.mxu1 %v6292_v11  ;;  %v6965_v11 = vld [vmem:[%s10065_s0 + $0xc8] ss:$16 sps:$4 sm:$0xff]  }
  0x61   :  { %1624 = vmatpush1.bf16.msra.mxu0 %v6287_v12  ;;  %v6410_v12 = vld [vmem:[#allocation2 + $0x388] ss:$16 sps:$4 sm:$0xff]  }
  0x62   :  { %1817 = vmatpush1.bf16.msra.mxu1 %v6290_v13  ;;  %1625 = vmatprep.subr.bf16.mxu0 %v6301_v14  ;;  %v6970_v13 = vld [vmem:[%s10065_s0 + $0xe4] ss:$16 sps:$4 sm:$0xff]   ;;  %v6421_v14 = vld [vmem:[#allocation2 + $0x16c] ss:$16 sps:$4 sm:$0xff]  }
  0x63   :  { %1818 = vmatprep.subr.bf16.mxu1 %v6304_v15  ;;  %v6975_v15 = vld [vmem:[%s10065_s0 + $0xec] ss:$16 sps:$4 sm:$0xff]  }
  0x64   :  { %1278 = vmatmul.mubr.bf16.gmra.mxu0 %v6285_v16  ;;  %v6424_v16 = vld [vmem:[#allocation2 + $0x36c] ss:$16 sps:$4 sm:$0xff]  }
  0x65   :  { %1471 = vmatmul.mubr.bf16.gmra.mxu1 %v6286_v17  ;;  %1287 = vmatprep.mubr.bf16.mxu0 %v6293_v18  ;;  %v6419_v17 = vld [vmem:[#allocation2 + $0x168] ss:$16 sps:$4 sm:$0xff]  }
  0x66   :  { %1480 = vmatprep.mubr.bf16.mxu1 %v6295_v19  ;;  %1626 = vmatpush1.bf16.msra.mxu0 %v6299_v20  ;;  %v6422_v18 = vld [vmem:[#allocation2 + $0x368] ss:$16 sps:$4 sm:$0xff]   ;;  %v6433_v20 = vld [vmem:[#allocation2 + $0x14c] ss:$16 sps:$4 sm:$0xff]  }
  0x67   :  { %1819 = vmatpush1.bf16.msra.mxu1 %v6302_v21  ;;  %1627 = vmatprep.subr.bf16.mxu0 %v6313_v22  ;;  %v6431_v19 = vld [vmem:[#allocation2 + $0x148] ss:$16 sps:$4 sm:$0xff]   ;;  %v6436_v22 = vld [vmem:[#allocation2 + $0x34c] ss:$16 sps:$4 sm:$0xff]  }
  0x68   :  { %1820 = vmatprep.subr.bf16.mxu1 %v6316_v23  ;;  %v6434_v21 = vld [vmem:[#allocation2 + $0x348] ss:$16 sps:$4 sm:$0xff]   ;;  %v6984_v23 = vld [vmem:[%s10065_s0 + $0xe0] ss:$16 sps:$4 sm:$0xff]  }
  0x6a   :  { %1628 = vmatpush1.bf16.msra.mxu0 %v6311_v24  ;;  %v6989_v24 = vld [vmem:[%s10065_s0 + $0xe8] ss:$16 sps:$4 sm:$0xff]  }
  0x6b   :  { %1821 = vmatpush1.bf16.msra.mxu1 %v6314_v27  ;;  %1629 = vmatprep.subr.bf16.mxu0 %v6325_v28  ;;  %v6443_v27 = vld [vmem:[#allocation2 + $0x128] ss:$16 sps:$4 sm:$0xff]   ;;  %v6445_v28 = vld [vmem:[#allocation2 + $0x12c] ss:$16 sps:$4 sm:$0xff]  }
  0x6c   :  { %1822 = vmatprep.subr.bf16.mxu1 %v6328_v29  ;;  %1288 = vmatmul.mubr.bf16.gmra.mxu0 %v6297_v25  ;;  %v6994_v25 = vld [vmem:[%s10065_s0 + $0x104] ss:$16 sps:$4 sm:$0xff]   ;;  %v6446_v29 = vld [vmem:[#allocation2 + $0x328] ss:$16 sps:$4 sm:$0xff]  }
  0x6d   :  { %1481 = vmatmul.mubr.bf16.gmra.mxu1 %v6298_v26  ;;  %1297 = vmatprep.mubr.bf16.mxu0 %v6305_v30  ;;  %v6999_v26 = vld [vmem:[%s10065_s0 + $0x10c] ss:$16 sps:$4 sm:$0xff]  }
  0x6e   :  { %1490 = vmatprep.mubr.bf16.mxu1 %v6307_v31  ;;  %1630 = vmatpush1.bf16.msra.mxu0 %v6323_v32  ;;  %v6448_v30 = vld [vmem:[#allocation2 + $0x32c] ss:$16 sps:$4 sm:$0xff]   ;;  %v7008_v31 = vld [vmem:[%s10065_s0 + $0x100] ss:$16 sps:$4 sm:$0xff]   ;;  %v7013_v32 = vld [vmem:[%s10065_s0 + $0x108] ss:$16 sps:$4 sm:$0xff]  }
  0x6f   :  { %1823 = vmatpush1.bf16.msra.mxu1 %v6326_v33  ;;  %1631 = vmatprep.subr.bf16.mxu0 %v6337_v34  ;;  %v7018_v33 = vld [vmem:[%s10065_s0 + $0x124] ss:$16 sps:$4 sm:$0xff]   ;;  %v6455_v34 = vld [vmem:[#allocation2 + $0x108] ss:$16 sps:$4 sm:$0xff]  }
  0x70   :  { %1824 = vmatprep.subr.bf16.mxu1 %v6340_v35  ;;  %v6457_v35 = vld [vmem:[#allocation2 + $0x10c] ss:$16 sps:$4 sm:$0xff]  }
  0x72   :  { %1632 = vmatpush1.bf16.msra.mxu0 %v6335_v36  ;;  %v6458_v36 = vld [vmem:[#allocation2 + $0x308] ss:$16 sps:$4 sm:$0xff]  }
  0x73   :  { %1825 = vmatpush1.bf16.msra.mxu1 %v6338_v37  ;;  %1633 = vmatprep.subr.bf16.mxu0 %v6349_v39  ;;  %v6460_v37 = vld [vmem:[#allocation2 + $0x30c] ss:$16 sps:$4 sm:$0xff]   ;;  %v6463_v39 = vld [vmem:[#allocation4 + $0xe4] ss:$16 sps:$4 sm:$0xff]  }
  0x74   :  { %1826 = vmatprep.subr.bf16.mxu1 %v6352_v40  ;;  %1298 = vmatmul.mubr.bf16.gmra.mxu0 %v6309_v38  ;;  %v7023_v38 = vld [vmem:[%s10065_s0 + $0x12c] ss:$16 sps:$4 sm:$0xff]   ;;  %v7032_v40 = vld [vmem:[%s10065_s0 + $0x120] ss:$16 sps:$4 sm:$0xff]  }
  0x75   :  { %1491 = vmatmul.mubr.bf16.gmra.mxu1 %v6894_v41  ;;  %1307 = vmatprep.mubr.bf16.mxu0 %v6899_v42 }
  0x76   :  { %1500 = vmatprep.mubr.bf16.mxu1 %v6904_v43  ;;  %1634 = vmatpush1.bf16.msra.mxu0 %v6347_v44  ;;  %v7037_v44 = vld [vmem:[%s10065_s0 + $0x128] ss:$16 sps:$4 sm:$0xff]  }
  0x77   :  { %1827 = vmatpush1.bf16.msra.mxu1 %v6350_v45  ;;  %1635 = vmatprep.subr.bf16.mxu0 %v6361_v46  ;;  %v7042_v45 = vld [vmem:[%s10065_s0 + $0x144] ss:$16 sps:$4 sm:$0xff]   ;;  %v7047_v46 = vld [vmem:[%s10065_s0 + $0x14c] ss:$16 sps:$4 sm:$0xff]  }
  0x78   :  { %1828 = vmatprep.subr.bf16.mxu1 %v6364_v47  ;;  %v7056_v47 = vld [vmem:[%s10065_s0 + $0x140] ss:$16 sps:$4 sm:$0xff]  }
  0x7a   :  { %1636 = vmatpush1.bf16.msra.mxu0 %v6359_v48  ;;  %v7061_v48 = vld [vmem:[%s10065_s0 + $0x148] ss:$16 sps:$4 sm:$0xff]  }
  0x7b   :  { %1829 = vmatpush1.bf16.msra.mxu1 %v6362_v51  ;;  %1637 = vmatprep.subr.bf16.mxu0 %v6373_v52  ;;  %v7066_v51 = vld [vmem:[%s10065_s0 + $0x164] ss:$16 sps:$4 sm:$0xff]   ;;  %v7071_v52 = vld [vmem:[%s10065_s0 + $0x16c] ss:$16 sps:$4 sm:$0xff]  }
  0x7c   :  { %1830 = vmatprep.subr.bf16.mxu1 %v6376_v53  ;;  %1308 = vmatmul.mubr.bf16.gmra.mxu0 %v6912_v49  ;;  %v7080_v53 = vld [vmem:[%s10065_s0 + $0x160] ss:$16 sps:$4 sm:$0xff]  }
  0x7d   :  { %1501 = vmatmul.mubr.bf16.gmra.mxu1 %v6917_v50  ;;  %1317 = vmatprep.mubr.bf16.mxu0 %v6922_v54 }
  0x7e   :  { %1510 = vmatprep.mubr.bf16.mxu1 %v6927_v55  ;;  %1638 = vmatpush2.bf16.msra.mxu0 %v6371_v56  ;;  %v7085_v56 = vld [vmem:[%s10065_s0 + $0x168] ss:$16 sps:$4 sm:$0xff]  }
  0x7f   :  { %1831 = vmatpush2.bf16.msra.mxu1 %v6374_v57  ;;  %1639 = vmatprep.subr.bf16.mxu0 %v6385_v58  ;;  %v7090_v57 = vld [vmem:[%s10065_s0 + $0x184] ss:$16 sps:$4 sm:$0xff]   ;;  %v7095_v58 = vld [vmem:[%s10065_s0 + $0x18c] ss:$16 sps:$4 sm:$0xff]  }
  0x80   :  { %1832 = vmatprep.subr.bf16.mxu1 %v6388_v59  ;;  %v6475_v59 = vld [vmem:[#allocation4 + $0x2e4] ss:$16 sps:$4 sm:$0xff]  }
  0x82   :  { %1640 = vmatpush2.bf16.msra.mxu0 %v6383_v60  ;;  %v7104_v60 = vld [vmem:[%s10065_s0 + $0x180] ss:$16 sps:$4 sm:$0xff]  }
  0x83   :  { %1833 = vmatpush2.bf16.msra.mxu1 %v6386_v61  ;;  %1641 = vmatprep.subr.bf16.mxu0 %v6397_v63  ;;  %v7109_v61 = vld [vmem:[%s10065_s0 + $0x188] ss:$16 sps:$4 sm:$0xff]   ;;  %v7114_v63 = vld [vmem:[%s10065_s0 + $0x1a4] ss:$16 sps:$4 sm:$0xff]  }
  0x84   :  { %1834 = vmatprep.subr.bf16.mxu1 %v6400_v0  ;;  %1318 = vmatmul.mubr.bf16.gmra.mxu0 %v6936_v62  ;;  %v7119_v0 = vld [vmem:[%s10065_s0 + $0x1ac] ss:$16 sps:$4 sm:$0xff]  }
  0x85   :  { %1511 = vmatmul.mubr.bf16.gmra.mxu1 %v6941_v1  ;;  %1327 = vmatprep.mubr.bf16.mxu0 %v6946_v2 }
  0x86   :  { %1520 = vmatprep.mubr.bf16.mxu1 %v6951_v3  ;;  %1642 = vmatpush2.bf16.msra.mxu0 %v6395_v4  ;;  %v7128_v4 = vld [vmem:[%s10065_s0 + $0x1a0] ss:$16 sps:$4 sm:$0xff]  }
  0x87   :  { %1835 = vmatpush2.bf16.msra.mxu1 %v6398_v5  ;;  %1643 = vmatprep.subr.bf16.mxu0 %v6409_v6  ;;  %v7133_v5 = vld [vmem:[%s10065_s0 + $0x1a8] ss:$16 sps:$4 sm:$0xff]   ;;  %v7138_v6 = vld [vmem:[%s10065_s0 + $0x1c4] ss:$16 sps:$4 sm:$0xff]  }
  0x88   :  { %1836 = vmatprep.subr.bf16.mxu1 %v6412_v7  ;;  %v7143_v7 = vld [vmem:[%s10065_s0 + $0x1cc] ss:$16 sps:$4 sm:$0xff]  }
  0x8a   :  { %1644 = vmatpush2.bf16.msra.mxu0 %v6407_v8  ;;  %v7152_v8 = vld [vmem:[%s10065_s0 + $0x1c0] ss:$16 sps:$4 sm:$0xff]  }
  0x8b   :  { %1837 = vmatpush2.bf16.msra.mxu1 %v6410_v12  ;;  %1645 = vmatprep.subr.bf16.mxu0 %v6421_v14  ;;  %v7157_v12 = vld [vmem:[%s10065_s0 + $0x1c8] ss:$16 sps:$4 sm:$0xff]   ;;  %v7162_v14 = vld [vmem:[%s10065_s0 + $0x1e4] ss:$16 sps:$4 sm:$0xff]  }
  0x8c   :  { %1838 = vmatprep.subr.bf16.mxu1 %v6424_v16  ;;  %1328 = vmatmul.mubr.bf16.gmra.mxu0 %v6960_v10  ;;  %v7167_v16 = vld [vmem:[%s10065_s0 + $0x1ec] ss:$16 sps:$4 sm:$0xff]  }
  0x8d   :  { %1521 = vmatmul.mubr.bf16.gmra.mxu1 %v6965_v11  ;;  %1337 = vmatprep.mubr.bf16.mxu0 %v6970_v13 }
  0x8e   :  { %1530 = vmatprep.mubr.bf16.mxu1 %v6975_v15  ;;  %1646 = vmatpush2.bf16.msra.mxu0 %v6419_v17  ;;  %v7176_v17 = vld [vmem:[%s10065_s0 + $0x1e0] ss:$16 sps:$4 sm:$0xff]  }
  0x8f   :  { %1839 = vmatpush2.bf16.msra.mxu1 %v6422_v18  ;;  %1647 = vmatprep.subr.bf16.mxu0 %v6433_v20  ;;  %v7181_v18 = vld [vmem:[%s10065_s0 + $0x1e8] ss:$16 sps:$4 sm:$0xff]   ;;  %v6686_v20 = vld [vmem:[%s10065_s0 + $0xc] ss:$16 sps:$4 sm:$0xff]  }
  0x90   :  { %1840 = vmatprep.subr.bf16.mxu1 %v6436_v22  ;;  %v6473_v22 = vld [vmem:[#allocation4 + $0x2e0] ss:$16 sps:$4 sm:$0xff]  }
  0x92   :  { %1648 = vmatpush2.bf16.msra.mxu0 %v6431_v19  ;;  %v6685_v19 = vld [vmem:[%s10065_s0 + $0x4] ss:$16 sps:$4 sm:$0xff]  }
  0x93   :  { %1841 = vmatpush2.bf16.msra.mxu1 %v6434_v21  ;;  %1649 = vmatprep.subr.bf16.mxu0 %v6445_v28  ;;  %v6461_v21 = vld [vmem:[#allocation4 + $0xe0] ss:$16 sps:$4 sm:$0xff]   ;;  %v6484_v28 = vld [vmem:[#allocation4 + $0x2c4] ss:$16 sps:$4 sm:$0xff]  }
  0x94   :  { %1338 = vmatmul.mubr.bf16.gmra.mxu0 %v6984_v23  ;;  %1842 = vmatprep.subr.bf16.mxu1 %v6448_v30  ;;  %v6688_v30 = vld [vmem:[%s10065_s0 + $0x8] ss:$16 sps:$4 sm:$0xff]  }
  0x95   :  { %1531 = vmatmul.mubr.bf16.gmra.mxu1 %v6989_v24  ;;  %1347 = vmatprep.mubr.bf16.mxu0 %v6994_v25 }
  0x96   :  { %1540 = vmatprep.mubr.bf16.mxu1 %v6999_v26  ;;  %1650 = vmatpush2.bf16.msra.mxu0 %v6443_v27  ;;  %v6466_v27 = vld [vmem:[#allocation4 + $0xc4] ss:$16 sps:$4 sm:$0xff]  }
  0x97   :  { %1843 = vmatpush2.bf16.msra.mxu1 %v6446_v29  ;;  %1651 = vmatprep.subr.bf16.mxu0 %v6457_v35  ;;  %v6687_v29 = vld [vmem:[%s10065_s0] ss:$16 sps:$4 sm:$0xff]  }
  0x98   :  { %1844 = vmatprep.subr.bf16.mxu1 %v6460_v37  ;;  %v6482_v35 = vld [vmem:[#allocation4 + $0x2c0] ss:$16 sps:$4 sm:$0xff]   ;;  %v6469_v37 = vld [vmem:[#allocation4 + $0xa4] ss:$16 sps:$4 sm:$0xff]  }
  0x9a   :  { %1652 = vmatpush2.bf16.msra.mxu0 %v6455_v34  ;;  %v6464_v34 = vld [vmem:[#allocation4 + $0xc0] ss:$16 sps:$4 sm:$0xff]  }
  0x9b   :  { %1845 = vmatpush2.bf16.msra.mxu1 %v6458_v36  ;;  %2861 = vmatprep.subr.bf16.mxu0 %v6463_v39  ;;  %v6689_v36 = vld [vmem:[%s10065_s0 + $0x24] ss:$16 sps:$4 sm:$0xff]  }
  0x9c   :  { %1348 = vmatmul.mubr.bf16.gmra.mxu0 %v7008_v31  ;;  %3054 = vmatprep.subr.bf16.mxu1 %v6475_v59  ;;  %v6493_v39 = vld [vmem:[#allocation4 + $0x2a4] ss:$16 sps:$4 sm:$0xff]   ;;  %v6467_v59 = vld [vmem:[#allocation4 + $0xa0] ss:$16 sps:$4 sm:$0xff]  }
  0x9d   :  { %1541 = vmatmul.mubr.bf16.gmra.mxu1 %v7013_v32  ;;  %1357 = vmatprep.mubr.bf16.mxu0 %v7018_v33 }
  0x9e   :  { %1550 = vmatprep.mubr.bf16.mxu1 %v7023_v38 }
  0xa4   :  { %1358 = vmatmul.mubr.bf16.gmra.mxu0 %v7032_v40 }
  0xa5   :  { %1551 = vmatmul.mubr.bf16.gmra.mxu1 %v7037_v44  ;;  %1367 = vmatprep.mubr.bf16.mxu0 %v7042_v45 }
  0xa6   :  { %1560 = vmatprep.mubr.bf16.mxu1 %v7047_v46 }
  0xac   :  { %1368 = vmatmul.mubr.bf16.gmra.mxu0 %v7056_v47 }
  0xad   :  { %1561 = vmatmul.mubr.bf16.gmra.mxu1 %v7061_v48  ;;  %1377 = vmatprep.mubr.bf16.mxu0 %v7066_v51 }
  0xae   :  { %1570 = vmatprep.mubr.bf16.mxu1 %v7071_v52 }
  0xb4   :  { %1378 = vmatmul.mubr.bf16.gmra.mxu0 %v7080_v53 }
  0xb5   :  { %1571 = vmatmul.mubr.bf16.gmra.mxu1 %v7085_v56  ;;  %1387 = vmatprep.mubr.bf16.mxu0 %v7090_v57 }
  0xb6   :  { %1580 = vmatprep.mubr.bf16.mxu1 %v7095_v58 }
  0xbc   :  { %1388 = vmatmul.mubr.bf16.gmra.mxu0 %v7104_v60 }
  0xbd   :  { %1581 = vmatmul.mubr.bf16.gmra.mxu1 %v7109_v61  ;;  %1397 = vmatprep.mubr.bf16.mxu0 %v7114_v63 }
  0xbe   :  { %1590 = vmatprep.mubr.bf16.mxu1 %v7119_v0 }
  0xc4   :  { %1398 = vmatmul.mubr.bf16.gmra.mxu0 %v7128_v4 }
  0xc5   :  { %1591 = vmatmul.mubr.bf16.gmra.mxu1 %v7133_v5  ;;  %1407 = vmatprep.mubr.bf16.mxu0 %v7138_v6 }
  0xc6   :  { %1600 = vmatprep.mubr.bf16.mxu1 %v7143_v7 }
  0xcc   :  { %1408 = vmatmul.mubr.bf16.gmra.mxu0 %v7152_v8 }
  0xcd   :  { %1601 = vmatmul.mubr.bf16.gmra.mxu1 %v7157_v12  ;;  %1417 = vmatprep.mubr.bf16.mxu0 %v7162_v14 }
  0xce   :  { %1610 = vmatprep.mubr.bf16.mxu1 %v7167_v16 }
  0xd4   :  { %1418 = vmatmul.mubr.bf16.gmra.mxu0 %v7176_v17 }
  0xd5   :  { %1611 = vmatmul.mubr.bf16.gmra.mxu1 %v7181_v18  ;;  %1653 = vmatprep.mubr.bf16.mxu0 %v6685_v19  ;;  %v6491_v19 = vld [vmem:[#allocation4 + $0x2a0] ss:$16 sps:$4 sm:$0xff]  }
  0xd6   :  { %1846 = vmatprep.mubr.bf16.mxu1 %v6686_v20  ;;  %v6472_v20 = vld [vmem:[#allocation4 + $0x84] ss:$16 sps:$4 sm:$0xff]  }
  0xdc   :  { %1654 = vmatmul.mubr.bf16.vlgmr.msra.gmra.mxu0 %v6687_v29  ;;  %v6502_v29 = vld [vmem:[#allocation4 + $0x284] ss:$16 sps:$4 sm:$0xff]  }
  0xdd   :  { %1847 = vmatmul.mubr.bf16.vlgmr.msra.gmra.mxu1 %v6688_v30  ;;  %1663 = vmatprep.mubr.bf16.mxu0 %v6689_v36  ;;  %v6690_v30 = vld [vmem:[%s10065_s0 + $0x20] ss:$16 sps:$4 sm:$0xff]  }
  0xde   :  { %1856 = vmatprep.mubr.bf16.mxu1 %v6861_v9  ;;  %2862 = vmatpush1.bf16.msra.mxu0 %v6461_v21  ;;  %v6691_v9 = vld [vmem:[%s10065_s0 + $0x28] ss:$16 sps:$4 sm:$0xff]   ;;  %v6470_v21 = vld [vmem:[#allocation4 + $0x80] ss:$16 sps:$4 sm:$0xff]  }
  0xdf   :  { %3055 = vmatpush1.bf16.msra.mxu1 %v6473_v22  ;;  %2863 = vmatprep.subr.bf16.mxu0 %v6466_v27  ;;  %v6500_v22 = vld [vmem:[#allocation4 + $0x280] ss:$16 sps:$4 sm:$0xff]   ;;  %v6692_v27 = vld [vmem:[%s10065_s0 + $0x44] ss:$16 sps:$4 sm:$0xff]  }
  0xe0   :  { %3056 = vmatprep.subr.bf16.mxu1 %v6484_v28  ;;  %v6693_v28 = vld [vmem:[%s10065_s0 + $0x4c] ss:$16 sps:$4 sm:$0xff]   ;;  %v6476_v36 = vld [vmem:[#allocation4 + $0x60] ss:$16 sps:$4 sm:$0xff]  }
  0xe2   :  { %2864 = vmatpush1.bf16.msra.mxu0 %v6464_v34  ;;  %v6478_v34 = vld [vmem:[#allocation4 + $0x64] ss:$16 sps:$4 sm:$0xff]  }
  0xe3   :  { %3057 = vmatpush1.bf16.msra.mxu1 %v6482_v35  ;;  %2865 = vmatprep.subr.bf16.mxu0 %v6469_v37  ;;  %v6511_v35 = vld [vmem:[#allocation4 + $0x264] ss:$16 sps:$4 sm:$0xff]   ;;  %v6509_v37 = vld [vmem:[#allocation4 + $0x260] ss:$16 sps:$4 sm:$0xff]  }
  0xe4   :  { %3058 = vmatprep.subr.bf16.mxu1 %v6493_v39  ;;  %1664 = vmatmul.mubr.bf16.gmra.mxu0 %v6690_v30  ;;  %v6481_v39 = vld [vmem:[#allocation4 + $0x44] ss:$16 sps:$4 sm:$0xff]  }
  0xe5   :  { %1857 = vmatmul.mubr.bf16.gmra.mxu1 %v6691_v9  ;;  %1673 = vmatprep.mubr.bf16.mxu0 %v6692_v27  ;;  %v6520_v30 = vld [vmem:[#allocation4 + $0x244] ss:$16 sps:$4 sm:$0xff]   ;;  %v6694_v9 = vld [vmem:[%s10065_s0 + $0x40] ss:$16 sps:$4 sm:$0xff]  }
  0xe6   :  { %1866 = vmatprep.mubr.bf16.mxu1 %v6693_v28  ;;  %2866 = vmatpush1.bf16.msra.mxu0 %v6467_v59  ;;  %v6695_v59 = vld [vmem:[%s10065_s0 + $0x48] ss:$16 sps:$4 sm:$0xff]   ;;  %v6529_v27 = vld [vmem:[#allocation4 + $0x224] ss:$16 sps:$4 sm:$0xff]   ;;  %v6485_v28 = vld [vmem:[#allocation4 + $0x20] ss:$16 sps:$4 sm:$0xff]  }
  0xe7   :  { %3059 = vmatpush1.bf16.msra.mxu1 %v6491_v19  ;;  %2867 = vmatprep.subr.bf16.mxu0 %v6472_v20  ;;  %v6696_v19 = vld [vmem:[%s10065_s0 + $0x64] ss:$16 sps:$4 sm:$0xff]   ;;  %v6697_v20 = vld [vmem:[%s10065_s0 + $0x6c] ss:$16 sps:$4 sm:$0xff]  }
  0xe8   :  { %3060 = vmatprep.subr.bf16.mxu1 %v6502_v29  ;;  %v6479_v29 = vld [vmem:[#allocation4 + $0x40] ss:$16 sps:$4 sm:$0xff]  }
  0xea   :  { %2868 = vmatpush1.bf16.msra.mxu0 %v6470_v21  ;;  %v6518_v21 = vld [vmem:[#allocation4 + $0x240] ss:$16 sps:$4 sm:$0xff]  }
  0xeb   :  { %3061 = vmatpush1.bf16.msra.mxu1 %v6500_v22  ;;  %2869 = vmatprep.subr.bf16.mxu0 %v6478_v34  ;;  %v6487_v22 = vld [vmem:[#allocation4 + $0x24] ss:$16 sps:$4 sm:$0xff]   ;;  %v6527_v34 = vld [vmem:[#allocation4 + $0x220] ss:$16 sps:$4 sm:$0xff]  }
  0xec   :  { %3062 = vmatprep.subr.bf16.mxu1 %v6511_v35  ;;  %1674 = vmatmul.mubr.bf16.gmra.mxu0 %v6694_v9  ;;  %v6490_v35 = vld [vmem:[#allocation4 + $0x4] ss:$16 sps:$4 sm:$0xff]  }
  0xed   :  { %1867 = vmatmul.mubr.bf16.gmra.mxu1 %v6695_v59  ;;  %1683 = vmatprep.mubr.bf16.mxu0 %v6696_v19  ;;  %v6532_v9 = vld [vmem:[#allocation4 + $0x204] ss:$16 sps:$4 sm:$0xff]   ;;  %v6698_v59 = vld [vmem:[%s10065_s0 + $0x60] ss:$16 sps:$4 sm:$0xff]  }
  0xee   :  { %1876 = vmatprep.mubr.bf16.mxu1 %v6697_v20  ;;  %2870 = vmatpush1.bf16.msra.mxu0 %v6476_v36  ;;  %v6488_v36 = vld [vmem:[#allocation4] ss:$16 sps:$4 sm:$0xff]  }
  0xef   :  { %3063 = vmatpush1.bf16.msra.mxu1 %v6509_v37  ;;  %2871 = vmatprep.subr.bf16.mxu0 %v6481_v39  ;;  %v6530_v37 = vld [vmem:[#allocation4 + $0x200] ss:$16 sps:$4 sm:$0xff]   ;;  %v6496_v39 = vld [vmem:[#allocation4 + $0x1e4] ss:$16 sps:$4 sm:$0xff]  }
  0xf0   :  { %3064 = vmatprep.subr.bf16.mxu1 %v6520_v30  ;;  %v6535_v30 = vld [vmem:[#allocation4 + $0x3e4] ss:$16 sps:$4 sm:$0xff]   ;;  %v6494_v19 = vld [vmem:[#allocation4 + $0x1e0] ss:$16 sps:$4 sm:$0xff]  }
  0xf1   :  { %v6533_v20 = vld [vmem:[#allocation4 + $0x3e0] ss:$16 sps:$4 sm:$0xff]  }
  0xf2   :  { %2872 = vmatpush1.bf16.msra.mxu0 %v6479_v29  ;;  %v6499_v29 = vld [vmem:[#allocation4 + $0x1c4] ss:$16 sps:$4 sm:$0xff]  }
  0xf3   :  { %3065 = vmatpush1.bf16.msra.mxu1 %v6518_v21  ;;  %2873 = vmatprep.subr.bf16.mxu0 %v6487_v22  ;;  %v6505_v21 = vld [vmem:[#allocation4 + $0x1a4] ss:$16 sps:$4 sm:$0xff]  }
  0xf4   :  { %3066 = vmatprep.subr.bf16.mxu1 %v6529_v27  ;;  %1684 = vmatmul.mubr.bf16.gmra.mxu0 %v6698_v59  ;;  %v6541_v22 = vld [vmem:[#allocation4 + $0x3a4] ss:$16 sps:$4 sm:$0xff]   ;;  %v6503_v27 = vld [vmem:[#allocation4 + $0x1a0] ss:$16 sps:$4 sm:$0xff]  }
  0xf5   :  { %1877 = vmatmul.mubr.bf16.gmra.mxu1 %v6894_v41  ;;  %1693 = vmatprep.mubr.bf16.mxu0 %v6899_v42  ;;  %v6538_v41 = vld [vmem:[#allocation4 + $0x3c4] ss:$16 sps:$4 sm:$0xff]   ;;  %v6497_v42 = vld [vmem:[#allocation4 + $0x1c0] ss:$16 sps:$4 sm:$0xff]  }
  0xf6   :  { %1886 = vmatprep.mubr.bf16.mxu1 %v6904_v43  ;;  %2874 = vmatpush1.bf16.msra.mxu0 %v6485_v28  ;;  %v6536_v43 = vld [vmem:[#allocation4 + $0x3c0] ss:$16 sps:$4 sm:$0xff]  }
  0xf7   :  { %3067 = vmatpush1.bf16.msra.mxu1 %v6527_v34  ;;  %2875 = vmatprep.subr.bf16.mxu0 %v6490_v35  ;;  %v6539_v28 = vld [vmem:[#allocation4 + $0x3a0] ss:$16 sps:$4 sm:$0xff]   ;;  %v6544_v34 = vld [vmem:[#allocation4 + $0x384] ss:$16 sps:$4 sm:$0xff]  }
  0xf8   :  { %3068 = vmatprep.subr.bf16.mxu1 %v6532_v9  ;;  %v6512_v35 = vld [vmem:[#allocation4 + $0x160] ss:$16 sps:$4 sm:$0xff]   ;;  %v6517_v9 = vld [vmem:[#allocation4 + $0x144] ss:$16 sps:$4 sm:$0xff]  }
  0xf9   :  { %v6521_v59 = vld [vmem:[#allocation4 + $0x120] ss:$16 sps:$4 sm:$0xff]  }
  0xfa   :  { %2876 = vmatpush1.bf16.msra.mxu0 %v6488_v36  ;;  %v6526_v36 = vld [vmem:[#allocation4 + $0x104] ss:$16 sps:$4 sm:$0xff]  }
  0xfb   :  { %3069 = vmatpush1.bf16.msra.mxu1 %v6530_v37  ;;  %2877 = vmatprep.subr.bf16.mxu0 %v6496_v39 }
  0xfc   :  { %3070 = vmatprep.subr.bf16.mxu1 %v6535_v30  ;;  %1694 = vmatmul.mubr.bf16.gmra.mxu0 %v6912_v49  ;;  %v6508_v49 = vld [vmem:[#allocation4 + $0x184] ss:$16 sps:$4 sm:$0xff]  }
  0xfd   :  { %1887 = vmatmul.mubr.bf16.gmra.mxu1 %v6917_v50  ;;  %1703 = vmatprep.mubr.bf16.mxu0 %v6922_v54  ;;  %v6506_v50 = vld [vmem:[#allocation4 + $0x180] ss:$16 sps:$4 sm:$0xff]   ;;  %v6514_v54 = vld [vmem:[#allocation4 + $0x164] ss:$16 sps:$4 sm:$0xff]  }
  0xfe   :  { %1896 = vmatprep.mubr.bf16.mxu1 %v6927_v55  ;;  %2878 = vmatpush2.bf16.msra.mxu0 %v6494_v19  ;;  %v6542_v55 = vld [vmem:[#allocation4 + $0x380] ss:$16 sps:$4 sm:$0xff]  }
  0xff   :  { %3071 = vmatpush2.bf16.msra.mxu1 %v6533_v20  ;;  %2879 = vmatprep.subr.bf16.mxu0 %v6499_v29  ;;  %v6560_v29 = vld [vmem:[#allocation4 + $0x300] ss:$16 sps:$4 sm:$0xff]  }
 0x100   :  { %3072 = vmatprep.subr.bf16.mxu1 %v6538_v41 }
 0x102   :  { %2880 = vmatpush2.bf16.msra.mxu0 %v6497_v42 }
 0x103   :  { %3073 = vmatpush2.bf16.msra.mxu1 %v6536_v43  ;;  %2881 = vmatprep.subr.bf16.mxu0 %v6505_v21 }
 0x104   :  { %3074 = vmatprep.subr.bf16.mxu1 %v6541_v22  ;;  %1704 = vmatmul.mubr.bf16.gmra.mxu0 %v6936_v62  ;;  %v6515_v62 = vld [vmem:[#allocation4 + $0x140] ss:$16 sps:$4 sm:$0xff]  }
 0x105   :  { %1897 = vmatmul.mubr.bf16.gmra.mxu1 %v6941_v1  ;;  %1713 = vmatprep.mubr.bf16.mxu0 %v6946_v2  ;;  %v6523_v1 = vld [vmem:[#allocation4 + $0x124] ss:$16 sps:$4 sm:$0xff]   ;;  %v6545_v2 = vld [vmem:[#allocation4 + $0x360] ss:$16 sps:$4 sm:$0xff]  }
 0x106   :  { %1906 = vmatprep.mubr.bf16.mxu1 %v6951_v3  ;;  %2882 = vmatpush2.bf16.msra.mxu0 %v6503_v27  ;;  %v6547_v3 = vld [vmem:[#allocation4 + $0x364] ss:$16 sps:$4 sm:$0xff]  }
 0x107   :  { %3075 = vmatpush2.bf16.msra.mxu1 %v6539_v28  ;;  %2883 = vmatprep.subr.bf16.mxu0 %v6508_v49  ;;  %v6571_v28 = vld [vmem:[#allocation4 + $0x2ec] ss:$16 sps:$4 sm:$0xff]  }
 0x108   :  { %3076 = vmatprep.subr.bf16.mxu1 %v6544_v34 }
 0x10a   :  { %2884 = vmatpush2.bf16.msra.mxu0 %v6506_v50 }
 0x10b   :  { %3077 = vmatpush2.bf16.msra.mxu1 %v6542_v55  ;;  %2885 = vmatprep.subr.bf16.mxu0 %v6514_v54 }
 0x10c   :  { %1714 = vmatmul.mubr.bf16.gmra.mxu0 %v6960_v10  ;;  %3078 = vmatprep.subr.bf16.mxu1 %v6547_v3  ;;  %v6524_v10 = vld [vmem:[#allocation4 + $0x100] ss:$16 sps:$4 sm:$0xff]  }
 0x10d   :  { %1907 = vmatmul.mubr.bf16.gmra.mxu1 %v6965_v11  ;;  %1723 = vmatprep.mubr.bf16.mxu0 %v6970_v13  ;;  %v6548_v11 = vld [vmem:[#allocation4 + $0x340] ss:$16 sps:$4 sm:$0xff]   ;;  %v6550_v13 = vld [vmem:[#allocation4 + $0x344] ss:$16 sps:$4 sm:$0xff]  }
 0x10e   :  { %1916 = vmatprep.mubr.bf16.mxu1 %v6975_v15  ;;  %2886 = vmatpush2.bf16.msra.mxu0 %v6512_v35  ;;  %v6556_v15 = vld [vmem:[#allocation4 + $0xec] ss:$16 sps:$4 sm:$0xff]  }
 0x10f   :  { %2887 = vmatprep.subr.bf16.mxu0 %v6517_v9  ;;  %3079 = vmatpush2.bf16.msra.mxu1 %v6545_v2 }
 0x110   :  { %3080 = vmatprep.subr.bf16.mxu1 %v6550_v13  ;;  %v7365_v13 = vld [vmem:[%s10068_s3] sm:$0xf] }
 0x111   :  { %10147 = vst [vmem:[#allocation9_spill] sm:$0xff] %v7365_v13 }
 0x112   :  { %2888 = vmatpush2.bf16.msra.mxu0 %v6515_v62 }
 0x113   :  { %2889 = vmatprep.subr.bf16.mxu0 %v6523_v1  ;;  %3081 = vmatpush2.bf16.msra.mxu1 %v6548_v11 }
 0x114   :  { %1724 = vmatmul.mubr.bf16.gmra.mxu0 %v6984_v23 }
 0x115   :  { %1917 = vmatmul.mubr.bf16.gmra.mxu1 %v6989_v24  ;;  %1733 = vmatprep.mubr.bf16.mxu0 %v6994_v25  ;;  %v6551_v25 = vld [vmem:[#allocation4 + $0x320] ss:$16 sps:$4 sm:$0xff]  }
 0x116   :  { %1926 = vmatprep.mubr.bf16.mxu1 %v6999_v26  ;;  %2890 = vmatpush2.bf16.msra.mxu0 %v6521_v59  ;;  %v6553_v26 = vld [vmem:[#allocation4 + $0x324] ss:$16 sps:$4 sm:$0xff]  }
 0x117   :  { %2891 = vmatprep.subr.bf16.mxu0 %v6526_v36  ;;  %3082 = vmatprep.subr.bf16.mxu1 %v6553_v26 }
 0x118   :  { %3083 = vmatpush2.bf16.msra.mxu1 %v6551_v25 }
 0x11a   :  { %2892 = vmatpush2.bf16.msra.mxu0 %v6524_v10 }
 0x11b   :  { %3247 = vmatprep.subr.bf16.mxu0 %v6556_v15 }
 0x11c   :  { %v7247_v37 = vpop.f32.mrf.mxu0  ;;  %1734 = vmatmul.mubr.bf16.gmra.mxu0 %v7008_v31 }
 0x11d   :  { %v7249_v39 = vpop.f32.mrf.mxu1  ;;  %1927 = vmatmul.mubr.bf16.gmra.mxu1 %v7013_v32  ;;  %1743 = vmatprep.mubr.bf16.mxu0 %v7018_v33 }
 0x11e   :  { %1936 = vmatprep.mubr.bf16.mxu1 %v7023_v38  ;;  %v7255_v23 = vpop.f32.mrf.mxu0  ;;  %v6562_v38 = vld [vmem:[#allocation4 + $0x304] ss:$16 sps:$4 sm:$0xff]  }
 0x11f   :  { %v7257_v24 = vpop.f32.mrf.mxu1  ;;  %3084 = vmatprep.subr.bf16.mxu1 %v6562_v38 }
 0x120   :  { %v7259_v30 = vpop.f32.mrf.mxu0  ;;  %3085 = vmatpush2.bf16.msra.mxu1 %v6560_v29 }
 0x121   :  { %v7261_v19 = vpop.f32.mrf.mxu1  ;;  %3440 = vmatprep.subr.bf16.mxu1 %v6571_v28 }
 0x122   :  { %v7263_v20 = vpop.f32.mrf.mxu0 }
 0x123   :  { %v7265_v31 = vpop.f32.mrf.mxu1 }
 0x124   :  { %v7267_v32 = vpop.f32.mrf.mxu0  ;;  %1744 = vmatmul.mubr.bf16.gmra.mxu0 %v7032_v40 }
 0x125   :  { %v7269_v33 = vpop.f32.mrf.mxu1  ;;  %1937 = vmatmul.mubr.bf16.gmra.mxu1 %v7037_v44  ;;  %1753 = vmatprep.mubr.bf16.mxu0 %v7042_v45 }
 0x126   :  { %1946 = vmatprep.mubr.bf16.mxu1 %v7047_v46  ;;  %v7275_v41 = vpop.f32.mrf.mxu0 }
 0x127   :  { %v7277_v42 = vpop.f32.mrf.mxu1 }
 0x128   :  { %v7279_v43 = vpop.f32.mrf.mxu0 }
 0x129   :  { %v7281_v21 = vpop.f32.mrf.mxu1 }
 0x12a   :  { %v7283_v22 = vpop.f32.mrf.mxu0 }
 0x12b   :  { %v7285_v40 = vpop.f32.mrf.mxu1 }
 0x12c   :  { %v7287_v44 = vpop.f32.mrf.mxu0  ;;  %1754 = vmatmul.mubr.bf16.gmra.mxu0 %v7056_v47 }
 0x12d   :  { %v7289_v45 = vpop.f32.mrf.mxu1  ;;  %1947 = vmatmul.mubr.bf16.gmra.mxu1 %v7061_v48  ;;  %1763 = vmatprep.mubr.bf16.mxu0 %v7066_v51 }
 0x12e   :  { %1956 = vmatprep.mubr.bf16.mxu1 %v7071_v52  ;;  %v7295_v46 = vpop.f32.mrf.mxu0 }
 0x12f   :  { %v7297_v27 = vpop.f32.mrf.mxu1 }
 0x130   :  { %v7299_v49 = vpop.f32.mrf.mxu0 }
 0x131   :  { %v7301_v50 = vpop.f32.mrf.mxu1 }
 0x132   :  { %v7303_v54 = vpop.f32.mrf.mxu0 }
 0x133   :  { %v7305_v55 = vpop.f32.mrf.mxu1 }
 0x134   :  { %v7307_v47 = vpop.f32.mrf.mxu0  ;;  %1764 = vmatmul.mubr.bf16.gmra.mxu0 %v7080_v53 }
 0x135   :  { %v7309_v48 = vpop.f32.mrf.mxu1  ;;  %1957 = vmatmul.mubr.bf16.gmra.mxu1 %v7085_v56  ;;  %1773 = vmatprep.mubr.bf16.mxu0 %v7090_v57 }
 0x136   :  { %1966 = vmatprep.mubr.bf16.mxu1 %v7095_v58  ;;  %v7315_v51 = vpop.f32.mrf.mxu0  ;;  %v255_v58 = vlaneseq }
 0x137   :  { %v7317_v52 = vpop.f32.mrf.mxu1 }
 0x138   :  { %v7319_v34 = vpop.f32.mrf.mxu0 }
 0x139   :  { %v7321_v35 = vpop.f32.mrf.mxu1 }
 0x13a   :  { %v7323_v9 = vpop.f32.mrf.mxu0 }
 0x13b   :  { %v7325_v62 = vpop.f32.mrf.mxu1 }
 0x13c   :  { %v7327_v1 = vpop.f32.mrf.mxu0  ;;  %1774 = vmatmul.mubr.bf16.gmra.mxu0 %v7104_v60  ;;  %v7347_v60 = vshrl.u32 %v255_v58, 7 }
 0x13d   :  { %v7329_v53 = vpop.f32.mrf.mxu1  ;;  %1967 = vmatmul.mubr.bf16.gmra.mxu1 %v7109_v61  ;;  %1783 = vmatprep.mubr.bf16.mxu0 %v7114_v63 }
 0x13e   :  { %1976 = vmatprep.mubr.bf16.mxu1 %v7119_v0  ;;  %v7335_v56 = vpop.f32.mrf.mxu0  ;;  %10146 = vst [vmem:[#allocation8_spill] sm:$0xff] %v7347_v60  ;;  %v10075_v0 = vsub.s32 1, %v7347_v60  ;;  %v10076_v26 = vsub.s32 0, %v7347_v60  ;;  %v6554_v60 = vld [vmem:[#allocation4 + $0xe8] ss:$16 sps:$4 sm:$0xff]  }
 0x13f   :  { %v7337_v57 = vpop.f32.mrf.mxu1 }
 0x140   :  { %v7339_v2 = vpop.f32.mrf.mxu0 }
 0x141   :  { %v7341_v3 = vpop.f32.mrf.mxu1 }
 0x142   :  { %v7343_v59 = vpop.f32.mrf.mxu0 }
 0x143   :  { %v7345_v36 = vpop.f32.mrf.mxu1 }
 0x144   :  { %v7349_v61 = vpop.f32.mrf.mxu0  ;;  %1784 = vmatmul.mubr.bf16.gmra.mxu0 %v7128_v4 }
 0x145   :  { %v7351_v63 = vpop.f32.mrf.mxu1  ;;  %1977 = vmatmul.mubr.bf16.gmra.mxu1 %v7133_v5  ;;  %1793 = vmatprep.mubr.bf16.mxu0 %v7138_v6  ;;  %v7374_v5 = vrot.slane %v7365_v13, %v10075_v0 }
 0x146   :  { %1986 = vmatprep.mubr.bf16.mxu1 %v7143_v7  ;;  %v7358_v10 = vpop.f32.mrf.mxu0 }
 0x147   :  { %v7360_v11 = vpop.f32.mrf.mxu1  ;;  %v1276_v25 = vadd.f32 %v7263_v20, %v7374_v5  ;;  %v1272_v28 = vadd.f32 %v7255_v23, %v7374_v5 }
 0x148   :  { %v7367_v15 = vpop.f32.mrf.mxu0 }
 0x149   :  { %v7369_v4 = vpop.f32.mrf.mxu1  ;;  %v1469_v0 = vadd.f32 %v7265_v31, %v1276_v25  ;;  %v1465_v23 = vadd.f32 %v7257_v24, %v1272_v28  ;;  %v1286_v31 = vadd.f32 %v7283_v22, %v7374_v5  ;;  %v1282_v24 = vadd.f32 %v7275_v41, %v7374_v5 }
 0x14a   :  { %v7376_v6 = vpop.f32.mrf.mxu0 }
 0x14b   :  { %v7378_v7 = vpop.f32.mrf.mxu1 }
 0x14c   :  { %v7383_v38 = vpop.f32.mrf.mxu0  ;;  %1794 = vmatmul.mubr.bf16.gmra.mxu0 %v7152_v8 }
 0x14d   :  { %10148 = vst [vmem:[#allocation10_spill] sm:$0xff] %v7383_v38  ;;  %v7385_v29 = vpop.f32.mrf.mxu1  ;;  %1987 = vmatmul.mubr.bf16.gmra.mxu1 %v7157_v12  ;;  %1803 = vmatprep.mubr.bf16.mxu0 %v7162_v14 }
 0x14e   :  { %10149 = vst [vmem:[#allocation11_spill] sm:$0xff] %v7385_v29  ;;  %1996 = vmatprep.mubr.bf16.mxu1 %v7167_v16  ;;  %v7393_v58 = vpop.f32.mrf.mxu0  ;;  %v7401_v29 = vrot.slane %v7365_v13, %v10076_v26 }
 0x14f   :  { %v7395_v20 = vpop.f32.mrf.mxu1 }
 0x150   :  { %10150 = vst [vmem:[#allocation12_spill] sm:$0xff] %v7395_v20  ;;  %v7403_v8 = vpop.f32.mrf.mxu0  ;;  %v1274_v14 = vadd.f32 %v7259_v30, %v7401_v29  ;;  %v7414_v20 = vpack.c.bf16 %v1469_v0, %v1465_v23  ;;  %v1270_v25 = vadd.f32 %v7247_v37, %v7401_v29  ;;  %v1479_v37 = vadd.f32 %v7285_v40, %v1286_v31 }
 0x151   :  { %v7405_v12 = vpop.f32.mrf.mxu1  ;;  %v1280_v31 = vadd.f32 %v7267_v32, %v7401_v29  ;;  %v6565_v32 = vld [vmem:[#allocation4 + $0xac] ss:$16 sps:$4 sm:$0xff]  }
 0x152   :  { %v7410_v16 = vpop.f32.mrf.mxu0  ;;  %10151 = vst [vmem:[#allocation13_spill] sm:$0xff] %v7414_v20  ;;  %v1467_v30 = vadd.f32 %v7261_v19, %v1274_v14  ;;  %v1463_v28 = vadd.f32 %v7249_v39, %v1270_v25  ;;  %v1284_v19 = vadd.f32 %v7279_v43, %v7401_v29  ;;  %v1296_v39 = vadd.f32 %v7303_v54, %v7374_v5 }
 0x153   :  { %v7412_v38 = vpop.f32.mrf.mxu1  ;;  %v1292_v43 = vadd.f32 %v7295_v46, %v7374_v5 }
 0x154   :  { %v7420_v26 = vpop.f32.mrf.mxu0  ;;  %1804 = vmatmul.mubr.bf16.gmra.mxu0 %v7176_v17  ;;  %v7441_v41 = vpack.c.bf16 %v1467_v30, %v1463_v28  ;;  %v1477_v30 = vadd.f32 %v7281_v21, %v1284_v19  ;;  %v1489_v28 = vadd.f32 %v7305_v55, %v1296_v39  ;;  %v1294_v21 = vadd.f32 %v7299_v49, %v7401_v29  ;;  %v6568_v55 = vld [vmem:[#allocation4 + $0x8c] ss:$16 sps:$4 sm:$0xff]  }
 0x155   :  { %v7422_v13 = vpop.f32.mrf.mxu1  ;;  %1997 = vmatmul.mubr.bf16.gmra.mxu1 %v7181_v18  ;;  %2893 = vmatprep.mubr.bf16.mxu0 %v7414_v20  ;;  %v1475_v18 = vadd.f32 %v7277_v42, %v1282_v24  ;;  %v6557_v24 = vld [vmem:[#allocation4 + $0xc8] ss:$16 sps:$4 sm:$0xff]   ;;  %v1485_v46 = vadd.f32 %v7297_v27, %v1292_v43  ;;  %v1306_v39 = vadd.f32 %v7323_v9, %v7374_v5 }
 0x156   :  { %10152 = vst [vmem:[#allocation14_spill] sm:$0xff] %v7422_v13  ;;  %v7430_v0 = vpop.f32.mrf.mxu0  ;;  %10153 = vst [vmem:[#allocation15_spill] sm:$0xff] %v7441_v41  ;;  %v6559_v13 = vld [vmem:[#allocation4 + $0xcc] ss:$16 sps:$4 sm:$0xff]   ;;  %v1290_v27 = vadd.f32 %v7287_v44, %v7401_v29  ;;  %v1302_v49 = vadd.f32 %v7315_v51, %v7374_v5 }
 0x157   :  { %v7432_v22 = vpop.f32.mrf.mxu1  ;;  %v7449_v40 = vpack.c.bf16 %v1479_v37, %v1475_v18  ;;  %v1473_v18 = vadd.f32 %v7269_v33, %v1280_v31  ;;  %v7483_v33 = vpack.c.bf16 %v1489_v28, %v1485_v46  ;;  %v6574_v44 = vld [vmem:[#allocation4 + $0x6c] ss:$16 sps:$4 sm:$0xff]   ;;  %v1499_v28 = vadd.f32 %v7325_v62, %v1306_v39 }
 0x158   :  { %v7436_v23 = vpop.f32.mrf.mxu0  ;;  %v1495_v51 = vadd.f32 %v7317_v52, %v1302_v49  ;;  %v6577_v62 = vld [vmem:[#allocation4 + $0x4c] ss:$16 sps:$4 sm:$0xff]   ;;  %v1316_v39 = vadd.f32 %v7343_v59, %v7374_v5  ;;  %v1300_v52 = vadd.f32 %v7307_v47, %v7401_v29 }
 0x159   :  { %v7438_v17 = vpop.f32.mrf.mxu1  ;;  %10154 = vst [vmem:[#allocation16_spill] sm:$0xff] %v7449_v40  ;;  %10157 = vst [vmem:[#allocation19_spill] sm:$0xff] %v7483_v33  ;;  %v6583_v47 = vld [vmem:[#allocation4 + $0x2c] ss:$16 sps:$4 sm:$0xff]  }
 0x15a   :  { %v7445_v14 = vpop.f32.mrf.mxu0 }
 0x15b   :  { %v7447_v20 = vpop.f32.mrf.mxu1 }
 0x15c   :  { %v7455_v42 = vpop.f32.mrf.mxu0  ;;  %2894 = vmatmul.mubr.bf16.vlgmr.msra.gmra.mxu0 %v7441_v41 }
 0x15d   :  { %v7457_v25 = vpop.f32.mrf.mxu1  ;;  %2903 = vmatprep.mubr.bf16.mxu0 %v7449_v40  ;;  %3248 = vmatpush1.bf16.msra.mxu0 %v6554_v60  ;;  %v6563_v60 = vld [vmem:[#allocation4 + $0xa8] ss:$16 sps:$4 sm:$0xff]   ;;  %v7475_v40 = vpack.c.bf16 %v1477_v30, %v1473_v18  ;;  %v1487_v30 = vadd.f32 %v7301_v50, %v1294_v21  ;;  %v1483_v18 = vadd.f32 %v7289_v45, %v1290_v27 }
 0x15e   :  { %10155 = vst [vmem:[#allocation17_spill] sm:$0xff] %v7457_v25  ;;  %v7464_v37 = vpop.f32.mrf.mxu0  ;;  %3249 = vmatprep.subr.bf16.mxu0 %v6559_v13  ;;  %v1304_v50 = vadd.f32 %v7319_v34, %v7401_v29  ;;  %v7517_v45 = vpack.c.bf16 %v1499_v28, %v1495_v51  ;;  %v1312_v34 = vadd.f32 %v7335_v56, %v7374_v5 }
 0x15f   :  { %v7466_v54 = vpop.f32.mrf.mxu1  ;;  %10156 = vst [vmem:[#allocation18_spill] sm:$0xff] %v7475_v40  ;;  %v1509_v28 = vadd.f32 %v7345_v36, %v1316_v39  ;;  %v6586_v36 = vld [vmem:[#allocation4 + $0xc] ss:$16 sps:$4 sm:$0xff]   ;;  %v1326_v39 = vadd.f32 %v7376_v6, %v7374_v5 }
 0x160   :  { %v7470_v41 = vpop.f32.mrf.mxu0  ;;  %10159 = vst [vmem:[#allocation21_spill] sm:$0xff] %v7517_v45  ;;  %v1505_v56 = vadd.f32 %v7337_v57, %v1312_v34  ;;  %v1310_v57 = vadd.f32 %v7327_v1, %v7401_v29  ;;  %v6592_v1 = vld [vmem:[#allocation4 + $0x1ec] ss:$16 sps:$4 sm:$0xff]  }
 0x161   :  { %v7472_v25 = vpop.f32.mrf.mxu1  ;;  %3250 = vmatpush1.bf16.msra.mxu0 %v6557_v24  ;;  %v6566_v24 = vld [vmem:[#allocation4 + $0x88] ss:$16 sps:$4 sm:$0xff]  }
 0x162   :  { %v7479_v19 = vpop.f32.mrf.mxu0  ;;  %3251 = vmatprep.subr.bf16.mxu0 %v6565_v32 }
 0x163   :  { %v7481_v13 = vpop.f32.mrf.mxu1 }
 0x164   :  { %v7489_v31 = vpop.f32.mrf.mxu0  ;;  %2904 = vmatmul.mubr.bf16.gmra.mxu0 %v7475_v40 }
 0x165   :  { %v7491_v43 = vpop.f32.mrf.mxu1  ;;  %2913 = vmatprep.mubr.bf16.mxu0 %v7483_v33  ;;  %3252 = vmatpush1.bf16.msra.mxu0 %v6563_v60  ;;  %v6572_v60 = vld [vmem:[#allocation4 + $0x68] ss:$16 sps:$4 sm:$0xff]   ;;  %v7509_v33 = vpack.c.bf16 %v1487_v30, %v1483_v18  ;;  %v1497_v30 = vadd.f32 %v7321_v35, %v1304_v50  ;;  %v1493_v18 = vadd.f32 %v7309_v48, %v1300_v52 }
 0x166   :  { %v7498_v32 = vpop.f32.mrf.mxu0  ;;  %3253 = vmatprep.subr.bf16.mxu0 %v6568_v55  ;;  %v1314_v35 = vadd.f32 %v7339_v2, %v7401_v29  ;;  %v7551_v48 = vpack.c.bf16 %v1509_v28, %v1505_v56  ;;  %v1322_v2 = vadd.f32 %v7358_v10, %v7374_v5  ;;  %v1519_v28 = vadd.f32 %v7378_v7, %v1326_v39  ;;  %v6595_v7 = vld [vmem:[#allocation4 + $0x1cc] ss:$16 sps:$4 sm:$0xff]  }
 0x167   :  { %v7500_v9 = vpop.f32.mrf.mxu1  ;;  %10158 = vst [vmem:[#allocation20_spill] sm:$0xff] %v7509_v33  ;;  %v1336_v39 = vadd.f32 %v7410_v16, %v7374_v5 }
 0x168   :  { %v7504_v46 = vpop.f32.mrf.mxu0  ;;  %10161 = vst [vmem:[#allocation23_spill] sm:$0xff] %v7551_v48  ;;  %v1515_v10 = vadd.f32 %v7360_v11, %v1322_v2  ;;  %v1320_v11 = vadd.f32 %v7349_v61, %v7401_v29  ;;  %v6601_v61 = vld [vmem:[#allocation4 + $0x1ac] ss:$16 sps:$4 sm:$0xff]  }
 0x169   :  { %v7506_v40 = vpop.f32.mrf.mxu1  ;;  %3254 = vmatpush1.bf16.msra.mxu0 %v6566_v24  ;;  %v6575_v24 = vld [vmem:[#allocation4 + $0x48] ss:$16 sps:$4 sm:$0xff]  }
 0x16a   :  { %v7513_v21 = vpop.f32.mrf.mxu0  ;;  %3255 = vmatprep.subr.bf16.mxu0 %v6574_v44 }
 0x16b   :  { %v7515_v55 = vpop.f32.mrf.mxu1 }
 0x16c   :  { %v7523_v27 = vpop.f32.mrf.mxu0  ;;  %2914 = vmatmul.mubr.bf16.gmra.mxu0 %v7509_v33 }
 0x16d   :  { %v7525_v49 = vpop.f32.mrf.mxu1  ;;  %2923 = vmatprep.mubr.bf16.mxu0 %v7517_v45  ;;  %3256 = vmatpush1.bf16.msra.mxu0 %v6572_v60  ;;  %v6581_v60 = vld [vmem:[#allocation4 + $0x28] ss:$16 sps:$4 sm:$0xff]   ;;  %v7543_v45 = vpack.c.bf16 %v1497_v30, %v1493_v18  ;;  %v1507_v30 = vadd.f32 %v7341_v3, %v1314_v35  ;;  %v1503_v18 = vadd.f32 %v7329_v53, %v1310_v57 }
 0x16e   :  { %v7532_v44 = vpop.f32.mrf.mxu0  ;;  %3257 = vmatprep.subr.bf16.mxu0 %v6577_v62  ;;  %v1324_v3 = vadd.f32 %v7367_v15, %v7401_v29  ;;  %v7585_v53 = vpack.c.bf16 %v1519_v28, %v1515_v10  ;;  %v1332_v15 = vadd.f32 %v7393_v58, %v7374_v5  ;;  %v1529_v28 = vadd.f32 %v7412_v38, %v1336_v39  ;;  %v10165_v58 = vld [vmem:[#allocation12_spill] sm:$0xff]  ;;  %v6604_v38 = vld [vmem:[#allocation4 + $0x18c] ss:$16 sps:$4 sm:$0xff]  }
 0x16f   :  { %v7534_v59 = vpop.f32.mrf.mxu1  ;;  %10160 = vst [vmem:[#allocation22_spill] sm:$0xff] %v7543_v45  ;;  %v1346_v39 = vadd.f32 %v7445_v14, %v7374_v5 }
 0x170   :  { %v7538_v51 = vpop.f32.mrf.mxu0  ;;  %10163 = vst [vmem:[#allocation25_spill] sm:$0xff] %v7585_v53 }
 0x171   :  { %v7540_v33 = vpop.f32.mrf.mxu1  ;;  %3258 = vmatpush1.bf16.msra.mxu0 %v6575_v24  ;;  %v6584_v24 = vld [vmem:[#allocation4 + $0x8] ss:$16 sps:$4 sm:$0xff]  }
 0x172   :  { %v7547_v50 = vpop.f32.mrf.mxu0  ;;  %3259 = vmatprep.subr.bf16.mxu0 %v6583_v47 }
 0x173   :  { %v7549_v62 = vpop.f32.mrf.mxu1 }
 0x174   :  { %v7557_v52 = vpop.f32.mrf.mxu0  ;;  %2924 = vmatmul.mubr.bf16.gmra.mxu0 %v7543_v45 }
 0x175   :  { %v7559_v34 = vpop.f32.mrf.mxu1  ;;  %2933 = vmatprep.mubr.bf16.mxu0 %v7551_v48  ;;  %3260 = vmatpush1.bf16.msra.mxu0 %v6581_v60  ;;  %v6590_v60 = vld [vmem:[#allocation4 + $0x1e8] ss:$16 sps:$4 sm:$0xff]   ;;  %v7577_v48 = vpack.c.bf16 %v1507_v30, %v1503_v18  ;;  %v1517_v30 = vadd.f32 %v7369_v4, %v1324_v3  ;;  %v1513_v18 = vadd.f32 %v7351_v63, %v1320_v11  ;;  %v10168_v11 = vld [vmem:[#allocation10_spill] sm:$0xff] }
 0x176   :  { %v7566_v47 = vpop.f32.mrf.mxu0  ;;  %3261 = vmatprep.subr.bf16.mxu0 %v6586_v36  ;;  %v1334_v4 = vadd.f32 %v7403_v8, %v7401_v29  ;;  %v1342_v8 = vadd.f32 %v7430_v0, %v7374_v5 }
 0x177   :  { %v7568_v6 = vpop.f32.mrf.mxu1  ;;  %10162 = vst [vmem:[#allocation24_spill] sm:$0xff] %v7577_v48 }
 0x178   :  { %v7572_v56 = vpop.f32.mrf.mxu0  ;;  %v1535_v0 = vadd.f32 %v7432_v22, %v1342_v8  ;;  %v1340_v22 = vadd.f32 %v7420_v26, %v7401_v29  ;;  %v6619_v26 = vld [vmem:[#allocation4 + $0x12c] ss:$16 sps:$4 sm:$0xff]  }
 0x179   :  { %v7574_v45 = vpop.f32.mrf.mxu1  ;;  %3262 = vmatpush1.bf16.msra.mxu0 %v6584_v24  ;;  %v6593_v24 = vld [vmem:[#allocation4 + $0x1c8] ss:$16 sps:$4 sm:$0xff]  }
 0x17a   :  { %v7581_v35 = vpop.f32.mrf.mxu0  ;;  %3263 = vmatprep.subr.bf16.mxu0 %v6592_v1 }
 0x17b   :  { %v7583_v36 = vpop.f32.mrf.mxu1 }
 0x17c   :  { %v7591_v57 = vpop.f32.mrf.mxu0  ;;  %2934 = vmatmul.mubr.bf16.gmra.mxu0 %v7577_v48 }
 0x17d   :  { %v7593_v2 = vpop.f32.mrf.mxu1  ;;  %2943 = vmatprep.mubr.bf16.mxu0 %v7585_v53  ;;  %3264 = vmatpush2.bf16.msra.mxu0 %v6590_v60  ;;  %v1525_v53 = vadd.f32 %v10165_v58, %v1332_v15  ;;  %v6599_v60 = vld [vmem:[#allocation4 + $0x1a8] ss:$16 sps:$4 sm:$0xff]   ;;  %v1330_v15 = vadd.f32 %v10168_v11, %v7401_v29  ;;  %v1539_v58 = vadd.f32 %v7447_v20, %v1346_v39  ;;  %v6613_v20 = vld [vmem:[#allocation4 + $0x14c] ss:$16 sps:$4 sm:$0xff]  }
 0x17e   :  { %10164 = vst [vmem:[#allocation26_spill] sm:$0xff] %v7593_v2  ;;  %v7600_v1 = vpop.f32.mrf.mxu0  ;;  %3265 = vmatprep.subr.bf16.mxu0 %v6595_v7  ;;  %v7611_v2 = vpack.c.bf16 %v1517_v30, %v1513_v18  ;;  %v6610_v18 = vld [vmem:[#allocation4 + $0x16c] ss:$16 sps:$4 sm:$0xff]  }
 0x17f   :  { %v7602_v16 = vpop.f32.mrf.mxu1  ;;  %v7619_v63 = vpack.c.bf16 %v1529_v28, %v1525_v53  ;;  %v6602_v53 = vld [vmem:[#allocation4 + $0x188] ss:$16 sps:$4 sm:$0xff]   ;;  %v7653_v39 = vpack.c.bf16 %v1539_v58, %v1535_v0 }
 0x180   :  { %v7606_v10 = vpop.f32.mrf.mxu0  ;;  %10166 = vst [vmem:[#allocation12_spill] sm:$0xff] %v7611_v2  ;;  %v10171_v11 = vld [vmem:[#allocation11_spill] sm:$0xff] }
 0x181   :  { %v7608_v48 = vpop.f32.mrf.mxu1  ;;  %3266 = vmatpush2.bf16.msra.mxu0 %v6593_v24  ;;  %10167 = vst [vmem:[#allocation27_spill] sm:$0xff] %v7619_v63  ;;  %10173 = vst [vmem:[#allocation29_spill] sm:$0xff] %v7653_v39 }
 0x182   :  { %v7615_v3 = vpop.f32.mrf.mxu0  ;;  %3267 = vmatprep.subr.bf16.mxu0 %v6601_v61  ;;  %v1527_v61 = vadd.f32 %v7405_v12, %v1334_v4  ;;  %v1344_v12 = vadd.f32 %v7436_v23, %v7401_v29  ;;  %v1352_v23 = vadd.f32 %v7464_v37, %v7374_v5 }
 0x183   :  { %v7617_v7 = vpop.f32.mrf.mxu1 }
 0x184   :  { %v7625_v24 = vpop.f32.mrf.mxu0  ;;  %2944 = vmatmul.mubr.bf16.gmra.mxu0 %v7611_v2  ;;  %v1545_v37 = vadd.f32 %v7466_v54, %v1352_v23  ;;  %v1350_v54 = vadd.f32 %v7455_v42, %v7401_v29 }
 0x185   :  { %10169 = vst [vmem:[#allocation10_spill] sm:$0xff] %v7625_v24  ;;  %v7627_v30 = vpop.f32.mrf.mxu1  ;;  %2953 = vmatprep.mubr.bf16.mxu0 %v7619_v63  ;;  %3268 = vmatpush2.bf16.msra.mxu0 %v6599_v60  ;;  %v6608_v60 = vld [vmem:[#allocation4 + $0x168] ss:$16 sps:$4 sm:$0xff]  }
 0x186   :  { %10170 = vst [vmem:[#allocation28_spill] sm:$0xff] %v7627_v30  ;;  %v7634_v28 = vpop.f32.mrf.mxu0  ;;  %3269 = vmatprep.subr.bf16.mxu0 %v6604_v38  ;;  %v1523_v30 = vadd.f32 %v10171_v11, %v1330_v15  ;;  %v1356_v15 = vadd.f32 %v7479_v19, %v7374_v5  ;;  %v10175_v11 = vld [vmem:[#allocation14_spill] sm:$0xff] }
 0x187   :  { %v7636_v14 = vpop.f32.mrf.mxu1  ;;  %v1533_v0 = vadd.f32 %v10175_v11, %v1340_v22  ;;  %v1366_v22 = vadd.f32 %v7513_v21, %v7374_v5  ;;  %v10180_v11 = vld [vmem:[#allocation17_spill] sm:$0xff] }
 0x188   :  { %v7640_v2 = vpop.f32.mrf.mxu0  ;;  %v7645_v63 = vpack.c.bf16 %v1527_v61, %v1523_v30  ;;  %v1537_v61 = vadd.f32 %v7438_v17, %v1344_v12  ;;  %v1549_v58 = vadd.f32 %v7481_v13, %v1356_v15  ;;  %v1354_v17 = vadd.f32 %v7470_v41, %v7401_v29  ;;  %v6622_v13 = vld [vmem:[#allocation4 + $0x10c] ss:$16 sps:$4 sm:$0xff]  }
 0x189   :  { %v7642_v24 = vpop.f32.mrf.mxu1  ;;  %3270 = vmatpush2.bf16.msra.mxu0 %v6602_v53  ;;  %v6611_v53 = vld [vmem:[#allocation4 + $0x148] ss:$16 sps:$4 sm:$0xff]   ;;  %v1362_v41 = vadd.f32 %v7498_v32, %v7374_v5  ;;  %v1559_v42 = vadd.f32 %v7515_v55, %v1366_v22 }
 0x18a   :  { %10172 = vst [vmem:[#allocation11_spill] sm:$0xff] %v7645_v63  ;;  %v7649_v4 = vpop.f32.mrf.mxu0  ;;  %3271 = vmatprep.subr.bf16.mxu0 %v6610_v18  ;;  %v7687_v15 = vpack.c.bf16 %v1549_v58, %v1545_v37 }
 0x18b   :  { %v7651_v38 = vpop.f32.mrf.mxu1  ;;  %v1555_v32 = vadd.f32 %v7500_v9, %v1362_v41  ;;  %v1360_v9 = vadd.f32 %v7489_v31, %v7401_v29 }
 0x18c   :  { %v7659_v8 = vpop.f32.mrf.mxu0  ;;  %2954 = vmatmul.mubr.bf16.gmra.mxu0 %v7645_v63  ;;  %10177 = vst [vmem:[#allocation31_spill] sm:$0xff] %v7687_v15 }
 0x18d   :  { %v7661_v30 = vpop.f32.mrf.mxu1  ;;  %2963 = vmatprep.mubr.bf16.mxu0 %v7653_v39  ;;  %3272 = vmatpush2.bf16.msra.mxu0 %v6608_v60  ;;  %v6617_v60 = vld [vmem:[#allocation4 + $0x128] ss:$16 sps:$4 sm:$0xff]   ;;  %v7679_v39 = vpack.c.bf16 %v1537_v61, %v1533_v0  ;;  %v1543_v0 = vadd.f32 %v10180_v11, %v1350_v54  ;;  %v7723_v22 = vpack.c.bf16 %v1559_v42, %v1555_v32 }
 0x18e   :  { %10174 = vst [vmem:[#allocation30_spill] sm:$0xff] %v7661_v30  ;;  %v7668_v18 = vpop.f32.mrf.mxu0  ;;  %3273 = vmatprep.subr.bf16.mxu0 %v6613_v20  ;;  %v6620_v61 = vld [vmem:[#allocation4 + $0x108] ss:$16 sps:$4 sm:$0xff]   ;;  %v1376_v54 = vadd.f32 %v7547_v50, %v7374_v5 }
 0x18f   :  { %v7670_v19 = vpop.f32.mrf.mxu1  ;;  %10176 = vst [vmem:[#allocation14_spill] sm:$0xff] %v7679_v39  ;;  %10184 = vst [vmem:[#allocation35_spill] sm:$0xff] %v7723_v22 }
 0x190   :  { %v7674_v63 = vpop.f32.mrf.mxu0  ;;  %v1569_v32 = vadd.f32 %v7549_v62, %v1376_v54  ;;  %v1370_v54 = vadd.f32 %v7523_v27, %v7401_v29 }
 0x191   :  { %v7676_v30 = vpop.f32.mrf.mxu1  ;;  %3274 = vmatpush2.bf16.msra.mxu0 %v6611_v53 }
 0x192   :  { %v7683_v12 = vpop.f32.mrf.mxu0  ;;  %3275 = vmatprep.subr.bf16.mxu0 %v6619_v26  ;;  %v1547_v26 = vadd.f32 %v7472_v25, %v1354_v17  ;;  %v1364_v25 = vadd.f32 %v7504_v46, %v7401_v29  ;;  %v1372_v46 = vadd.f32 %v7532_v44, %v7374_v5  ;;  %v1553_v44 = vadd.f32 %v7491_v43, %v1360_v9 }
 0x193   :  { %v7685_v20 = vpop.f32.mrf.mxu1  ;;  %v1386_v43 = vadd.f32 %v7581_v35, %v7374_v5 }
 0x194   :  { %v7693_v23 = vpop.f32.mrf.mxu0  ;;  %2964 = vmatmul.mubr.bf16.gmra.mxu0 %v7679_v39  ;;  %v1557_v11 = vadd.f32 %v7506_v40, %v1364_v25  ;;  %v1374_v25 = vadd.f32 %v7538_v51, %v7401_v29  ;;  %v1382_v51 = vadd.f32 %v7566_v47, %v7374_v5 }
 0x195   :  { %10178 = vst [vmem:[#allocation32_spill] sm:$0xff] %v7693_v23  ;;  %v7695_v53 = vpop.f32.mrf.mxu1  ;;  %2973 = vmatprep.mubr.bf16.mxu0 %v7687_v15  ;;  %3276 = vmatpush2.bf16.msra.mxu0 %v6617_v60  ;;  %v10182_v15 = vld [vmem:[#allocation8_spill] sm:$0xff] }
 0x196   :  { %10179 = vst [vmem:[#allocation33_spill] sm:$0xff] %v7695_v53  ;;  %v7702_v58 = vpop.f32.mrf.mxu0  ;;  %3277 = vmatprep.subr.bf16.mxu0 %v6622_v13  ;;  %v10100_v60 = vsub.s32 3, %v10182_v15  ;;  %v7714_v53 = vpack.c.bf16 %v1547_v26, %v1543_v0  ;;  %v10101_v55 = vsub.s32 2, %v10182_v15  ;;  %v10185_v26 = vld [vmem:[#allocation9_spill] sm:$0xff]  ;;  %v7749_v40 = vpack.c.bf16 %v1557_v11, %v1553_v44 }
 0x197   :  { %v7704_v21 = vpop.f32.mrf.mxu1 }
 0x198   :  { %v7708_v37 = vpop.f32.mrf.mxu0  ;;  %10183 = vst [vmem:[#allocation34_spill] sm:$0xff] %v7714_v53  ;;  %v7736_v42 = vrot.slane %v10185_v26, %v10100_v60  ;;  %v7742_v31 = vrot.slane %v10185_v26, %v10101_v55  ;;  %10186 = vst [vmem:[#allocation9_spill] sm:$0xff] %v7749_v40 }
 0x199   :  { %v7710_v39 = vpop.f32.mrf.mxu1  ;;  %3278 = vmatpush2.bf16.msra.mxu0 %v6620_v61 }
 0x19a   :  { %10181 = vst [vmem:[#allocation17_spill] sm:$0xff] %v7710_v39  ;;  %v7718_v17 = vpop.f32.mrf.mxu0  ;;  %v1565_v39 = vadd.f32 %v7534_v59, %v1372_v46 }
 0x19b   :  { %v7720_v13 = vpop.f32.mrf.mxu1 }
 0x19c   :  { %v1655_v41 = vpop.f32.mrf.mxu0  ;;  %2974 = vmatmul.mubr.bf16.gmra.mxu0 %v7714_v53  ;;  %v7754_v62 = vpack.c.bf16 %v1569_v32, %v1565_v39  ;;  %v1567_v39 = vadd.f32 %v7540_v33, %v1374_v25  ;;  %v1579_v32 = vadd.f32 %v7583_v36, %v1386_v43  ;;  %v1384_v36 = vadd.f32 %v7572_v56, %v7401_v29 }
 0x19d   :  { %v1848_v61 = vpop.f32.mrf.mxu1  ;;  %2983 = vmatprep.mubr.bf16.mxu0 %v7723_v22  ;;  %v1656_v26 = vadd.f32 %v1655_v41, %v7742_v31 }
 0x19e   :  { %v1657_v50 = vpop.f32.mrf.mxu0 }
 0x19f   :  { %v1850_v0 = vpop.f32.mrf.mxu1  ;;  %v1658_v60 = vadd.f32 %v1657_v50, %v7736_v42  ;;  %v1849_v35 = vadd.f32 %v1848_v61, %v1656_v26 }
 0x1a0   :  { %v1659_v53 = vpop.f32.mrf.mxu0 }
 0x1a1   :  { %v1852_v22 = vpop.f32.mrf.mxu1  ;;  %v1660_v23 = vadd.f32 %v1659_v53, %v7742_v31  ;;  %v1851_v41 = vadd.f32 %v1850_v0, %v1658_v60  ;;  %v6580_v60 = vld [vmem:[#allocation4 + $0x2cc] ss:$16 sps:$4 sm:$0xff]  }
 0x1a2   :  { %v1661_v55 = vpop.f32.mrf.mxu0 }
 0x1a3   :  { %v1854_v15 = vpop.f32.mrf.mxu1  ;;  %v1662_v59 = vadd.f32 %v1661_v55, %v7736_v42  ;;  %v1853_v53 = vadd.f32 %v1852_v22, %v1660_v23  ;;  %v6569_v23 = vld [vmem:[#allocation4 + $0x2e8] ss:$16 sps:$4 sm:$0xff]   ;;  %v1563_v22 = vadd.f32 %v7525_v49, %v1370_v54  ;;  %v1380_v54 = vadd.f32 %v7557_v52, %v7401_v29 }
 0x1a4   :  { %v1665_v9 = vpop.f32.mrf.mxu0  ;;  %2984 = vmatmul.mubr.bf16.gmra.mxu0 %v7749_v40 }
 0x1a5   :  { %v1858_v46 = vpop.f32.mrf.mxu1  ;;  %v1855_v11 = vadd.f32 %v1854_v15, %v1662_v59  ;;  %2993 = vmatprep.mubr.bf16.mxu0 %v7754_v62  ;;  %v7770_v44 = vpack.c.bf16 %v1853_v53, %v1849_v35  ;;  %v1575_v15 = vadd.f32 %v7568_v6, %v1382_v51  ;;  %v7776_v61 = vpack.c.bf16 %v1567_v39, %v1563_v22  ;;  %v6578_v59 = vld [vmem:[#allocation4 + $0x2c8] ss:$16 sps:$4 sm:$0xff]  }
 0x1a6   :  { %v1667_v50 = vpop.f32.mrf.mxu0  ;;  %v1666_v49 = vadd.f32 %v1665_v9, %v7742_v31  ;;  %v1396_v6 = vadd.f32 %v7615_v3, %v7374_v5  ;;  %v6589_v9 = vld [vmem:[#allocation4 + $0x2ac] ss:$16 sps:$4 sm:$0xff]   ;;  %v1577_v3 = vadd.f32 %v7574_v45, %v1384_v36  ;;  %v6587_v22 = vld [vmem:[#allocation4 + $0x2a8] ss:$16 sps:$4 sm:$0xff]  }
 0x1a7   :  { %v1860_v55 = vpop.f32.mrf.mxu1  ;;  %v7767_v27 = vpack.c.bf16 %v1855_v11, %v1851_v41  ;;  %v1668_v0 = vadd.f32 %v1667_v50, %v7736_v42  ;;  %v7782_v43 = vpack.c.bf16 %v1579_v32, %v1575_v15  ;;  %v1392_v41 = vadd.f32 %v7600_v1, %v7374_v5  ;;  %v6598_v15 = vld [vmem:[#allocation4 + $0x28c] ss:$16 sps:$4 sm:$0xff]  }
 0x1a8   :  { %v1669_v40 = vpop.f32.mrf.mxu0  ;;  %v1859_v35 = vadd.f32 %v1858_v46, %v1666_v49  ;;  %v1589_v52 = vadd.f32 %v7617_v7, %v1396_v6  ;;  %v6596_v6 = vld [vmem:[#allocation4 + $0x288] ss:$16 sps:$4 sm:$0xff]  }
 0x1a9   :  { %v1862_v47 = vpop.f32.mrf.mxu1  ;;  %v1670_v33 = vadd.f32 %v1669_v40, %v7742_v31  ;;  %3086 = vmatprep.mubr.bf16.mxu1 %v7767_v27  ;;  %v1861_v11 = vadd.f32 %v1860_v55, %v1668_v0  ;;  %v1585_v0 = vadd.f32 %v7602_v16, %v1392_v41  ;;  %v1406_v16 = vadd.f32 %v7649_v4, %v7374_v5 }
 0x1aa   :  { %v1671_v25 = vpop.f32.mrf.mxu0  ;;  %3087 = vmatmul.mubr.bf16.vlgmr.msra.gmra.mxu1 %v7770_v44 }
 0x1ab   :  { %v1864_v26 = vpop.f32.mrf.mxu1  ;;  %v1672_v40 = vadd.f32 %v1671_v25, %v7736_v42  ;;  %3441 = vmatpush1.bf16.msra.mxu1 %v6569_v23  ;;  %v1863_v53 = vadd.f32 %v1862_v47, %v1670_v33  ;;  %v1573_v47 = vadd.f32 %v7559_v34, %v1380_v54  ;;  %v1394_v33 = vadd.f32 %v7606_v10, %v7401_v29 }
 0x1ac   :  { %v1675_v56 = vpop.f32.mrf.mxu0  ;;  %2994 = vmatmul.mubr.bf16.gmra.mxu0 %v7776_v61  ;;  %3442 = vmatprep.subr.bf16.mxu1 %v6580_v60  ;;  %v7810_v25 = vpack.c.bf16 %v1589_v52, %v1585_v0  ;;  %v10187_v52 = vld [vmem:[#allocation26_spill] sm:$0xff] }
 0x1ad   :  { %v1868_v51 = vpop.f32.mrf.mxu1  ;;  %v1865_v39 = vadd.f32 %v1864_v26, %v1672_v40  ;;  %3003 = vmatprep.mubr.bf16.mxu0 %v7782_v43  ;;  %v7798_v60 = vpack.c.bf16 %v1863_v53, %v1859_v35  ;;  %v7804_v7 = vpack.c.bf16 %v1577_v3, %v1573_v47  ;;  %v1676_v34 = vadd.f32 %v1675_v56, %v7742_v31  ;;  %v6607_v53 = vld [vmem:[#allocation4 + $0x26c] ss:$16 sps:$4 sm:$0xff]  }
 0x1ae   :  { %v1677_v50 = vpop.f32.mrf.mxu0  ;;  %v1390_v40 = vadd.f32 %v7591_v57, %v7401_v29  ;;  %v1402_v56 = vadd.f32 %v7634_v28, %v7374_v5  ;;  %v1587_v4 = vadd.f32 %v7608_v48, %v1394_v33  ;;  %v1599_v57 = vadd.f32 %v7651_v38, %v1406_v16 }
 0x1af   :  { %v1870_v32 = vpop.f32.mrf.mxu1  ;;  %v7795_v23 = vpack.c.bf16 %v1865_v39, %v1861_v11  ;;  %3443 = vmatpush1.bf16.msra.mxu1 %v6578_v59  ;;  %v1678_v45 = vadd.f32 %v1677_v50, %v7736_v42  ;;  %v1869_v11 = vadd.f32 %v1868_v51, %v1676_v34  ;;  %v6605_v50 = vld [vmem:[#allocation4 + $0x268] ss:$16 sps:$4 sm:$0xff]  }
 0x1b0   :  { %v1679_v1 = vpop.f32.mrf.mxu0  ;;  %3444 = vmatprep.subr.bf16.mxu1 %v6589_v9 }
 0x1b1   :  { %v1872_v55 = vpop.f32.mrf.mxu1  ;;  %v1680_v46 = vadd.f32 %v1679_v1, %v7742_v31  ;;  %3096 = vmatprep.mubr.bf16.mxu1 %v7795_v23  ;;  %v1871_v9 = vadd.f32 %v1870_v32, %v1678_v45  ;;  %v6616_v1 = vld [vmem:[#allocation4 + $0x24c] ss:$16 sps:$4 sm:$0xff]  }
 0x1b2   :  { %v1681_v36 = vpop.f32.mrf.mxu0  ;;  %3097 = vmatmul.mubr.bf16.gmra.mxu1 %v7798_v60 }
 0x1b3   :  { %v1874_v49 = vpop.f32.mrf.mxu1  ;;  %v1682_v26 = vadd.f32 %v1681_v36, %v7736_v42  ;;  %3445 = vmatpush1.bf16.msra.mxu1 %v6587_v22  ;;  %v1873_v59 = vadd.f32 %v1872_v55, %v1680_v46  ;;  %v1583_v22 = vadd.f32 %v10187_v52, %v1390_v40  ;;  %v1595_v55 = vadd.f32 %v7636_v14, %v1402_v56  ;;  %v6614_v36 = vld [vmem:[#allocation4 + $0x248] ss:$16 sps:$4 sm:$0xff]   ;;  %v6625_v40 = vld [vmem:[#allocation4 + $0x22c] ss:$16 sps:$4 sm:$0xff]  }
 0x1b4   :  { %v1685_v10 = vpop.f32.mrf.mxu0  ;;  %3004 = vmatmul.mubr.bf16.gmra.mxu0 %v7804_v7  ;;  %3446 = vmatprep.subr.bf16.mxu1 %v6598_v15  ;;  %v1404_v15 = vadd.f32 %v7640_v2, %v7401_v29  ;;  %v1416_v14 = vadd.f32 %v7683_v12, %v7374_v5 }
 0x1b5   :  { %v1878_v54 = vpop.f32.mrf.mxu1  ;;  %v1875_v41 = vadd.f32 %v1874_v49, %v1682_v26  ;;  %3013 = vmatprep.mubr.bf16.mxu0 %v7810_v25  ;;  %v7826_v47 = vpack.c.bf16 %v1873_v59, %v1869_v11  ;;  %v7832_v38 = vpack.c.bf16 %v1587_v4, %v1583_v22  ;;  %v1686_v0 = vadd.f32 %v1685_v10, %v7742_v31  ;;  %v10188_v49 = vld [vmem:[#allocation10_spill] sm:$0xff]  ;;  %v6628_v22 = vld [vmem:[#allocation4 + $0x20c] ss:$16 sps:$4 sm:$0xff]  }
 0x1b6   :  { %v1687_v39 = vpop.f32.mrf.mxu0  ;;  %v7838_v33 = vpack.c.bf16 %v1599_v57, %v1595_v55  ;;  %v1400_v16 = vadd.f32 %v10188_v49, %v7401_v29  ;;  %v1412_v59 = vadd.f32 %v7668_v18, %v7374_v5  ;;  %v1597_v12 = vadd.f32 %v7642_v24, %v1404_v15  ;;  %v10189_v57 = vld [vmem:[#allocation28_spill] sm:$0xff]  ;;  %v6631_v49 = vld [vmem:[#allocation4 + $0x3ec] ss:$16 sps:$4 sm:$0xff]  }
 0x1b7   :  { %v1880_v3 = vpop.f32.mrf.mxu1  ;;  %v7823_v35 = vpack.c.bf16 %v1875_v41, %v1871_v9  ;;  %3447 = vmatpush1.bf16.msra.mxu1 %v6596_v6  ;;  %v1688_v48 = vadd.f32 %v1687_v39, %v7736_v42  ;;  %v1879_v56 = vadd.f32 %v1878_v54, %v1686_v0  ;;  %v1609_v4 = vadd.f32 %v7685_v20, %v1416_v14  ;;  %v6623_v39 = vld [vmem:[#allocation4 + $0x228] ss:$16 sps:$4 sm:$0xff]  }
 0x1b8   :  { %v1689_v28 = vpop.f32.mrf.mxu0  ;;  %3448 = vmatprep.subr.bf16.mxu1 %v6607_v53  ;;  %v6780_v20 = vmov 0   ;;  %v1414_v55 = vadd.f32 %v7674_v63, %v7401_v29  ;;  %v1426_v0 = vadd.f32 %v7718_v17, %v7374_v5  ;;  %v1410_v63 = vadd.f32 %v7659_v8, %v7401_v29 }
 0x1b9   :  { %v1882_v32 = vpop.f32.mrf.mxu1  ;;  %v1690_v51 = vadd.f32 %v1689_v28, %v7742_v31  ;;  %3106 = vmatprep.mubr.bf16.mxu1 %v7823_v35  ;;  %v1881_v10 = vadd.f32 %v1880_v3, %v1688_v48  ;;  %v1605_v28 = vadd.f32 %v7670_v19, %v1412_v59  ;;  %6166 = vset.pattern.permute.xlu1 %v6780_v20 }
 0x1ba   :  { %v1691_v45 = vpop.f32.mrf.mxu0  ;;  %3107 = vmatmul.mubr.bf16.gmra.mxu1 %v7826_v47  ;;  %6165 = vset.pattern.permute.xlu0 %v6780_v20  ;;  %v1607_v8 = vadd.f32 %v7676_v30, %v1414_v55  ;;  %v6632_v20 = vld [vmem:[#allocation4 + $0x3c8] ss:$16 sps:$4 sm:$0xff]   ;;  %v10198_v55 = vld [vmem:[#allocation32_spill] sm:$0xff] }
 0x1bb   :  { %v1884_v46 = vpop.f32.mrf.mxu1  ;;  %v1692_v34 = vadd.f32 %v1691_v45, %v7736_v42  ;;  %3449 = vmatpush1.bf16.msra.mxu1 %v6605_v50  ;;  %v1883_v26 = vadd.f32 %v1882_v32, %v1690_v51  ;;  %v1593_v50 = vadd.f32 %v10189_v57, %v1400_v16  ;;  %v7863_v32 = vld [vmem:[%s10066_s1 + $0x10] sm:$0xff]  ;;  %v7872_v15 = vpack.c.bf16 %v1609_v4, %v1605_v28 }
 0x1bc   :  { %v1695_v2 = vpop.f32.mrf.mxu0  ;;  %3014 = vmatmul.mubr.bf16.gmra.mxu0 %v7832_v38  ;;  %3450 = vmatprep.subr.bf16.mxu1 %v6616_v1  ;;  %v1422_v16 = vadd.f32 %v7702_v58, %v7374_v5  ;;  %v6629_v5 = vld [vmem:[#allocation4 + $0x3e8] ss:$16 sps:$4 sm:$0xff]   ;;  %v10194_v58 = vld [vmem:[#allocation30_spill] sm:$0xff] }
 0x1bd   :  { %v1888_v6 = vpop.f32.mrf.mxu1  ;;  %v1885_v53 = vadd.f32 %v1884_v46, %v1692_v34  ;;  %3023 = vmatprep.mubr.bf16.mxu0 %v7838_v33  ;;  %v7854_v52 = vpack.c.bf16 %v1883_v26, %v1879_v56  ;;  %v7865_v1 = vpack.c.bf16 %v1597_v12, %v1593_v50  ;;  %v1696_v19 = vadd.f32 %v1695_v2, %v7742_v31  ;;  %v6626_v46 = vld [vmem:[#allocation4 + $0x208] ss:$16 sps:$4 sm:$0xff]   ;;  %v7908_v50 = vld [vmem:[%s10066_s1] sm:$0xff] }
 0x1be   :  { %v1697_v9 = vpop.f32.mrf.mxu0  ;;  %4326 = vperm.xlu1 %6166, %v7863_v32   ;;  %10192 = vst [vmem:[#allocation28_spill] sm:$0xff] %v7872_v15  ;;  %v7886_v2 = vld [vmem:[%s10066_s1 + $0x18] sm:$0xff]  ;;  %v1603_v56 = vadd.f32 %v10194_v58, %v1410_v63  ;;  %v1615_v30 = vadd.f32 %v7704_v21, %v1422_v16  ;;  %v1424_v21 = vadd.f32 %v7708_v37, %v7401_v29 }
 0x1bf   :  { %v1890_v41 = vpop.f32.mrf.mxu1  ;;  %v7851_v11 = vpack.c.bf16 %v1885_v53, %v1881_v10  ;;  %3451 = vmatpush1.bf16.msra.mxu1 %v6614_v36  ;;  %10190 = vst [vmem:[#allocation26_spill] sm:$0xff] %v7854_v52  ;;  %v1698_v24 = vadd.f32 %v1697_v9, %v7736_v42  ;;  %10191 = vst [vmem:[#allocation10_spill] sm:$0xff] %v7865_v1  ;;  %v1619_v53 = vadd.f32 %v7720_v13, %v1426_v0  ;;  %v7903_v13 = vld [vmem:[%s10066_s1 + $0x28] sm:$0xff]  ;;  %v7928_v63 = vld [vmem:[%s10066_s1 + $0x38] sm:$0xff] }
 0x1c0   :  { %v1699_v18 = vpop.f32.mrf.mxu0  ;;  %3452 = vmatprep.subr.bf16.mxu1 %v6625_v40  ;;  %v1889_v40 = vadd.f32 %v1888_v6, %v1696_v19  ;;  %4316 = vperm.xlu0 %6165, %v7908_v50   ;;  %v1420_v19 = vadd.f32 %v10198_v55, %v7401_v29  ;;  %v6637_v0 = vld [vmem:[#allocation4 + $0x3ac] ss:$16 sps:$4 sm:$0xff]  }
 0x1c1   :  { %v1892_v3 = vpop.f32.mrf.mxu1  ;;  %v1700_v54 = vadd.f32 %v1699_v18, %v7742_v31  ;;  %3116 = vmatprep.mubr.bf16.mxu1 %v7851_v11  ;;  %v1891_v26 = vadd.f32 %v1890_v41, %v1698_v24  ;;  %v7910_v18 = vpack.c.bf16 %v1607_v8, %v1603_v56  ;;  %v7917_v24 = vpack.c.bf16 %v1619_v53, %v1615_v30  ;;  %v7933_v29 = vld [vmem:[%s10066_s1 + $0x8] sm:$0xff]  ;;  %v6653_v55 = vld [vmem:[%s10071_s6 + $0x78] sm:$0xff]  }
 0x1c2   :  { %v1701_v48 = vpop.f32.mrf.mxu0  ;;  %3117 = vmatmul.mubr.bf16.gmra.mxu1 %v7854_v52  ;;  %4331 = vperm.xlu1 %6166, %v7886_v2   ;;  %10199 = vst [vmem:[#allocation32_spill] sm:$0xff] %v7933_v29  ;;  %v6635_v8 = vld [vmem:[#allocation4 + $0x3a8] ss:$16 sps:$4 sm:$0xff]   ;;  %v6640_v58 = vld [vmem:[#allocation4 + $0x38c] ss:$16 sps:$4 sm:$0xff]  }
 0x1c3   :  { %v1894_v51 = vpop.f32.mrf.mxu1  ;;  %v1702_v45 = vadd.f32 %v1701_v48, %v7736_v42  ;;  %3453 = vmatpush1.bf16.msra.mxu1 %v6623_v39  ;;  %v1893_v14 = vadd.f32 %v1892_v3, %v1700_v54  ;;  %v6634_v39 = vld [vmem:[#allocation4 + $0x3cc] ss:$16 sps:$4 sm:$0xff]   ;;  %10196 = vst [vmem:[#allocation37_spill] sm:$0xff] %v7910_v18  ;;  %10197 = vst [vmem:[#allocation38_spill] sm:$0xff] %v7917_v24  ;;  %5930 = vmatprep.subr.bf16.mxu0 %v6653_v55 }
 0x1c4   :  { %v1705_v34 = vpop.f32.mrf.mxu0  ;;  %3024 = vmatmul.mubr.bf16.gmra.mxu0 %v7865_v1  ;;  %3454 = vmatprep.subr.bf16.mxu1 %v6628_v22 }
 0x1c5   :  { %v1898_v36 = vpop.f32.mrf.mxu1  ;;  %v1895_v17 = vadd.f32 %v1894_v51, %v1702_v45  ;;  %3033 = vmatprep.mubr.bf16.mxu0 %v7872_v15  ;;  %v7894_v9 = vpack.c.bf16 %v1893_v14, %v1889_v40  ;;  %v1706_v3 = vadd.f32 %v1705_v34, %v7742_v31  ;;  %v10200_v14 = vld [vmem:[#allocation17_spill] sm:$0xff]  ;;  %4321 = vperm.xlu0 %6165, %v7933_v29  }
 0x1c6   :  { %v1707_v59 = vpop.f32.mrf.mxu0  ;;  %4341 = vperm.xlu1 %6166, %v7903_v13   ;;  %v1617_v34 = vadd.f32 %v10200_v14, %v1424_v21  ;;  %v10202_v40 = vld [vmem:[#allocation33_spill] sm:$0xff] }
 0x1c7   :  { %v1900_v10 = vpop.f32.mrf.mxu1  ;;  %v7891_v12 = vpack.c.bf16 %v1895_v17, %v1891_v26  ;;  %3455 = vmatpush1.bf16.msra.mxu1 %v6626_v46  ;;  %10195 = vst [vmem:[#allocation30_spill] sm:$0xff] %v7894_v9  ;;  %v1708_v6 = vadd.f32 %v1707_v59, %v7736_v42  ;;  %v1613_v59 = vadd.f32 %v10202_v40, %v1420_v19 }
 0x1c8   :  { %v1709_v41 = vpop.f32.mrf.mxu0  ;;  %3456 = vmatprep.subr.bf16.mxu1 %v6631_v49  ;;  %v1899_v49 = vadd.f32 %v1898_v36, %v1706_v3  ;;  %v6638_v3 = vld [vmem:[#allocation4 + $0x388] ss:$16 sps:$4 sm:$0xff]  }
 0x1c9   :  { %10193 = vst [vmem:[#allocation36_spill] sm:$0xff] %v7891_v12  ;;  %v1902_v4 = vpop.f32.mrf.mxu1  ;;  %v1710_v57 = vadd.f32 %v1709_v41, %v7742_v31  ;;  %3126 = vmatprep.mubr.bf16.mxu1 %v7891_v12  ;;  %v1901_v45 = vadd.f32 %v1900_v10, %v1708_v6  ;;  %v7949_v41 = vld [vmem:[%s10066_s1 + $0x48] sm:$0xff] }
 0x1ca   :  { %v1711_v22 = vpop.f32.mrf.mxu0  ;;  %3127 = vmatmul.mubr.bf16.gmra.mxu1 %v7894_v9  ;;  %4351 = vperm.xlu1 %6166, %v7928_v63  }
 0x1cb   :  { %v1904_v28 = vpop.f32.mrf.mxu1  ;;  %v1712_v54 = vadd.f32 %v1711_v22, %v7736_v42  ;;  %3457 = vmatpush2.bf16.msra.mxu1 %v6629_v5  ;;  %v1903_v37 = vadd.f32 %v1902_v4, %v1710_v57  ;;  %v7954_v4 = vld [vmem:[%s10066_s1 + $0x20] sm:$0xff] }
 0x1cc   :  { %v1715_v48 = vpop.f32.mrf.mxu0  ;;  %3034 = vmatmul.mubr.bf16.gmra.mxu0 %v7910_v18  ;;  %3458 = vmatprep.subr.bf16.mxu1 %v6634_v39  ;;  %v7956_v39 = vpack.c.bf16 %v1617_v34, %v1613_v59  ;;  %v6646_v59 = vld [vmem:[#allocation4 + $0x34c] ss:$16 sps:$4 sm:$0xff]  }
 0x1cd   :  { %v1908_v51 = vpop.f32.mrf.mxu1  ;;  %v1905_v46 = vadd.f32 %v1904_v28, %v1712_v54  ;;  %3043 = vmatprep.mubr.bf16.mxu0 %v7917_v24  ;;  %v7941_v10 = vpack.c.bf16 %v1903_v37, %v1899_v49  ;;  %v1716_v30 = vadd.f32 %v1715_v48, %v7742_v31  ;;  %4336 = vperm.xlu0 %6165, %v7954_v4   ;;  %v10205_v48 = vld [vmem:[#allocation13_spill] sm:$0xff]  ;;  %v10221_v24 = vld [vmem:[#allocation22_spill] sm:$0xff]  ;;  %v10222_v18 = vld [vmem:[#allocation23_spill] sm:$0xff] }
 0x1ce   :  { %v1717_v16 = vpop.f32.mrf.mxu0  ;;  %10204 = vst [vmem:[#allocation39_spill] sm:$0xff] %v7956_v39  ;;  %4361 = vperm.xlu1 %6166, %v7949_v41  }
 0x1cf   :  { %v1910_v26 = vpop.f32.mrf.mxu1  ;;  %v7937_v17 = vpack.c.bf16 %v1905_v46, %v1901_v45  ;;  %3459 = vmatpush2.bf16.msra.mxu1 %v6632_v20  ;;  %10203 = vst [vmem:[#allocation33_spill] sm:$0xff] %v7941_v10  ;;  %v1718_v36 = vadd.f32 %v1717_v16, %v7736_v42  ;;  %v6643_v20 = vld [vmem:[#allocation4 + $0x36c] ss:$16 sps:$4 sm:$0xff]   ;;  %v7976_v45 = vld [vmem:[%s10066_s1 + $0x30] sm:$0xff]  ;;  %v1909_v46 = vadd.f32 %v1908_v51, %v1716_v30  ;;  %v6641_v16 = vld [vmem:[#allocation4 + $0x368] ss:$16 sps:$4 sm:$0xff]  }
 0x1d0   :  { %v1719_v53 = vpop.f32.mrf.mxu0  ;;  %3460 = vmatprep.subr.bf16.mxu1 %v6637_v0  ;;  %v7971_v0 = vld [vmem:[%s10066_s1 + $0x58] sm:$0xff] }
 0x1d1   :  { %10201 = vst [vmem:[#allocation17_spill] sm:$0xff] %v7937_v17  ;;  %v1912_v5 = vpop.f32.mrf.mxu1  ;;  %v1720_v56 = vadd.f32 %v1719_v53, %v7742_v31  ;;  %3136 = vmatprep.mubr.bf16.mxu1 %v7937_v17  ;;  %v1911_v19 = vadd.f32 %v1910_v26, %v1718_v36  ;;  %4346 = vperm.xlu0 %6165, %v7976_v45   ;;  %v7998_v36 = vld [vmem:[%s10066_s1 + $0x40] sm:$0xff] }
 0x1d2   :  { %v1721_v6 = vpop.f32.mrf.mxu0  ;;  %3137 = vmatmul.mubr.bf16.gmra.mxu1 %v7941_v10  ;;  %4371 = vperm.xlu1 %6166, %v7971_v0  }
 0x1d3   :  { %v1914_v57 = vpop.f32.mrf.mxu1  ;;  %v1722_v21 = vadd.f32 %v1721_v6, %v7736_v42  ;;  %3461 = vmatpush2.bf16.msra.mxu1 %v6635_v8  ;;  %v1913_v22 = vadd.f32 %v1912_v5, %v1720_v56  ;;  %v6654_v5 = vld [vmem:[%s10071_s6 + $0x38] sm:$0xff]  }
 0x1d4   :  { %v1725_v28 = vpop.f32.mrf.mxu0  ;;  %3044 = vmatmul.mubr.bf16.gmra.mxu0 %v7956_v39  ;;  %3462 = vmatprep.subr.bf16.mxu1 %v6640_v58  ;;  %v7993_v58 = vld [vmem:[%s10066_s1 + $0x68] sm:$0xff] }
 0x1d5   :  { %v1918_v54 = vpop.f32.mrf.mxu1  ;;  %v1915_v37 = vadd.f32 %v1914_v57, %v1722_v21  ;;  %3279 = vmatprep.mubr.bf16.mxu0 %v10205_v48  ;;  %v7982_v26 = vpack.c.bf16 %v1913_v22, %v1909_v46  ;;  %v1726_v56 = vadd.f32 %v1725_v28, %v7742_v31  ;;  %v6655_v57 = vld [vmem:[%s10071_s6 + $0x70] sm:$0xff]   ;;  %4356 = vperm.xlu0 %6165, %v7998_v36   ;;  %v10208_v28 = vld [vmem:[#allocation15_spill] sm:$0xff]  ;;  %v10209_v46 = vld [vmem:[#allocation16_spill] sm:$0xff] }
 0x1d6   :  { %v1727_v14 = vpop.f32.mrf.mxu0  ;;  %4381 = vperm.xlu1 %6166, %v7993_v58  }
 0x1d7   :  { %v1920_v34 = vpop.f32.mrf.mxu1  ;;  %v7979_v49 = vpack.c.bf16 %v1915_v37, %v1911_v19  ;;  %3463 = vmatpush2.bf16.msra.mxu1 %v6638_v3  ;;  %10207 = vst [vmem:[#allocation40_spill] sm:$0xff] %v7982_v26  ;;  %v1728_v53 = vadd.f32 %v1727_v14, %v7736_v42  ;;  %v6644_v3 = vld [vmem:[#allocation4 + $0x348] ss:$16 sps:$4 sm:$0xff]   ;;  %v6649_v19 = vld [vmem:[#allocation4 + $0x32c] ss:$16 sps:$4 sm:$0xff]   ;;  %v6656_v14 = vld [vmem:[%s10071_s6 + $0x30] sm:$0xff]  }
 0x1d8   :  { %v1729_v8 = vpop.f32.mrf.mxu0  ;;  %3464 = vmatprep.subr.bf16.mxu1 %v6643_v20 }
 0x1d9   :  { %10206 = vst [vmem:[#allocation13_spill] sm:$0xff] %v7979_v49  ;;  %v1922_v40 = vpop.f32.mrf.mxu1  ;;  %v1730_v51 = vadd.f32 %v1729_v8, %v7742_v31  ;;  %3146 = vmatprep.mubr.bf16.mxu1 %v7979_v49  ;;  %v1921_v37 = vadd.f32 %v1920_v34, %v1728_v53  ;;  %v8021_v8 = vld [vmem:[%s10066_s1 + $0x50] sm:$0xff]  ;;  %v6657_v53 = vld [vmem:[%s10071_s6 + $0x68] sm:$0xff]  }
 0x1da   :  { %v1731_v30 = vpop.f32.mrf.mxu0  ;;  %3147 = vmatmul.mubr.bf16.gmra.mxu1 %v7982_v26  ;;  %4366 = vperm.xlu0 %6165, %v8021_v8   ;;  %v10213_v26 = vld [vmem:[#allocation19_spill] sm:$0xff] }
 0x1db   :  { %v1924_v6 = vpop.f32.mrf.mxu1  ;;  %v1732_v21 = vadd.f32 %v1731_v30, %v7736_v42  ;;  %3465 = vmatpush2.bf16.msra.mxu1 %v6641_v16  ;;  %v1923_v22 = vadd.f32 %v1922_v40, %v1730_v51  ;;  %v8016_v16 = vld [vmem:[%s10066_s1 + $0x78] sm:$0xff]  ;;  %v1919_v40 = vadd.f32 %v1918_v54, %v1726_v56 }
 0x1dc   :  { %v1735_v20 = vpop.f32.mrf.mxu0  ;;  %3280 = vmatmul.mubr.bf16.vlgmr.msra.gmra.mxu0 %v10208_v28  ;;  %3466 = vmatprep.subr.bf16.mxu1 %v6646_v59  ;;  %v6652_v54 = vld [vmem:[#allocation4 + $0x30c] ss:$16 sps:$4 sm:$0xff]  }
 0x1dd   :  { %v1928_v55 = vpop.f32.mrf.mxu1  ;;  %v1925_v48 = vadd.f32 %v1924_v6, %v1732_v21  ;;  %3289 = vmatprep.mubr.bf16.mxu0 %v10209_v46  ;;  %5931 = vmatpush3.bf16.msra.mxu0 %v6654_v5  ;;  %v6647_v5 = vld [vmem:[#allocation4 + $0x328] ss:$16 sps:$4 sm:$0xff]   ;;  %v8030_v30 = vpack.c.bf16 %v1923_v22, %v1919_v40  ;;  %v1736_v28 = vadd.f32 %v1735_v20, %v7742_v31  ;;  %v8053_v40 = vld [vmem:[%s10066_s1 + $0x60] sm:$0xff] }
 0x1de   :  { %v1737_v34 = vpop.f32.mrf.mxu0  ;;  %5932 = vmatprep.subr.bf16.mxu0 %v6655_v57  ;;  %4391 = vperm.xlu1 %6166, %v8016_v16   ;;  %v8041_v22 = vld [vmem:[%s10066_s1 + $0x88] sm:$0xff] }
 0x1df   :  { %v1930_v59 = vpop.f32.mrf.mxu1  ;;  %v8027_v51 = vpack.c.bf16 %v1925_v48, %v1921_v37  ;;  %3467 = vmatpush2.bf16.msra.mxu1 %v6644_v3  ;;  %10211 = vst [vmem:[#allocation16_spill] sm:$0xff] %v8030_v30  ;;  %v1738_v56 = vadd.f32 %v1737_v34, %v7736_v42  ;;  %v6658_v3 = vld [vmem:[%s10071_s6 + $0x28] sm:$0xff]   ;;  %v6659_v48 = vld [vmem:[%s10071_s6 + $0x60] sm:$0xff]   ;;  %4376 = vperm.xlu0 %6165, %v8053_v40  }
 0x1e0   :  { %v1739_v6 = vpop.f32.mrf.mxu0  ;;  %3468 = vmatprep.subr.bf16.mxu1 %v6649_v19 }
 0x1e1   :  { %10210 = vst [vmem:[#allocation15_spill] sm:$0xff] %v8027_v51  ;;  %v1932_v21 = vpop.f32.mrf.mxu1  ;;  %v1740_v57 = vadd.f32 %v1739_v6, %v7742_v31  ;;  %3156 = vmatprep.mubr.bf16.mxu1 %v8027_v51  ;;  %5933 = vmatpush3.bf16.msra.mxu0 %v6656_v14  ;;  %v6650_v14 = vld [vmem:[#allocation4 + $0x308] ss:$16 sps:$4 sm:$0xff]  }
 0x1e2   :  { %v1741_v19 = vpop.f32.mrf.mxu0  ;;  %3157 = vmatmul.mubr.bf16.gmra.mxu1 %v8030_v30  ;;  %5934 = vmatprep.subr.bf16.mxu0 %v6657_v53  ;;  %v10212_v30 = vld [vmem:[#allocation18_spill] sm:$0xff]  ;;  %v1931_v53 = vadd.f32 %v1930_v59, %v1738_v56 }
 0x1e3   :  { %v1934_v37 = vpop.f32.mrf.mxu1  ;;  %v1742_v46 = vadd.f32 %v1741_v19, %v7736_v42  ;;  %3469 = vmatpush2.bf16.msra.mxu1 %v6647_v5  ;;  %4401 = vperm.xlu1 %6166, %v8041_v22   ;;  %v1933_v20 = vadd.f32 %v1932_v21, %v1740_v57  ;;  %v6660_v5 = vld [vmem:[%s10071_s6 + $0x20] sm:$0xff]   ;;  %v8063_v19 = vld [vmem:[%s10066_s1 + $0x98] sm:$0xff]  ;;  %v1929_v21 = vadd.f32 %v1928_v55, %v1736_v28  ;;  %v8077_v55 = vld [vmem:[%s10066_s1 + $0x70] sm:$0xff] }
 0x1e4   :  { %v1745_v34 = vpop.f32.mrf.mxu0  ;;  %3290 = vmatmul.mubr.bf16.gmra.mxu0 %v10212_v30  ;;  %3470 = vmatprep.subr.bf16.mxu1 %v6652_v54 }
 0x1e5   :  { %v1938_v6 = vpop.f32.mrf.mxu1  ;;  %v1935_v51 = vadd.f32 %v1934_v37, %v1742_v46  ;;  %3299 = vmatprep.mubr.bf16.mxu0 %v10213_v26  ;;  %5935 = vmatpush3.bf16.msra.mxu0 %v6658_v3  ;;  %v6661_v26 = vld [vmem:[%s10071_s6 + $0x58] sm:$0xff]   ;;  %v8072_v30 = vpack.c.bf16 %v1933_v20, %v1929_v21  ;;  %v8088_v37 = vld [vmem:[%s10066_s1 + $0xa8] sm:$0xff]  ;;  %v6663_v20 = vld [vmem:[%s10071_s6 + $0x50] sm:$0xff]  }
 0x1e6   :  { %v1747_v57 = vpop.f32.mrf.mxu0  ;;  %5936 = vmatprep.subr.bf16.mxu0 %v6659_v48  ;;  %v1746_v48 = vadd.f32 %v1745_v34, %v7742_v31  ;;  %4386 = vperm.xlu0 %6165, %v8077_v55   ;;  %v8102_v34 = vld [vmem:[%s10066_s1 + $0x80] sm:$0xff] }
 0x1e7   :  { %v1940_v39 = vpop.f32.mrf.mxu1  ;;  %v8069_v59 = vpack.c.bf16 %v1935_v51, %v1931_v53  ;;  %3471 = vmatpush2.bf16.msra.mxu1 %v6650_v14  ;;  %4411 = vperm.xlu1 %6166, %v8063_v19   ;;  %10215 = vst [vmem:[#allocation19_spill] sm:$0xff] %v8072_v30  ;;  %v1748_v3 = vadd.f32 %v1747_v57, %v7736_v42  ;;  %v6662_v51 = vld [vmem:[%s10071_s6 + $0x18] sm:$0xff]  }
 0x1e8   :  { %v1749_v54 = vpop.f32.mrf.mxu0 }
 0x1e9   :  { %10214 = vst [vmem:[#allocation18_spill] sm:$0xff] %v8069_v59  ;;  %v1942_v56 = vpop.f32.mrf.mxu1  ;;  %v1750_v28 = vadd.f32 %v1749_v54, %v7742_v31  ;;  %3166 = vmatprep.mubr.bf16.mxu1 %v8069_v59  ;;  %5937 = vmatpush3.bf16.msra.mxu0 %v6660_v5  ;;  %v10216_v54 = vld [vmem:[#allocation20_spill] sm:$0xff]  ;;  %v10217_v59 = vld [vmem:[#allocation21_spill] sm:$0xff] }
 0x1ea   :  { %v1751_v46 = vpop.f32.mrf.mxu0  ;;  %3167 = vmatmul.mubr.bf16.gmra.mxu1 %v8072_v30  ;;  %5938 = vmatprep.subr.bf16.mxu0 %v6661_v26  ;;  %v1941_v26 = vadd.f32 %v1940_v39, %v1748_v3  ;;  %v6665_v39 = vld [vmem:[%s10071_s6 + $0x48] sm:$0xff]  }
 0x1eb   :  { %v1944_v14 = vpop.f32.mrf.mxu1  ;;  %v1752_v53 = vadd.f32 %v1751_v46, %v7736_v42  ;;  %4421 = vperm.xlu1 %6166, %v8088_v37   ;;  %v1943_v5 = vadd.f32 %v1942_v56, %v1750_v28  ;;  %v6664_v46 = vld [vmem:[%s10071_s6 + $0x10] sm:$0xff]   ;;  %v8111_v56 = vld [vmem:[%s10066_s1 + $0xb8] sm:$0xff]  ;;  %v1939_v28 = vadd.f32 %v1938_v6, %v1746_v48  ;;  %4396 = vperm.xlu0 %6165, %v8102_v34  }
 0x1ec   :  { %v1755_v21 = vpop.f32.mrf.mxu0  ;;  %3300 = vmatmul.mubr.bf16.gmra.mxu0 %v10216_v54  ;;  %v8125_v6 = vld [vmem:[%s10066_s1 + $0x90] sm:$0xff] }
 0x1ed   :  { %v1948_v57 = vpop.f32.mrf.mxu1  ;;  %v1945_v30 = vadd.f32 %v1944_v14, %v1752_v53  ;;  %3309 = vmatprep.mubr.bf16.mxu0 %v10217_v59  ;;  %5939 = vmatpush3.bf16.msra.mxu0 %v6662_v51  ;;  %v8120_v59 = vpack.c.bf16 %v1943_v5, %v1939_v28  ;;  %v8136_v53 = vld [vmem:[%s10066_s1 + $0xc8] sm:$0xff]  ;;  %v1756_v5 = vadd.f32 %v1755_v21, %v7742_v31  ;;  %v8150_v21 = vld [vmem:[%s10066_s1 + $0xa0] sm:$0xff] }
 0x1ee   :  { %v1757_v54 = vpop.f32.mrf.mxu0  ;;  %5940 = vmatprep.subr.bf16.mxu0 %v6663_v20  ;;  %10220 = vst [vmem:[#allocation41_spill] sm:$0xff] %v8136_v53 }
 0x1ef   :  { %v1950_v49 = vpop.f32.mrf.mxu1  ;;  %v8116_v3 = vpack.c.bf16 %v1945_v30, %v1941_v26  ;;  %4431 = vperm.xlu1 %6166, %v8111_v56   ;;  %10219 = vst [vmem:[#allocation21_spill] sm:$0xff] %v8120_v59  ;;  %v1758_v48 = vadd.f32 %v1757_v54, %v7736_v42  ;;  %v6666_v30 = vld [vmem:[%s10071_s6 + $0x8] sm:$0xff]   ;;  %4406 = vperm.xlu0 %6165, %v8125_v6  }
 0x1f0   :  { %v1759_v51 = vpop.f32.mrf.mxu0 }
 0x1f1   :  { %10218 = vst [vmem:[#allocation20_spill] sm:$0xff] %v8116_v3  ;;  %v1952_v14 = vpop.f32.mrf.mxu1  ;;  %v1760_v20 = vadd.f32 %v1759_v51, %v7742_v31  ;;  %3176 = vmatprep.mubr.bf16.mxu1 %v8116_v3  ;;  %5941 = vmatpush3.bf16.msra.mxu0 %v6664_v46  ;;  %v6667_v46 = vld [vmem:[%s10071_s6 + $0x40] sm:$0xff]  }
 0x1f2   :  { %v1761_v26 = vpop.f32.mrf.mxu0  ;;  %3177 = vmatmul.mubr.bf16.gmra.mxu1 %v8120_v59  ;;  %5942 = vmatprep.subr.bf16.mxu0 %v6665_v39  ;;  %v1951_v39 = vadd.f32 %v1950_v49, %v1758_v48 }
 0x1f3   :  { %v1954_v28 = vpop.f32.mrf.mxu1  ;;  %v1762_v54 = vadd.f32 %v1761_v26, %v7736_v42  ;;  %4441 = vperm.xlu1 %6166, %v8136_v53   ;;  %v1953_v51 = vadd.f32 %v1952_v14, %v1760_v20  ;;  %v6668_v26 = vld [vmem:[%s10071_s6] sm:$0xff]   ;;  %v8159_v14 = vld [vmem:[%s10066_s1 + $0xd8] sm:$0xff]  ;;  %4416 = vperm.xlu0 %6165, %v8150_v21  }
 0x1f4   :  { %v1765_v3 = vpop.f32.mrf.mxu0  ;;  %3310 = vmatmul.mubr.bf16.gmra.mxu0 %v10221_v24  ;;  %10223 = vst [vmem:[#allocation22_spill] sm:$0xff] %v8159_v14  ;;  %v1949_v24 = vadd.f32 %v1948_v57, %v1756_v5 }
 0x1f5   :  { %v1958_v10 = vpop.f32.mrf.mxu1  ;;  %v1955_v59 = vadd.f32 %v1954_v28, %v1762_v54  ;;  %3319 = vmatprep.mubr.bf16.mxu0 %v10222_v18  ;;  %5943 = vmatpush3.bf16.msra.mxu0 %v6666_v30  ;;  %v8170_v30 = vld [vmem:[%s10066_s1 + $0xb0] sm:$0xff]  ;;  %v8181_v28 = vld [vmem:[%s10066_s1 + $0xe8] sm:$0xff] }
 0x1f6   :  { %v1767_v20 = vpop.f32.mrf.mxu0  ;;  %5944 = vmatprep.subr.bf16.mxu0 %v6667_v46  ;;  %v8165_v18 = vpack.c.bf16 %v1953_v51, %v1949_v24  ;;  %10226 = vst [vmem:[#allocation43_spill] sm:$0xff] %v8181_v28  ;;  %v1766_v46 = vadd.f32 %v1765_v3, %v7742_v31  ;;  %v8192_v3 = vld [vmem:[%s10066_s1 + $0xc0] sm:$0xff] }
 0x1f7   :  { %v1960_v17 = vpop.f32.mrf.mxu1  ;;  %v8161_v9 = vpack.c.bf16 %v1955_v59, %v1951_v39  ;;  %4451 = vperm.xlu1 %6166, %v8159_v14   ;;  %v1768_v57 = vadd.f32 %v1767_v20, %v7736_v42  ;;  %v6669_v59 = vld [vmem:[%s10071_s6 + $0xf8] sm:$0xff]   ;;  %4426 = vperm.xlu0 %6165, %v8170_v30  }
 0x1f8   :  { %10225 = vst [vmem:[#allocation42_spill] sm:$0xff] %v8165_v18  ;;  %v1769_v49 = vpop.f32.mrf.mxu0  ;;  %6042 = vmatprep.subr.bf16.mxu1 %v6669_v59  ;;  %v8198_v59 = vld [vmem:[%s10066_s1 + $0xf8] sm:$0xff] }
 0x1f9   :  { %10224 = vst [vmem:[#allocation23_spill] sm:$0xff] %v8161_v9  ;;  %v1962_v48 = vpop.f32.mrf.mxu1  ;;  %v1770_v5 = vadd.f32 %v1769_v49, %v7742_v31  ;;  %3186 = vmatprep.mubr.bf16.mxu1 %v8161_v9  ;;  %5945 = vmatpush3.bf16.msra.mxu0 %v6668_v26  ;;  %v10227_v49 = vld [vmem:[#allocation24_spill] sm:$0xff]  ;;  %v1961_v9 = vadd.f32 %v1960_v17, %v1768_v57  ;;  %v8209_v17 = vld [vmem:[%s10066_s1 + $0xd0] sm:$0xff] }
 0x1fa   :  { %v1771_v54 = vpop.f32.mrf.mxu0  ;;  %3187 = vmatmul.mubr.bf16.gmra.mxu1 %v8165_v18  ;;  %v10228_v18 = vld [vmem:[#allocation25_spill] sm:$0xff]  ;;  %10229 = vst [vmem:[#allocation24_spill] sm:$0xff] %v8198_v59 }
 0x1fb   :  { %v1964_v51 = vpop.f32.mrf.mxu1  ;;  %v1772_v39 = vadd.f32 %v1771_v54, %v7736_v42  ;;  %v1963_v26 = vadd.f32 %v1962_v48, %v1770_v5  ;;  %4461 = vperm.xlu1 %6166, %v8181_v28   ;;  %v1959_v48 = vadd.f32 %v1958_v10, %v1766_v46  ;;  %4436 = vperm.xlu0 %6165, %v8192_v3  }
 0x1fc   :  { %v1775_v24 = vpop.f32.mrf.mxu0  ;;  %3320 = vmatmul.mubr.bf16.gmra.mxu0 %v10227_v49 }
 0x1fd   :  { %v1968_v20 = vpop.f32.mrf.mxu1  ;;  %v1965_v14 = vadd.f32 %v1964_v51, %v1772_v39  ;;  %3329 = vmatprep.mubr.bf16.mxu0 %v10228_v18  ;;  %v8203_v28 = vpack.c.bf16 %v1963_v26, %v1959_v48  ;;  %v10232_v48 = vld [vmem:[#allocation12_spill] sm:$0xff] }
 0x1fe   :  { %v1777_v5 = vpop.f32.mrf.mxu0 }
 0x1ff   :  { %v1970_v54 = vpop.f32.mrf.mxu1  ;;  %v8200_v49 = vpack.c.bf16 %v1965_v14, %v1961_v9  ;;  %10231 = vst [vmem:[#allocation44_spill] sm:$0xff] %v8203_v28  ;;  %4471 = vperm.xlu1 %6166, %v8198_v59   ;;  %v1778_v18 = vadd.f32 %v1777_v5, %v7736_v42  ;;  %v1776_v9 = vadd.f32 %v1775_v24, %v7742_v31  ;;  %v6781_v5 = vmov 1   ;;  %v10233_v59 = vld [vmem:[#allocation27_spill] sm:$0xff] }
 0x200   :  { %v1779_v15 = vpop.f32.mrf.mxu0  ;;  %4446 = vperm.xlu0 %6165, %v8209_v17  }
 0x201   :  { %10230 = vst [vmem:[#allocation25_spill] sm:$0xff] %v8200_v49  ;;  %v1972_v1 = vpop.f32.mrf.mxu1  ;;  %v1780_v10 = vadd.f32 %v1779_v15, %v7742_v31  ;;  %3196 = vmatprep.mubr.bf16.mxu1 %v8200_v49  ;;  %v8222_v15 = vld [vmem:[%s10066_s1 + $0xe0] sm:$0xff]  ;;  %v1971_v24 = vadd.f32 %v1970_v54, %v1778_v18  ;;  %v8234_v54 = vld [vmem:[%s10066_s1 + $0xf0] sm:$0xff] }
 0x202   :  { %v1781_v14 = vpop.f32.mrf.mxu0  ;;  %3197 = vmatmul.mubr.bf16.gmra.mxu1 %v8203_v28 }
 0x203   :  { %v1974_v57 = vpop.f32.mrf.mxu1  ;;  %v1782_v46 = vadd.f32 %v1781_v14, %v7736_v42  ;;  %v1973_v51 = vadd.f32 %v1972_v1, %v1780_v10  ;;  %6168 = vset.pattern.permute.xlu1 %v6781_v5  ;;  %v1969_v14 = vadd.f32 %v1968_v20, %v1776_v9 }
 0x204   :  { %v1785_v39 = vpop.f32.mrf.mxu0  ;;  %3330 = vmatmul.mubr.bf16.gmra.mxu0 %v10232_v48  ;;  %4543 = vperm.xlu1 %6168, %v7933_v29  }
 0x205   :  { %v1978_v26 = vpop.f32.mrf.mxu1  ;;  %v1975_v49 = vadd.f32 %v1974_v57, %v1782_v46  ;;  %3339 = vmatprep.mubr.bf16.mxu0 %v10233_v59  ;;  %4456 = vperm.xlu0 %6165, %v8222_v15   ;;  %v8229_v48 = vpack.c.bf16 %v1973_v51, %v1969_v14  ;;  %v1786_v20 = vadd.f32 %v1785_v39, %v7742_v31 }
 0x206   :  { %v1787_v28 = vpop.f32.mrf.mxu0 }
 0x207   :  { %v1980_v1 = vpop.f32.mrf.mxu1  ;;  %v8226_v10 = vpack.c.bf16 %v1975_v49, %v1971_v24  ;;  %10235 = vst [vmem:[#allocation27_spill] sm:$0xff] %v8229_v48  ;;  %v1788_v59 = vadd.f32 %v1787_v28, %v7736_v42  ;;  %v10236_v28 = vld [vmem:[#allocation11_spill] sm:$0xff] }
 0x208   :  { %v1789_v12 = vpop.f32.mrf.mxu0  ;;  %4547 = vperm.xlu1 %6168, %v7863_v32   ;;  %v1979_v32 = vadd.f32 %v1978_v26, %v1786_v20 }
 0x209   :  { %10234 = vst [vmem:[#allocation12_spill] sm:$0xff] %v8226_v10  ;;  %v1982_v52 = vpop.f32.mrf.mxu1  ;;  %v1790_v18 = vadd.f32 %v1789_v12, %v7742_v31  ;;  %3206 = vmatprep.mubr.bf16.mxu1 %v8226_v10  ;;  %4466 = vperm.xlu0 %6165, %v8234_v54   ;;  %v1981_v12 = vadd.f32 %v1980_v1, %v1788_v59  ;;  %v10237_v10 = vld [vmem:[#allocation29_spill] sm:$0xff] }
 0x20a   :  { %v1791_v49 = vpop.f32.mrf.mxu0  ;;  %3207 = vmatmul.mubr.bf16.gmra.mxu1 %v8229_v48 }
 0x20b   :  { %v1984_v9 = vpop.f32.mrf.mxu1  ;;  %v1792_v57 = vadd.f32 %v1791_v49, %v7736_v42  ;;  %v1983_v46 = vadd.f32 %v1982_v52, %v1790_v18 }
 0x20c   :  { %v1795_v51 = vpop.f32.mrf.mxu0  ;;  %3340 = vmatmul.mubr.bf16.gmra.mxu0 %v10236_v28  ;;  %4555 = vperm.xlu1 %6168, %v7954_v4  }
 0x20d   :  { %v1988_v24 = vpop.f32.mrf.mxu1  ;;  %v1985_v14 = vadd.f32 %v1984_v9, %v1792_v57  ;;  %3349 = vmatprep.mubr.bf16.mxu0 %v10237_v10  ;;  %6167 = vset.pattern.permute.xlu0 %v6781_v5  ;;  %v8249_v49 = vpack.c.bf16 %v1983_v46, %v1979_v32  ;;  %v1796_v26 = vadd.f32 %v1795_v51, %v7742_v31  ;;  %v10239_v46 = vld [vmem:[#allocation14_spill] sm:$0xff] }
 0x20e   :  { %v1797_v39 = vpop.f32.mrf.mxu0  ;;  %4539 = vperm.xlu0 %6167, %v7908_v50  }
 0x20f   :  { %v1990_v29 = vpop.f32.mrf.mxu1  ;;  %v8247_v53 = vpack.c.bf16 %v1985_v14, %v1981_v12  ;;  %10238 = vst [vmem:[#allocation11_spill] sm:$0xff] %v8249_v49  ;;  %v1798_v18 = vadd.f32 %v1797_v39, %v7736_v42  ;;  %v10240_v12 = vld [vmem:[#allocation31_spill] sm:$0xff]  ;;  %v1989_v51 = vadd.f32 %v1988_v24, %v1796_v26 }
 0x210   :  { %v1799_v48 = vpop.f32.mrf.mxu0  ;;  %4563 = vperm.xlu1 %6168, %v7976_v45  }
 0x211   :  { %v1992_v52 = vpop.f32.mrf.mxu1  ;;  %v1800_v1 = vadd.f32 %v1799_v48, %v7742_v31  ;;  %3216 = vmatprep.mubr.bf16.mxu1 %v8247_v53  ;;  %v1991_v48 = vadd.f32 %v1990_v29, %v1798_v18 }
 0x212   :  { %v1801_v10 = vpop.f32.mrf.mxu0  ;;  %3217 = vmatmul.mubr.bf16.gmra.mxu1 %v8249_v49  ;;  %4551 = vperm.xlu0 %6167, %v7886_v2  }
 0x213   :  { %v1994_v59 = vpop.f32.mrf.mxu1  ;;  %v1802_v5 = vadd.f32 %v1801_v10, %v7736_v42  ;;  %v1993_v20 = vadd.f32 %v1992_v52, %v1800_v1 }
 0x214   :  { %v1805_v9 = vpop.f32.mrf.mxu0  ;;  %3350 = vmatmul.mubr.bf16.gmra.mxu0 %v10239_v46  ;;  %4571 = vperm.xlu1 %6168, %v7998_v36   ;;  %v10242_v46 = vld [vmem:[#allocation34_spill] sm:$0xff] }
 0x215   :  { %v1998_v57 = vpop.f32.mrf.mxu1  ;;  %v1995_v28 = vadd.f32 %v1994_v59, %v1802_v5  ;;  %3359 = vmatprep.mubr.bf16.mxu0 %v10240_v12  ;;  %v8265_v49 = vpack.c.bf16 %v1993_v20, %v1989_v51  ;;  %v1806_v24 = vadd.f32 %v1805_v9, %v7742_v31  ;;  %v10243_v12 = vld [vmem:[#allocation35_spill] sm:$0xff] }
 0x216   :  { %v1807_v14 = vpop.f32.mrf.mxu0  ;;  %4559 = vperm.xlu0 %6167, %v7903_v13  }
 0x217   :  { %v2000_v32 = vpop.f32.mrf.mxu1  ;;  %v8263_v39 = vpack.c.bf16 %v1995_v28, %v1991_v48  ;;  %10241 = vst [vmem:[#allocation29_spill] sm:$0xff] %v8265_v49  ;;  %v1808_v10 = vadd.f32 %v1807_v14, %v7736_v42 }
 0x218   :  { %v1809_v52 = vpop.f32.mrf.mxu0  ;;  %4579 = vperm.xlu1 %6168, %v8021_v8  }
 0x219   :  { %v2002_v1 = vpop.f32.mrf.mxu1  ;;  %v1810_v29 = vadd.f32 %v1809_v52, %v7742_v31  ;;  %3226 = vmatprep.mubr.bf16.mxu1 %v8263_v39  ;;  %v2001_v48 = vadd.f32 %v2000_v32, %v1808_v10  ;;  %v1999_v31 = vadd.f32 %v1998_v57, %v1806_v24  ;;  %v10246_v52 = vld [vmem:[#allocation9_spill] sm:$0xff]  ;;  %v6670_v10 = vld [vmem:[%s10071_s6 + $0xb8] sm:$0xff]  }
 0x21a   :  { %v1811_v18 = vpop.f32.mrf.mxu0  ;;  %3227 = vmatmul.mubr.bf16.gmra.mxu1 %v8265_v49  ;;  %4567 = vperm.xlu0 %6167, %v7928_v63  }
 0x21b   :  { %v1812_v26 = vadd.f32 %v1811_v18, %v7736_v42  ;;  %v2003_v59 = vadd.f32 %v2002_v1, %v1810_v29  ;;  %v2004_v5 = vpop.f32.mrf.mxu1 }
 0x21c   :  { %v8275_v20 = vpop.f32.mrf.mxu0  ;;  %3360 = vmatmul.mubr.bf16.gmra.mxu0 %v10242_v46  ;;  %4587 = vperm.xlu1 %6168, %v8053_v40  }
 0x21d   :  { %v2005_v28 = vadd.f32 %v2004_v5, %v1812_v26  ;;  %3369 = vmatprep.mubr.bf16.mxu0 %v10243_v12  ;;  %v8285_v42 = vpack.c.bf16 %v2003_v59, %v1999_v31  ;;  %v6673_v26 = vld [vmem:[%s10071_s6 + $0xe8] sm:$0xff]   ;;  %v6676_v5 = vld [vmem:[%s10071_s6 + $0xa0] sm:$0xff]  }
 0x21e   :  { %v8281_v9 = vpop.f32.mrf.mxu0  ;;  %4575 = vperm.xlu0 %6167, %v7949_v41  }
 0x21f   :  { %v8283_v51 = vpack.c.bf16 %v2005_v28, %v2001_v48  ;;  %10245 = vst [vmem:[#allocation31_spill] sm:$0xff] %v8285_v42 }
 0x220   :  { %v8287_v14 = vpop.f32.mrf.mxu0  ;;  %4595 = vperm.xlu1 %6168, %v8077_v55  }
 0x221   :  { %10244 = vst [vmem:[#allocation14_spill] sm:$0xff] %v8283_v51  ;;  %3236 = vmatprep.mubr.bf16.mxu1 %v8283_v51  ;;  %v10260_v51 = vld [vmem:[#allocation24_spill] sm:$0xff] }
 0x222   :  { %v8292_v32 = vpop.f32.mrf.mxu0  ;;  %3237 = vmatmul.mubr.bf16.gmra.mxu1 %v8285_v42  ;;  %4583 = vperm.xlu0 %6167, %v7971_v0   ;;  %v10259_v42 = vld [vmem:[#allocation38_spill] sm:$0xff] }
 0x223   :  { %3472 = vmatprep.mubr.bf16.mxu1 %v7767_v27  ;;  %v6671_v27 = vld [vmem:[%s10071_s6 + $0xf0] sm:$0xff]  }
 0x224   :  { %v8296_v57 = vpop.f32.mrf.mxu0  ;;  %3370 = vmatmul.mubr.bf16.gmra.mxu0 %v10246_v52  ;;  %4603 = vperm.xlu1 %6168, %v8102_v34  }
 0x225   :  { %3379 = vmatprep.mubr.bf16.mxu0 %v7754_v62  ;;  %v6672_v62 = vld [vmem:[%s10071_s6 + $0xb0] sm:$0xff]  }
 0x226   :  { %v8302_v1 = vpop.f32.mrf.mxu0  ;;  %4591 = vperm.xlu0 %6167, %v7993_v58  }
 0x228   :  { %v8307_v29 = vpop.f32.mrf.mxu0  ;;  %4611 = vperm.xlu1 %6168, %v8125_v6  }
 0x22a   :  { %v8314_v24 = vpop.f32.mrf.mxu0  ;;  %3473 = vmatmul.mubr.bf16.vlgmr.msra.gmra.mxu1 %v7770_v44  ;;  %4599 = vperm.xlu0 %6167, %v8016_v16  }
 0x22b   :  { %3482 = vmatprep.mubr.bf16.mxu1 %v7795_v23  ;;  %6043 = vmatpush3.bf16.msra.mxu1 %v6670_v10  ;;  %v6674_v23 = vld [vmem:[%s10071_s6 + $0xa8] sm:$0xff]  }
 0x22c   :  { %v8321_v18 = vpop.f32.mrf.mxu0  ;;  %3380 = vmatmul.mubr.bf16.gmra.mxu0 %v7776_v61  ;;  %6044 = vmatprep.subr.bf16.mxu1 %v6671_v27  ;;  %v6675_v61 = vld [vmem:[%s10071_s6 + $0xe0] sm:$0xff]  }
 0x22d   :  { %3389 = vmatprep.mubr.bf16.mxu0 %v7782_v43  ;;  %4619 = vperm.xlu1 %6168, %v8150_v21   ;;  %v10252_v27 = vld [vmem:[#allocation28_spill] sm:$0xff] }
 0x22e   :  { %v8329_v44 = vpop.f32.mrf.mxu0  ;;  %4607 = vperm.xlu0 %6167, %v8041_v22  }
 0x22f   :  { %6045 = vmatpush3.bf16.msra.mxu1 %v6672_v62  ;;  %v10253_v62 = vld [vmem:[#allocation22_spill] sm:$0xff] }
 0x230   :  { %v8335_v59 = vpop.f32.mrf.mxu0  ;;  %6046 = vmatprep.subr.bf16.mxu1 %v6673_v26 }
 0x231   :  { %4627 = vperm.xlu1 %6168, %v8170_v30  }
 0x232   :  { %v8341_v43 = vpop.f32.mrf.mxu0  ;;  %3483 = vmatmul.mubr.bf16.gmra.mxu1 %v7798_v60  ;;  %4615 = vperm.xlu0 %6167, %v8063_v19  }
 0x233   :  { %3492 = vmatprep.mubr.bf16.mxu1 %v7823_v35  ;;  %6047 = vmatpush3.bf16.msra.mxu1 %v6674_v23  ;;  %v6677_v35 = vld [vmem:[%s10071_s6 + $0xd8] sm:$0xff]   ;;  %v6782_v23 = vmov 2  }
 0x234   :  { %v8349_v46 = vpop.f32.mrf.mxu0  ;;  %3390 = vmatmul.mubr.bf16.gmra.mxu0 %v7804_v7  ;;  %6048 = vmatprep.subr.bf16.mxu1 %v6675_v61  ;;  %v6678_v7 = vld [vmem:[%s10071_s6 + $0x98] sm:$0xff]  }
 0x235   :  { %3399 = vmatprep.mubr.bf16.mxu0 %v7810_v25  ;;  %4635 = vperm.xlu1 %6168, %v8192_v3  }
 0x236   :  { %v8354_v48 = vpop.f32.mrf.mxu0  ;;  %4623 = vperm.xlu0 %6167, %v8088_v37  }
 0x237   :  { %6049 = vmatpush3.bf16.msra.mxu1 %v6676_v5  ;;  %v10254_v5 = vld [vmem:[#allocation43_spill] sm:$0xff] }
 0x238   :  { %v8357_v60 = vpop.f32.mrf.mxu0  ;;  %6050 = vmatprep.subr.bf16.mxu1 %v6677_v35  ;;  %v6679_v35 = vld [vmem:[%s10071_s6 + $0xd0] sm:$0xff]  }
 0x239   :  { %4643 = vperm.xlu1 %6168, %v8209_v17  }
 0x23a   :  { %v8366_v25 = vpop.f32.mrf.mxu0  ;;  %3493 = vmatmul.mubr.bf16.gmra.mxu1 %v7826_v47  ;;  %4631 = vperm.xlu0 %6167, %v8111_v56   ;;  %v10247_v47 = vld [vmem:[#allocation41_spill] sm:$0xff] }
 0x23b   :  { %3502 = vmatprep.mubr.bf16.mxu1 %v7851_v11  ;;  %6051 = vmatpush3.bf16.msra.mxu1 %v6678_v7  ;;  %v10248_v11 = vld [vmem:[#allocation26_spill] sm:$0xff] }
 0x23c   :  { %v8371_v28 = vpop.f32.mrf.mxu0  ;;  %3400 = vmatmul.mubr.bf16.gmra.mxu0 %v7832_v38  ;;  %v10249_v38 = vld [vmem:[#allocation36_spill] sm:$0xff]  ;;  %v6680_v7 = vld [vmem:[%s10071_s6 + $0x90] sm:$0xff]   ;;  %6052 = vmatprep.subr.bf16.mxu1 %v6679_v35 }
 0x23d   :  { %3409 = vmatprep.mubr.bf16.mxu0 %v7838_v33  ;;  %4651 = vperm.xlu1 %6168, %v8222_v15   ;;  %v10251_v33 = vld [vmem:[#allocation10_spill] sm:$0xff] }
 0x23e   :  { %v8376_v12 = vpop.f32.mrf.mxu0  ;;  %4639 = vperm.xlu0 %6167, %v10247_v47  }
 0x23f   :  { %6053 = vmatpush3.bf16.msra.mxu1 %v6680_v7  ;;  %v10264_v7 = vld [vmem:[#allocation32_spill] sm:$0xff] }
 0x240   :  { %v8379_v31 = vpop.f32.mrf.mxu0 }
 0x241   :  { %4659 = vperm.xlu1 %6168, %v8234_v54  }
 0x242   :  { %v8382_v52 = vpop.f32.mrf.mxu0  ;;  %3503 = vmatmul.mubr.bf16.gmra.mxu1 %v10248_v11  ;;  %4647 = vperm.xlu0 %6167, %v10253_v62  }
 0x243   :  { %3512 = vmatprep.mubr.bf16.mxu1 %v10249_v38  ;;  %v10255_v38 = vld [vmem:[#allocation30_spill] sm:$0xff] }
 0x244   :  { %v8387_v10 = vpop.f32.mrf.mxu0  ;;  %3410 = vmatmul.mubr.bf16.gmra.mxu0 %v10251_v33  ;;  %v10256_v33 = vld [vmem:[#allocation17_spill] sm:$0xff] }
 0x245   :  { %10250 = vst [vmem:[#allocation34_spill] sm:$0xff] %v8387_v10  ;;  %3419 = vmatprep.mubr.bf16.mxu0 %v10252_v27  ;;  %6169 = vset.pattern.permute.xlu1 %v6782_v23  ;;  %v10258_v27 = vld [vmem:[#allocation37_spill] sm:$0xff]  ;;  %v8418_v10 = vld [vmem:[%s10066_s1 + $0x10] sm:$0xff] }
 0x246   :  { %v8392_v26 = vpop.f32.mrf.mxu0  ;;  %4859 = vperm.xlu1 %6169, %v7908_v50   ;;  %4655 = vperm.xlu0 %6167, %v10254_v5  }
 0x248   :  { %v8395_v61 = vpop.f32.mrf.mxu0 }
 0x24a   :  { %v8404_v11 = vpop.f32.mrf.mxu0  ;;  %3513 = vmatmul.mubr.bf16.gmra.mxu1 %v10255_v38  ;;  %4663 = vperm.xlu0 %6167, %v10260_v51  }
 0x24b   :  { %3522 = vmatprep.mubr.bf16.mxu1 %v10256_v33  ;;  %4867 = vperm.xlu1 %6169, %v8418_v10   ;;  %v10262_v33 = vld [vmem:[#allocation33_spill] sm:$0xff] }
 0x24c   :  { %v8408_v50 = vpop.f32.mrf.mxu0  ;;  %3420 = vmatmul.mubr.bf16.gmra.mxu0 %v10258_v27 }
 0x24d   :  { %10257 = vst [vmem:[#allocation35_spill] sm:$0xff] %v8408_v50  ;;  %3429 = vmatprep.mubr.bf16.mxu0 %v10259_v42  ;;  %v10263_v42 = vld [vmem:[#allocation13_spill] sm:$0xff]  ;;  %v10266_v50 = vld [vmem:[#allocation39_spill] sm:$0xff] }
 0x24e   :  { %v8413_v49 = vpop.f32.mrf.mxu0  ;;  %6170 = vset.pattern.permute.xlu0 %v6782_v23 }
 0x24f   :  { %10261 = vst [vmem:[#allocation9_spill] sm:$0xff] %v8413_v49  ;;  %4871 = vperm.xlu1 %6169, %v7886_v2   ;;  %4863 = vperm.xlu0 %6170, %v10264_v7   ;;  %v6681_v2 = vld [vmem:[%s10071_s6 + $0xc8] sm:$0xff]   ;;  %v10268_v7 = vld [vmem:[#allocation40_spill] sm:$0xff] }
 0x250   :  { %v8421_v38 = vpop.f32.mrf.mxu0  ;;  %6054 = vmatprep.subr.bf16.mxu1 %v6681_v2 }
 0x252   :  { %v8423_v35 = vpop.f32.mrf.mxu0  ;;  %3523 = vmatmul.mubr.bf16.gmra.mxu1 %v10262_v33  ;;  %v6682_v33 = vld [vmem:[%s10071_s6 + $0x88] sm:$0xff]  }
 0x253   :  { %3532 = vmatprep.mubr.bf16.mxu1 %v10263_v42  ;;  %4879 = vperm.xlu1 %6169, %v7903_v13  }
 0x254   :  { %v8429_v27 = vpop.f32.mrf.mxu0  ;;  %3430 = vmatmul.mubr.bf16.gmra.mxu0 %v10266_v50  ;;  %4875 = vperm.xlu0 %6170, %v7954_v4   ;;  %v10269_v50 = vld [vmem:[#allocation15_spill] sm:$0xff] }
 0x255   :  { %10265 = vst [vmem:[#allocation41_spill] sm:$0xff] %v8429_v27  ;;  %6055 = vmatpush3.bf16.msra.mxu1 %v6682_v33 }
 0x256   :  { %v8432_v49 = vpop.f32.mrf.mxu0 }
 0x257   :  { %4887 = vperm.xlu1 %6169, %v7928_v63   ;;  %v10273_v63 = vld [vmem:[#allocation18_spill] sm:$0xff] }
 0x258   :  { %v8436_v23 = vpop.f32.mrf.mxu0  ;;  %4883 = vperm.xlu0 %6170, %v7976_v45  }
 0x25a   :  { %v8444_v42 = vpop.f32.mrf.mxu0  ;;  %3533 = vmatmul.mubr.bf16.gmra.mxu1 %v10268_v7  ;;  %v10272_v7 = vld [vmem:[#allocation16_spill] sm:$0xff] }
 0x25b   :  { %10267 = vst [vmem:[#allocation26_spill] sm:$0xff] %v8444_v42  ;;  %3542 = vmatprep.mubr.bf16.mxu1 %v10269_v50  ;;  %4895 = vperm.xlu1 %6169, %v7949_v41   ;;  %v10279_v50 = vld [vmem:[#allocation19_spill] sm:$0xff] }
 0x25c   :  { %v8450_v13 = vpop.f32.mrf.mxu0  ;;  %4891 = vperm.xlu0 %6170, %v7998_v36   ;;  %v8475_v36 = vld [vmem:[%s10070_s5] sm:$0xf] }
 0x25d   :  { %10270 = vst [vmem:[#allocation36_spill] sm:$0xff] %v8450_v13  ;;  %10277 = vst [vmem:[#allocation30_spill] sm:$0xff] %v8475_v36 }
 0x25e   :  { %v8452_v4 = vpop.f32.mrf.mxu0 }
 0x25f   :  { %4903 = vperm.xlu1 %6169, %v7971_v0   ;;  %v6683_v0 = vld [vmem:[%s10071_s6 + $0xc0] sm:$0xff]  }
 0x260   :  { %v8456_v27 = vpop.f32.mrf.mxu0  ;;  %4899 = vperm.xlu0 %6170, %v8021_v8   ;;  %v6684_v8 = vld [vmem:[%s10071_s6 + $0x80] sm:$0xff]   ;;  %6056 = vmatprep.subr.bf16.mxu1 %v6683_v0 }
 0x261   :  { %6057 = vmatpush3.bf16.msra.mxu1 %v6684_v8 }
 0x262   :  { %v8458_v42 = vpop.f32.mrf.mxu0  ;;  %3543 = vmatmul.mubr.bf16.gmra.mxu1 %v10272_v7 }
 0x263   :  { %10271 = vst [vmem:[#allocation10_spill] sm:$0xff] %v8458_v42  ;;  %3552 = vmatprep.mubr.bf16.mxu1 %v10273_v63  ;;  %4911 = vperm.xlu1 %6169, %v7993_v58   ;;  %v10287_v42 = vld [vmem:[#allocation21_spill] sm:$0xff] }
 0x264   :  { %v8464_v45 = vpop.f32.mrf.mxu0  ;;  %4907 = vperm.xlu0 %6170, %v8053_v40   ;;  %v10280_v40 = vld [vmem:[#allocation8_spill] sm:$0xff] }
 0x265   :  { %10274 = vst [vmem:[#allocation28_spill] sm:$0xff] %v8464_v45  ;;  %v10281_v7 = vsub.s32 1, %v10280_v40  ;;  %v10282_v45 = vld [vmem:[#allocation20_spill] sm:$0xff] }
 0x266   :  { %v8466_v2 = vpop.f32.mrf.mxu0 }
 0x267   :  { %10275 = vst [vmem:[#allocation22_spill] sm:$0xff] %v8466_v2  ;;  %4919 = vperm.xlu1 %6169, %v8016_v16   ;;  %v8490_v63 = vrot.slane %v8475_v36, %v10281_v7  ;;  %v10283_v2 = vsub.s32 0, %v10280_v40 }
 0x268   :  { %v8470_v41 = vpop.f32.mrf.mxu0  ;;  %4915 = vperm.xlu0 %6170, %v8077_v55  }
 0x269   :  { %10276 = vst [vmem:[#allocation43_spill] sm:$0xff] %v8470_v41  ;;  %v8497_v41 = vrot.slane %v8475_v36, %v10283_v2  ;;  %v2898_v55 = vadd.f32 %v8281_v9, %v8490_v63 }
 0x26a   :  { %v8483_v33 = vpop.f32.mrf.mxu0  ;;  %v3088_v58 = vpop.f32.mrf.mxu1  ;;  %3553 = vmatmul.mubr.bf16.gmra.mxu1 %v10279_v50 }
 0x26b   :  { %10278 = vst [vmem:[#allocation17_spill] sm:$0xff] %v8483_v33  ;;  %3562 = vmatprep.mubr.bf16.mxu1 %v10282_v45  ;;  %v2900_v16 = vadd.f32 %v8287_v14, %v8497_v41  ;;  %4927 = vperm.xlu1 %6169, %v8041_v22   ;;  %v2902_v45 = vadd.f32 %v8292_v32, %v8490_v63  ;;  %v10288_v32 = vld [vmem:[#allocation23_spill] sm:$0xff] }
 0x26c   :  { %v8499_v33 = vpop.f32.mrf.mxu0  ;;  %v3090_v13 = vpop.f32.mrf.mxu1  ;;  %4923 = vperm.xlu0 %6170, %v8102_v34   ;;  %v2896_v2 = vadd.f32 %v8275_v20, %v8497_v41 }
 0x26d   :  { %10284 = vst [vmem:[#allocation37_spill] sm:$0xff] %v8499_v33  ;;  %v3091_v36 = vadd.f32 %v3090_v13, %v2898_v55  ;;  %v8515_v33 = vpop.permute.xlu1 %4326 }
 0x26e   :  { %v8503_v50 = vpop.f32.mrf.mxu0  ;;  %v3092_v7 = vpop.f32.mrf.mxu1  ;;  %10286 = vst [vmem:[#allocation24_spill] sm:$0xff] %v8515_v33  ;;  %v3089_v22 = vadd.f32 %v3088_v58, %v2896_v2  ;;  %v2910_v58 = vadd.f32 %v8307_v29, %v8497_v41 }
 0x26f   :  { %10285 = vst [vmem:[#allocation38_spill] sm:$0xff] %v8503_v50  ;;  %v3093_v0 = vadd.f32 %v3092_v7, %v2900_v16  ;;  %4935 = vperm.xlu1 %6169, %v8063_v19   ;;  %v2908_v19 = vadd.f32 %v8302_v1, %v8490_v63 }
 0x270   :  { %v8513_v8 = vpop.f32.mrf.mxu0  ;;  %v3094_v14 = vpop.f32.mrf.mxu1  ;;  %4931 = vperm.xlu0 %6170, %v8125_v6   ;;  %v2912_v6 = vadd.f32 %v8314_v24, %v8490_v63 }
 0x271   :  { %v3095_v40 = vadd.f32 %v3094_v14, %v2902_v45  ;;  %v3633_v20 = vpack.c.bf16 %v3093_v0, %v3089_v22  ;;  %v10290_v22 = vld [vmem:[#allocation42_spill] sm:$0xff] }
 0x272   :  { %v8517_v50 = vpop.f32.mrf.mxu0  ;;  %v3098_v9 = vpop.f32.mrf.mxu1  ;;  %3563 = vmatmul.mubr.bf16.gmra.mxu1 %v10287_v42 }
 0x273   :  { %v3634_v34 = vpack.c.bf16 %v3095_v40, %v3091_v36  ;;  %3572 = vmatprep.mubr.bf16.mxu1 %v10288_v32  ;;  %4943 = vperm.xlu1 %6169, %v8088_v37   ;;  %v8534_v42 = vpop.permute.xlu1 %4331  ;;  %v2906_v36 = vadd.f32 %v8296_v57, %v8497_v41 }
 0x274   :  { %v8523_v16 = vpop.f32.mrf.mxu0  ;;  %v3100_v13 = vpop.f32.mrf.mxu1  ;;  %10289 = vst [vmem:[#allocation33_spill] sm:$0xff] %v8534_v42  ;;  %4939 = vperm.xlu0 %6170, %v8150_v21  }
 0x275   :  { %3992 = vmatprep.mubr.bf16.mxu0 %v3634_v34  ;;  %v3101_v2 = vadd.f32 %v3100_v13, %v2908_v19  ;;  %v3099_v37 = vadd.f32 %v3098_v9, %v2906_v36  ;;  %v10291_v34 = vld [vmem:[#allocation25_spill] sm:$0xff]  ;;  %v2920_v13 = vadd.f32 %v8335_v59, %v8497_v41  ;;  %v2916_v19 = vadd.f32 %v8321_v18, %v8497_v41 }
 0x276   :  { %v8527_v7 = vpop.f32.mrf.mxu0  ;;  %v3102_v55 = vpop.f32.mrf.mxu1  ;;  %3993 = vmatmul.mubr.bf16.vlgmr.msra.gmra.mxu0 %v3633_v20 }
 0x277   :  { %v3103_v29 = vadd.f32 %v3102_v55, %v2910_v58  ;;  %4951 = vperm.xlu1 %6169, %v8111_v56   ;;  %v8549_v20 = vpop.permute.xlu0 %4316  ;;  %v8551_v9 = vpop.permute.xlu1 %4341  ;;  %v2922_v55 = vadd.f32 %v8341_v43, %v8490_v63  ;;  %v10295_v43 = vld [vmem:[#allocation12_spill] sm:$0xff] }
 0x278   :  { %v8539_v40 = vpop.f32.mrf.mxu0  ;;  %v3104_v45 = vpop.f32.mrf.mxu1  ;;  %4947 = vperm.xlu0 %6170, %v8170_v30   ;;  %10292 = vst [vmem:[#allocation13_spill] sm:$0xff] %v8549_v20  ;;  %10293 = vst [vmem:[#allocation32_spill] sm:$0xff] %v8551_v9  ;;  %v2918_v30 = vadd.f32 %v8329_v44, %v8490_v63 }
 0x279   :  { %v3105_v0 = vadd.f32 %v3104_v45, %v2912_v6  ;;  %v3637_v21 = vpack.c.bf16 %v3103_v29, %v3099_v37  ;;  %v10294_v37 = vld [vmem:[#allocation44_spill] sm:$0xff] }
 0x27a   :  { %v8541_v14 = vpop.f32.mrf.mxu0  ;;  %v3108_v1 = vpop.f32.mrf.mxu1  ;;  %3573 = vmatmul.mubr.bf16.gmra.mxu1 %v10290_v22 }
 0x27b   :  { %v3638_v24 = vpack.c.bf16 %v3105_v0, %v3101_v2  ;;  %3582 = vmatprep.mubr.bf16.mxu1 %v10291_v34  ;;  %4959 = vperm.xlu1 %6169, %v10247_v47   ;;  %v3109_v2 = vadd.f32 %v3108_v1, %v2916_v19  ;;  %v8574_v18 = vpop.permute.xlu1 %4351  ;;  %v2930_v34 = vadd.f32 %v8357_v60, %v8497_v41 }
 0x27c   :  { %v8547_v57 = vpop.f32.mrf.mxu0  ;;  %v3110_v32 = vpop.f32.mrf.mxu1  ;;  %4955 = vperm.xlu0 %6170, %v8192_v3   ;;  %10297 = vst [vmem:[#allocation40_spill] sm:$0xff] %v8574_v18 }
 0x27d   :  { %4000 = vmatprep.mubr.bf16.mxu0 %v3638_v24  ;;  %v3111_v29 = vadd.f32 %v3110_v32, %v2918_v30  ;;  %v8572_v3 = vpop.permute.xlu0 %4321  ;;  %v2928_v32 = vadd.f32 %v8354_v48, %v8490_v63 }
 0x27e   :  { %v8555_v58 = vpop.f32.mrf.mxu0  ;;  %v3112_v56 = vpop.f32.mrf.mxu1  ;;  %4001 = vmatmul.mubr.bf16.gmra.mxu0 %v3637_v21  ;;  %10296 = vst [vmem:[#allocation39_spill] sm:$0xff] %v8572_v3 }
 0x27f   :  { %v3113_v6 = vadd.f32 %v3112_v56, %v2920_v13  ;;  %4967 = vperm.xlu1 %6169, %v10253_v62   ;;  %v2926_v13 = vadd.f32 %v8349_v46, %v8497_v41 }
 0x280   :  { %v8565_v36 = vpop.f32.mrf.mxu0  ;;  %v3114_v59 = vpop.f32.mrf.mxu1  ;;  %4963 = vperm.xlu0 %6170, %v8209_v17   ;;  %v2932_v17 = vadd.f32 %v8366_v25, %v8490_v63  ;;  %v10300_v25 = vld [vmem:[#allocation27_spill] sm:$0xff] }
 0x281   :  { %v3115_v45 = vadd.f32 %v3114_v59, %v2922_v55  ;;  %v3641_v22 = vpack.c.bf16 %v3113_v6, %v3109_v2  ;;  %v8593_v6 = vpop.permute.xlu0 %4336 }
 0x282   :  { %v8567_v0 = vpop.f32.mrf.mxu0  ;;  %v3118_v47 = vpop.f32.mrf.mxu1  ;;  %3583 = vmatmul.mubr.bf16.gmra.mxu1 %v10294_v37  ;;  %10298 = vst [vmem:[#allocation15_spill] sm:$0xff] %v8593_v6 }
 0x283   :  { %v3642_v44 = vpack.c.bf16 %v3115_v45, %v3111_v29  ;;  %3592 = vmatprep.mubr.bf16.mxu1 %v10295_v43  ;;  %4975 = vperm.xlu1 %6169, %v10254_v5   ;;  %v8595_v5 = vpop.permute.xlu1 %4361  ;;  %v3119_v59 = vadd.f32 %v3118_v47, %v2926_v13  ;;  %v2940_v47 = vadd.f32 %v8379_v31, %v8497_v41  ;;  %v6783_v43 = vmov 3   ;;  %v6700_v31 = vld [vmem:[%s10066_s1 + $0x8] sm:$0xff] }
 0x284   :  { %v8577_v24 = vpop.f32.mrf.mxu0  ;;  %v3120_v1 = vpop.f32.mrf.mxu1  ;;  %4971 = vperm.xlu0 %6170, %v8222_v15   ;;  %10299 = vst [vmem:[#allocation16_spill] sm:$0xff] %v8595_v5 }
 0x285   :  { %4008 = vmatprep.mubr.bf16.mxu0 %v3642_v44  ;;  %v3121_v55 = vadd.f32 %v3120_v1, %v2928_v32  ;;  %v2936_v1 = vadd.f32 %v8371_v28, %v8497_v41 }
 0x286   :  { %v8581_v21 = vpop.f32.mrf.mxu0  ;;  %v3122_v62 = vpop.f32.mrf.mxu1  ;;  %4009 = vmatmul.mubr.bf16.gmra.mxu0 %v3641_v22 }
 0x287   :  { %v3123_v56 = vadd.f32 %v3122_v62, %v2930_v34  ;;  %4983 = vperm.xlu1 %6169, %v10260_v51   ;;  %v2938_v51 = vadd.f32 %v8376_v12, %v8490_v63  ;;  %v8615_v22 = vpop.permute.xlu1 %4371 }
 0x288   :  { %v8591_v30 = vpop.f32.mrf.mxu0  ;;  %v3124_v60 = vpop.f32.mrf.mxu1  ;;  %4979 = vperm.xlu0 %6170, %v8234_v54   ;;  %10302 = vst [vmem:[#allocation19_spill] sm:$0xff] %v8615_v22 }
 0x289   :  { %v3125_v19 = vadd.f32 %v3124_v60, %v2932_v17  ;;  %v3645_v46 = vpack.c.bf16 %v3123_v56, %v3119_v59  ;;  %v8613_v54 = vpop.permute.xlu0 %4346 }
 0x28a   :  { %v8597_v48 = vpop.f32.mrf.mxu0  ;;  %v3128_v29 = vpop.f32.mrf.mxu1  ;;  %3593 = vmatmul.mubr.bf16.gmra.mxu1 %v10300_v25  ;;  %10301 = vst [vmem:[#allocation18_spill] sm:$0xff] %v8613_v54 }
 0x28b   :  { %v3646_v15 = vpack.c.bf16 %v3125_v19, %v3121_v55  ;;  %3602 = vmatprep.mubr.bf16.mxu1 %v8247_v53  ;;  %6172 = vset.pattern.permute.xlu1 %v6783_v43  ;;  %v2942_v53 = vadd.f32 %v8382_v52, %v8490_v63  ;;  %v6701_v52 = vld [vmem:[%s10066_s1] sm:$0xff]  ;;  %v3129_v13 = vadd.f32 %v3128_v29, %v2936_v1  ;;  %v10303_v55 = vld [vmem:[#allocation11_spill] sm:$0xff] }
 0x28c   :  { %v8603_v45 = vpop.f32.mrf.mxu0  ;;  %v3130_v2 = vpop.f32.mrf.mxu1  ;;  %6171 = vset.pattern.permute.xlu0 %v6783_v43  ;;  %5183 = vperm.xlu1 %6172, %v6700_v31   ;;  %v6703_v43 = vld [vmem:[%s10066_s1 + $0x20] sm:$0xff] }
 0x28d   :  { %4016 = vmatprep.mubr.bf16.mxu0 %v3646_v15  ;;  %5179 = vperm.xlu0 %6171, %v6701_v52   ;;  %v3131_v32 = vadd.f32 %v3130_v2, %v2938_v51  ;;  %v6702_v15 = vld [vmem:[%s10066_s1 + $0x18] sm:$0xff]  ;;  %v8637_v29 = vpop.permute.xlu0 %4356  ;;  %v2950_v2 = vadd.f32 %v8395_v61, %v8497_v41  ;;  %v10306_v51 = vld [vmem:[#allocation34_spill] sm:$0xff] }
 0x28e   :  { %v8607_v37 = vpop.f32.mrf.mxu0  ;;  %v3132_v44 = vpop.f32.mrf.mxu1  ;;  %4017 = vmatmul.mubr.bf16.gmra.mxu0 %v3645_v46  ;;  %10304 = vst [vmem:[#allocation20_spill] sm:$0xff] %v8637_v29 }
 0x28f   :  { %v3133_v34 = vadd.f32 %v3132_v44, %v2940_v47  ;;  %v8639_v46 = vpop.permute.xlu1 %4381  ;;  %v2948_v47 = vadd.f32 %v8392_v26, %v8490_v63  ;;  %v2952_v44 = vadd.f32 %v8404_v11, %v8490_v63 }
 0x290   :  { %v8622_v62 = vpop.f32.mrf.mxu0  ;;  %v3134_v12 = vpop.f32.mrf.mxu1  ;;  %5187 = vperm.xlu1 %6172, %v8418_v10   ;;  %10305 = vst [vmem:[#allocation21_spill] sm:$0xff] %v8639_v46 }
 0x291   :  { %v3135_v17 = vadd.f32 %v3134_v12, %v2942_v53  ;;  %v3649_v28 = vpack.c.bf16 %v3133_v34, %v3129_v13  ;;  %5191 = vperm.xlu0 %6171, %v6702_v15   ;;  %v2946_v53 = vadd.f32 %v10306_v51, %v8497_v41  ;;  %v6704_v34 = vld [vmem:[%s10066_s1 + $0x28] sm:$0xff]  ;;  %v6705_v15 = vld [vmem:[%s10066_s1 + $0x30] sm:$0xff] }
 0x292   :  { %v8627_v56 = vpop.f32.mrf.mxu0  ;;  %v3138_v60 = vpop.f32.mrf.mxu1  ;;  %3603 = vmatmul.mubr.bf16.gmra.mxu1 %v10303_v55  ;;  %v10308_v55 = vld [vmem:[#allocation14_spill] sm:$0xff]  ;;  %v10311_v51 = vld [vmem:[#allocation9_spill] sm:$0xff] }
 0x293   :  { %v3650_v19 = vpack.c.bf16 %v3135_v17, %v3131_v32  ;;  %3612 = vmatprep.mubr.bf16.mxu1 %v8263_v39  ;;  %v3139_v11 = vadd.f32 %v3138_v60, %v2946_v53  ;;  %v10307_v17 = vld [vmem:[#allocation29_spill] sm:$0xff]  ;;  %v2958_v53 = vadd.f32 %v10311_v51, %v8490_v63 }
 0x294   :  { %v8632_v59 = vpop.f32.mrf.mxu0  ;;  %v3140_v25 = vpop.f32.mrf.mxu1  ;;  %5195 = vperm.xlu1 %6172, %v6703_v43  }
 0x295   :  { %4024 = vmatprep.mubr.bf16.mxu0 %v3650_v19  ;;  %5199 = vperm.xlu0 %6171, %v6704_v34   ;;  %v3141_v26 = vadd.f32 %v3140_v25, %v2948_v47  ;;  %v8663_v19 = vpop.permute.xlu0 %4366  ;;  %v2960_v47 = vadd.f32 %v8421_v38, %v8497_v41  ;;  %v10312_v34 = vld [vmem:[#allocation35_spill] sm:$0xff] }
 0x296   :  { %v8643_v39 = vpop.f32.mrf.mxu0  ;;  %v3142_v10 = vpop.f32.mrf.mxu1  ;;  %4025 = vmatmul.mubr.bf16.gmra.mxu0 %v3649_v28  ;;  %10309 = vst [vmem:[#allocation23_spill] sm:$0xff] %v8663_v19 }
 0x297   :  { %v3143_v31 = vadd.f32 %v3142_v10, %v2950_v2  ;;  %v8665_v28 = vpop.permute.xlu1 %4391  ;;  %v6706_v10 = vld [vmem:[%s10066_s1 + $0x38] sm:$0xff] }
 0x298   :  { %v8654_v61 = vpop.f32.mrf.mxu0  ;;  %v3144_v1 = vpop.f32.mrf.mxu1  ;;  %10310 = vst [vmem:[#allocation42_spill] sm:$0xff] %v8665_v28  ;;  %5203 = vperm.xlu1 %6172, %v6705_v15  }
 0x299   :  { %v3145_v12 = vadd.f32 %v3144_v1, %v2952_v44  ;;  %v3653_v25 = vpack.c.bf16 %v3143_v31, %v3139_v11  ;;  %5207 = vperm.xlu0 %6171, %v6706_v10   ;;  %v2962_v31 = vadd.f32 %v8423_v35, %v8490_v63  ;;  %v6707_v1 = vld [vmem:[%s10066_s1 + $0x40] sm:$0xff]  ;;  %v8693_v35 = vpop.permute.xlu0 %4376 }
 0x29a   :  { %v8659_v52 = vpop.f32.mrf.mxu0  ;;  %v3148_v32 = vpop.f32.mrf.mxu1  ;;  %3613 = vmatmul.mubr.bf16.gmra.mxu1 %v10307_v17  ;;  %v6708_v17 = vld [vmem:[%s10066_s1 + $0x48] sm:$0xff]  ;;  %10313 = vst [vmem:[#allocation25_spill] sm:$0xff] %v8693_v35 }
 0x29b   :  { %v3654_v13 = vpack.c.bf16 %v3145_v12, %v3141_v26  ;;  %3622 = vmatprep.mubr.bf16.mxu1 %v10308_v55  ;;  %v2956_v26 = vadd.f32 %v10312_v34, %v8497_v41  ;;  %v8695_v15 = vpop.permute.xlu1 %4401 }
 0x29c   :  { %v3150_v2 = vpop.f32.mrf.mxu1  ;;  %v8670_v60 = vpop.f32.mrf.mxu0  ;;  %5211 = vperm.xlu1 %6172, %v6707_v1   ;;  %10314 = vst [vmem:[#allocation44_spill] sm:$0xff] %v8695_v15  ;;  %v10315_v1 = vld [vmem:[#allocation31_spill] sm:$0xff] }
 0x29d   :  { %4032 = vmatprep.mubr.bf16.mxu0 %v3654_v13  ;;  %5215 = vperm.xlu0 %6171, %v6708_v17   ;;  %v3151_v13 = vadd.f32 %v3150_v2, %v2958_v53  ;;  %v6710_v53 = vld [vmem:[%s10066_s1 + $0x58] sm:$0xff] }
 0x29e   :  { %v3152_v44 = vpop.f32.mrf.mxu1  ;;  %v8677_v43 = vpop.f32.mrf.mxu0  ;;  %4033 = vmatmul.mubr.bf16.gmra.mxu0 %v3653_v25  ;;  %v3149_v25 = vadd.f32 %v3148_v32, %v2956_v26  ;;  %v2970_v32 = vadd.f32 %v8436_v23, %v8497_v41  ;;  %v10319_v23 = vld [vmem:[#allocation41_spill] sm:$0xff] }
 0x29f   :  { %v3153_v12 = vadd.f32 %v3152_v44, %v2960_v47  ;;  %v6709_v44 = vld [vmem:[%s10066_s1 + $0x50] sm:$0xff] }
 0x2a0   :  { %v3154_v38 = vpop.f32.mrf.mxu1  ;;  %v8688_v11 = vpop.f32.mrf.mxu0  ;;  %5219 = vperm.xlu1 %6172, %v6709_v44  }
 0x2a1   :  { %v3155_v55 = vadd.f32 %v3154_v38, %v2962_v31  ;;  %v3657_v34 = vpack.c.bf16 %v3153_v12, %v3149_v25  ;;  %5223 = vperm.xlu0 %6171, %v6710_v53   ;;  %v2968_v38 = vadd.f32 %v8432_v49, %v8490_v63  ;;  %v10316_v12 = vld [vmem:[#allocation26_spill] sm:$0xff]  ;;  %v8718_v25 = vpop.permute.xlu1 %4411  ;;  %v6712_v49 = vld [vmem:[%s10066_s1 + $0x68] sm:$0xff] }
 0x2a2   :  { %v3158_v10 = vpop.f32.mrf.mxu1  ;;  %v8697_v51 = vpop.f32.mrf.mxu0  ;;  %3623 = vmatmul.mubr.bf16.gmra.mxu1 %v10315_v1  ;;  %10318 = vst [vmem:[#allocation27_spill] sm:$0xff] %v8718_v25  ;;  %v6711_v1 = vld [vmem:[%s10066_s1 + $0x60] sm:$0xff] }
 0x2a3   :  { %v3658_v47 = vpack.c.bf16 %v3155_v55, %v3151_v13  ;;  %v2972_v13 = vadd.f32 %v10316_v12, %v8490_v63  ;;  %v8716_v55 = vpop.permute.xlu0 %4386 }
 0x2a4   :  { %v3160_v17 = vpop.f32.mrf.mxu1  ;;  %v8703_v2 = vpop.f32.mrf.mxu0  ;;  %10317 = vst [vmem:[#allocation12_spill] sm:$0xff] %v8716_v55  ;;  %5227 = vperm.xlu1 %6172, %v6711_v1   ;;  %v6713_v1 = vld [vmem:[%s10066_s1 + $0x70] sm:$0xff] }
 0x2a5   :  { %4040 = vmatprep.mubr.bf16.mxu0 %v3658_v47  ;;  %v2966_v47 = vadd.f32 %v10319_v23, %v8497_v41  ;;  %5231 = vperm.xlu0 %6171, %v6712_v49   ;;  %v3161_v12 = vadd.f32 %v3160_v17, %v2968_v38  ;;  %v6714_v49 = vld [vmem:[%s10066_s1 + $0x78] sm:$0xff]  ;;  %v8742_v17 = vpop.permute.xlu1 %4421 }
 0x2a6   :  { %v3162_v31 = vpop.f32.mrf.mxu1  ;;  %v8710_v26 = vpop.f32.mrf.mxu0  ;;  %4041 = vmatmul.mubr.bf16.gmra.mxu0 %v3657_v34  ;;  %10321 = vst [vmem:[#allocation34_spill] sm:$0xff] %v8742_v17 }
 0x2a7   :  { %v3163_v44 = vadd.f32 %v3162_v31, %v2970_v32  ;;  %v3159_v25 = vadd.f32 %v3158_v10, %v2966_v47  ;;  %v8740_v10 = vpop.permute.xlu0 %4396  ;;  %v10322_v47 = vld [vmem:[#allocation10_spill] sm:$0xff] }
 0x2a8   :  { %v3164_v34 = vpop.f32.mrf.mxu1  ;;  %v8725_v53 = vpop.f32.mrf.mxu0  ;;  %5235 = vperm.xlu1 %6172, %v6713_v1   ;;  %10320 = vst [vmem:[#allocation11_spill] sm:$0xff] %v8740_v10 }
 0x2a9   :  { %v3165_v15 = vadd.f32 %v3164_v34, %v2972_v13  ;;  %v3661_v32 = vpack.c.bf16 %v3163_v44, %v3159_v25  ;;  %5239 = vperm.xlu0 %6171, %v6714_v49   ;;  %v2978_v25 = vadd.f32 %v8452_v4, %v8490_v63  ;;  %v2982_v44 = vadd.f32 %v10322_v47, %v8490_v63  ;;  %v10323_v34 = vld [vmem:[#allocation36_spill] sm:$0xff]  ;;  %v8766_v19 = vpop.permute.xlu1 %4431 }
 0x2aa   :  { %v3168_v28 = vpop.f32.mrf.mxu1  ;;  %v8730_v55 = vpop.f32.mrf.mxu0  ;;  %10325 = vst [vmem:[#allocation14_spill] sm:$0xff] %v8766_v19 }
 0x2ab   :  { %v3662_v46 = vpack.c.bf16 %v3165_v15, %v3161_v12  ;;  %v2980_v15 = vadd.f32 %v8456_v27, %v8497_v41  ;;  %v2976_v12 = vadd.f32 %v10323_v34, %v8497_v41 }
 0x2ac   :  { %v3170_v31 = vpop.f32.mrf.mxu1  ;;  %v8735_v23 = vpop.f32.mrf.mxu0 }
 0x2ad   :  { %4048 = vmatprep.mubr.bf16.mxu0 %v3662_v46  ;;  %v6715_v46 = vld [vmem:[%s10066_s1 + $0x80] sm:$0xff]  ;;  %v3171_v4 = vadd.f32 %v3170_v31, %v2978_v25  ;;  %v3169_v47 = vadd.f32 %v3168_v28, %v2976_v12  ;;  %v6718_v28 = vld [vmem:[%s10066_s1 + $0x98] sm:$0xff]  ;;  %v10327_v12 = vld [vmem:[#allocation22_spill] sm:$0xff] }
 0x2ae   :  { %v3172_v38 = vpop.f32.mrf.mxu1  ;;  %v8746_v13 = vpop.f32.mrf.mxu0  ;;  %4049 = vmatmul.mubr.bf16.gmra.mxu0 %v3661_v32  ;;  %5243 = vperm.xlu1 %6172, %v6715_v46   ;;  %v6716_v32 = vld [vmem:[%s10066_s1 + $0x88] sm:$0xff]  ;;  %v10326_v31 = vld [vmem:[#allocation43_spill] sm:$0xff] }
 0x2af   :  { %v3173_v1 = vadd.f32 %v3172_v38, %v2980_v15  ;;  %5247 = vperm.xlu0 %6171, %v6716_v32   ;;  %v8764_v46 = vpop.permute.xlu0 %4406  ;;  %v6717_v15 = vld [vmem:[%s10066_s1 + $0x90] sm:$0xff] }
 0x2b0   :  { %v3174_v27 = vpop.f32.mrf.mxu1  ;;  %v8757_v49 = vpop.f32.mrf.mxu0  ;;  %10324 = vst [vmem:[#allocation29_spill] sm:$0xff] %v8764_v46 }
 0x2b1   :  { %v3175_v17 = vadd.f32 %v3174_v27, %v2982_v44  ;;  %v3665_v38 = vpack.c.bf16 %v3173_v1, %v3169_v47  ;;  %v2988_v27 = vadd.f32 %v10327_v12, %v8490_v63  ;;  %v10328_v1 = vld [vmem:[#allocation17_spill] sm:$0xff]  ;;  %v8796_v46 = vpop.permute.xlu1 %4441 }
 0x2b2   :  { %v3178_v10 = vpop.f32.mrf.mxu1  ;;  %v8762_v35 = vpop.f32.mrf.mxu0  ;;  %5251 = vperm.xlu1 %6172, %v6717_v15   ;;  %v2992_v32 = vadd.f32 %v10328_v1, %v8490_v63  ;;  %10331 = vst [vmem:[#allocation35_spill] sm:$0xff] %v8796_v46 }
 0x2b3   :  { %v3666_v22 = vpack.c.bf16 %v3175_v17, %v3171_v4  ;;  %5255 = vperm.xlu0 %6171, %v6718_v28   ;;  %v2990_v17 = vadd.f32 %v10326_v31, %v8497_v41  ;;  %v6719_v4 = vld [vmem:[%s10066_s1 + $0xa0] sm:$0xff]  ;;  %v8794_v1 = vpop.permute.xlu0 %4416 }
 0x2b4   :  { %v3180_v34 = vpop.f32.mrf.mxu1  ;;  %v8771_v5 = vpop.f32.mrf.mxu0  ;;  %10330 = vst [vmem:[#allocation9_spill] sm:$0xff] %v8794_v1 }
 0x2b5   :  { %4056 = vmatprep.mubr.bf16.mxu0 %v3666_v22  ;;  %v10329_v22 = vld [vmem:[#allocation28_spill] sm:$0xff]  ;;  %v3181_v12 = vadd.f32 %v3180_v34, %v2988_v27  ;;  %v6722_v34 = vld [vmem:[%s10066_s1 + $0xb8] sm:$0xff] }
 0x2b6   :  { %v3182_v25 = vpop.f32.mrf.mxu1  ;;  %v8778_v44 = vpop.f32.mrf.mxu0  ;;  %4057 = vmatmul.mubr.bf16.gmra.mxu0 %v3665_v38  ;;  %5259 = vperm.xlu1 %6172, %v6719_v4   ;;  %v2986_v47 = vadd.f32 %v10329_v22, %v8497_v41  ;;  %v6720_v38 = vld [vmem:[%s10066_s1 + $0xa8] sm:$0xff] }
 0x2b7   :  { %v3183_v15 = vadd.f32 %v3182_v25, %v2990_v17  ;;  %5263 = vperm.xlu0 %6171, %v6720_v38   ;;  %v6721_v17 = vld [vmem:[%s10066_s1 + $0xb0] sm:$0xff]  ;;  %v6723_v38 = vld [vmem:[%s10066_s1 + $0xc0] sm:$0xff] }
 0x2b8   :  { %v3184_v28 = vpop.f32.mrf.mxu1  ;;  %v8789_v31 = vpop.f32.mrf.mxu0  ;;  %v3179_v29 = vadd.f32 %v3178_v10, %v2986_v47  ;;  %v3000_v10 = vadd.f32 %v8513_v8, %v8497_v41  ;;  %v10335_v8 = vld [vmem:[#allocation37_spill] sm:$0xff] }
 0x2b9   :  { %v3185_v19 = vadd.f32 %v3184_v28, %v2992_v32  ;;  %v10332_v32 = vld [vmem:[#allocation38_spill] sm:$0xff]  ;;  %v8818_v28 = vpop.permute.xlu1 %4451 }
 0x2ba   :  { %v3188_v4 = vpop.f32.mrf.mxu1  ;;  %v8798_v18 = vpop.f32.mrf.mxu0  ;;  %5267 = vperm.xlu1 %6172, %v6721_v17   ;;  %v3669_v25 = vpack.c.bf16 %v3183_v15, %v3179_v29  ;;  %v2998_v47 = vadd.f32 %v10332_v32, %v8490_v63  ;;  %v3002_v29 = vadd.f32 %v8517_v50, %v8490_v63  ;;  %10334 = vst [vmem:[#allocation26_spill] sm:$0xff] %v8818_v28  ;;  %v6724_v50 = vld [vmem:[%s10066_s1 + $0xc8] sm:$0xff] }
 0x2bb   :  { %v3670_v22 = vpack.c.bf16 %v3185_v19, %v3181_v12  ;;  %5271 = vperm.xlu0 %6171, %v6722_v34   ;;  %v8816_v15 = vpop.permute.xlu0 %4426  ;;  %v2996_v12 = vadd.f32 %v10335_v8, %v8497_v41 }
 0x2bc   :  { %v3190_v54 = vpop.f32.mrf.mxu1  ;;  %v8803_v9 = vpop.f32.mrf.mxu0  ;;  %10333 = vst [vmem:[#allocation31_spill] sm:$0xff] %v8816_v15 }
 0x2bd   :  { %4064 = vmatprep.mubr.bf16.mxu0 %v3670_v22  ;;  %v3191_v34 = vadd.f32 %v3190_v54, %v2998_v47  ;;  %v3189_v28 = vadd.f32 %v3188_v4, %v2996_v12  ;;  %v8842_v4 = vpop.permute.xlu1 %4461  ;;  %v3010_v47 = vadd.f32 %v8539_v40, %v8497_v41 }
 0x2be   :  { %v3192_v27 = vpop.f32.mrf.mxu1  ;;  %v8810_v19 = vpop.f32.mrf.mxu0  ;;  %4065 = vmatmul.mubr.bf16.gmra.mxu0 %v3669_v25  ;;  %5275 = vperm.xlu1 %6172, %v6723_v38   ;;  %v6725_v38 = vld [vmem:[%s10066_s1 + $0xd0] sm:$0xff]  ;;  %10337 = vst [vmem:[#allocation10_spill] sm:$0xff] %v8842_v4 }
 0x2bf   :  { %v3193_v22 = vadd.f32 %v3192_v27, %v3000_v10  ;;  %5279 = vperm.xlu0 %6171, %v6724_v50   ;;  %v6726_v50 = vld [vmem:[%s10066_s1 + $0xd8] sm:$0xff]  ;;  %v8840_v54 = vpop.permute.xlu0 %4436 }
 0x2c0   :  { %v3194_v17 = vpop.f32.mrf.mxu1  ;;  %v8825_v25 = vpop.f32.mrf.mxu0  ;;  %10336 = vst [vmem:[#allocation41_spill] sm:$0xff] %v8840_v54 }
 0x2c1   :  { %v3195_v32 = vadd.f32 %v3194_v17, %v3002_v29  ;;  %v3673_v10 = vpack.c.bf16 %v3193_v22, %v3189_v28  ;;  %v3008_v28 = vadd.f32 %v8527_v7, %v8490_v63  ;;  %v3012_v22 = vadd.f32 %v8541_v14, %v8490_v63  ;;  %v8866_v6 = vpop.permute.xlu1 %4471 }
 0x2c2   :  { %v3198_v46 = vpop.f32.mrf.mxu1  ;;  %v8830_v15 = vpop.f32.mrf.mxu0  ;;  %5283 = vperm.xlu1 %6172, %v6725_v38   ;;  %v3006_v17 = vadd.f32 %v8523_v16, %v8497_v41  ;;  %v6728_v38 = vld [vmem:[%s10066_s1 + $0xe8] sm:$0xff]  ;;  %10339 = vst [vmem:[#allocation43_spill] sm:$0xff] %v8866_v6  ;;  %v6729_v16 = vld [vmem:[%s10066_s1 + $0xf0] sm:$0xff] }
 0x2c3   :  { %v3674_v1 = vpack.c.bf16 %v3195_v32, %v3191_v34  ;;  %5287 = vperm.xlu0 %6171, %v6726_v50  }
 0x2c4   :  { %v3200_v27 = vpop.f32.mrf.mxu1  ;;  %v8835_v8 = vpop.f32.mrf.mxu0  ;;  %v3199_v14 = vadd.f32 %v3198_v46, %v3006_v17  ;;  %v6730_v46 = vld [vmem:[%s10066_s1 + $0xf8] sm:$0xff]  ;;  %v3018_v17 = vadd.f32 %v8555_v58, %v8490_v63  ;;  %v3030_v58 = vadd.f32 %v8591_v30, %v8497_v41 }
 0x2c5   :  { %4072 = vmatprep.mubr.bf16.mxu0 %v3674_v1  ;;  %v6727_v1 = vld [vmem:[%s10066_s1 + $0xe0] sm:$0xff]  ;;  %v3201_v7 = vadd.f32 %v3200_v27, %v3008_v28  ;;  %v3020_v27 = vadd.f32 %v8565_v36, %v8497_v41 }
 0x2c6   :  { %v3202_v29 = vpop.f32.mrf.mxu1  ;;  %v8846_v12 = vpop.f32.mrf.mxu0  ;;  %4073 = vmatmul.mubr.bf16.gmra.mxu0 %v3673_v10  ;;  %5291 = vperm.xlu1 %6172, %v6727_v1  }
 0x2c7   :  { %v3203_v34 = vadd.f32 %v3202_v29, %v3010_v47  ;;  %5295 = vperm.xlu0 %6171, %v6728_v38   ;;  %v8864_v1 = vpop.permute.xlu0 %4446 }
 0x2c8   :  { %v3204_v40 = vpop.f32.mrf.mxu1  ;;  %v8857_v32 = vpop.f32.mrf.mxu0  ;;  %10338 = vst [vmem:[#allocation36_spill] sm:$0xff] %v8864_v1 }
 0x2c9   :  { %v3205_v10 = vadd.f32 %v3204_v40, %v3012_v22  ;;  %v3677_v47 = vpack.c.bf16 %v3203_v34, %v3199_v14  ;;  %v3022_v34 = vadd.f32 %v8567_v0, %v8490_v63  ;;  %v3016_v40 = vadd.f32 %v8547_v57, %v8497_v41 }
 0x2ca   :  { %v3208_v50 = vpop.f32.mrf.mxu1  ;;  %v8862_v4 = vpop.f32.mrf.mxu0  ;;  %5299 = vperm.xlu1 %6172, %v6729_v16   ;;  %v3028_v57 = vadd.f32 %v8581_v21, %v8490_v63  ;;  %v3040_v21 = vadd.f32 %v8622_v62, %v8497_v41 }
 0x2cb   :  { %v3678_v54 = vpack.c.bf16 %v3205_v10, %v3201_v7  ;;  %5303 = vperm.xlu0 %6171, %v6730_v46   ;;  %v3209_v36 = vadd.f32 %v3208_v50, %v3016_v40  ;;  %v3026_v50 = vadd.f32 %v8577_v24, %v8497_v41  ;;  %v3038_v24 = vadd.f32 %v8607_v37, %v8490_v63 }
 0x2cc   :  { %v3210_v29 = vpop.f32.mrf.mxu1  ;;  %v8871_v42 = vpop.f32.mrf.mxu0  ;;  %v3050_v37 = vadd.f32 %v8654_v61, %v8497_v41  ;;  %v10340_v61 = vld [vmem:[#allocation8_spill] sm:$0xff] }
 0x2cd   :  { %4080 = vmatprep.mubr.bf16.mxu0 %v3678_v54  ;;  %v3211_v54 = vadd.f32 %v3210_v29, %v3018_v17  ;;  %v3032_v29 = vadd.f32 %v8597_v48, %v8490_v63 }
 0x2ce   :  { %v3212_v28 = vpop.f32.mrf.mxu1  ;;  %v8878_v22 = vpop.f32.mrf.mxu0  ;;  %4081 = vmatmul.mubr.bf16.gmra.mxu0 %v3677_v47 }
 0x2cf   :  { %v3213_v38 = vadd.f32 %v3212_v28, %v3020_v27 }
 0x2d0   :  { %v3214_v7 = vpop.f32.mrf.mxu1  ;;  %v8886_v10 = vpop.f32.mrf.mxu0 }
 0x2d1   :  { %v3215_v14 = vadd.f32 %v3214_v7, %v3022_v34  ;;  %v3681_v6 = vpack.c.bf16 %v3213_v38, %v3209_v36  ;;  %v3036_v36 = vadd.f32 %v8603_v45, %v8497_v41  ;;  %v3048_v45 = vadd.f32 %v8643_v39, %v8490_v63 }
 0x2d2   :  { %v3218_v16 = vpop.f32.mrf.mxu1  ;;  %v8888_v47 = vpop.f32.mrf.mxu0 }
 0x2d3   :  { %v3682_v46 = vpack.c.bf16 %v3215_v14, %v3211_v54  ;;  %v3219_v38 = vadd.f32 %v3218_v16, %v3026_v50 }
 0x2d4   :  { %v3220_v1 = vpop.f32.mrf.mxu1  ;;  %v8898_v27 = vpop.f32.mrf.mxu0 }
 0x2d5   :  { %4088 = vmatprep.mubr.bf16.mxu0 %v3682_v46  ;;  %v3221_v34 = vadd.f32 %v3220_v1, %v3028_v57  ;;  %v3042_v1 = vadd.f32 %v8627_v56, %v8490_v63 }
 0x2d6   :  { %v3222_v0 = vpop.f32.mrf.mxu1  ;;  %4089 = vmatmul.mubr.bf16.gmra.mxu0 %v3681_v6  ;;  %v8900_v6 = vpop.f32.mrf.mxu0 }
 0x2d7   :  { %v3223_v28 = vadd.f32 %v3222_v0, %v3030_v58 }
 0x2d8   :  { %v3224_v17 = vpop.f32.mrf.mxu1  ;;  %v8910_v16 = vpop.f32.mrf.mxu0 }
 0x2d9   :  { %v3225_v40 = vadd.f32 %v3224_v17, %v3032_v29  ;;  %v3685_v54 = vpack.c.bf16 %v3223_v28, %v3219_v38  ;;  %v3046_v38 = vadd.f32 %v8632_v59, %v8497_v41 }
 0x2da   :  { %v3228_v7 = vpop.f32.mrf.mxu1  ;;  %v8912_v28 = vpop.f32.mrf.mxu0 }
 0x2db   :  { %v3686_v30 = vpack.c.bf16 %v3225_v40, %v3221_v34  ;;  %v3229_v29 = vadd.f32 %v3228_v7, %v3036_v36  ;;  %v3052_v40 = vadd.f32 %v8659_v52, %v8490_v63  ;;  %v10342_v36 = vld [vmem:[#allocation30_spill] sm:$0xff] }
 0x2dc   :  { %v3230_v14 = vpop.f32.mrf.mxu1  ;;  %v8922_v7 = vpop.f32.mrf.mxu0 }
 0x2dd   :  { %4096 = vmatprep.mubr.bf16.mxu0 %v3686_v30  ;;  %v3231_v0 = vadd.f32 %v3230_v14, %v3038_v24 }
 0x2de   :  { %v3232_v48 = vpop.f32.mrf.mxu1  ;;  %4097 = vmatmul.mubr.bf16.gmra.mxu0 %v3685_v54  ;;  %v8934_v41 = vpop.f32.mrf.mxu0 }
 0x2df   :  { %v3233_v46 = vadd.f32 %v3232_v48, %v3040_v21 }
 0x2e0   :  { %v3234_v58 = vpop.f32.mrf.mxu1 }
 0x2e1   :  { %v3235_v57 = vadd.f32 %v3234_v58, %v3042_v1  ;;  %v3689_v17 = vpack.c.bf16 %v3233_v46, %v3229_v29  ;;  %v10341_v1 = vsub.s32 3, %v10340_v61  ;;  %v10343_v58 = vsub.s32 2, %v10340_v61 }
 0x2e2   :  { %v3238_v50 = vpop.f32.mrf.mxu1 }
 0x2e3   :  { %v3690_v62 = vpack.c.bf16 %v3235_v57, %v3231_v0  ;;  %v3239_v48 = vadd.f32 %v3238_v50, %v3046_v38  ;;  %v8927_v46 = vrot.slane %v10342_v36, %v10341_v1  ;;  %v8932_v63 = vrot.slane %v10342_v36, %v10343_v58 }
 0x2e4   :  { %v3240_v34 = vpop.f32.mrf.mxu1 }
 0x2e5   :  { %4104 = vmatprep.mubr.bf16.mxu0 %v3690_v62  ;;  %v3241_v14 = vadd.f32 %v3240_v34, %v3048_v45  ;;  %v3286_v0 = vadd.f32 %v8688_v11, %v8932_v63  ;;  %v3284_v29 = vadd.f32 %v8677_v43, %v8927_v46  ;;  %v3288_v50 = vadd.f32 %v8697_v51, %v8927_v46 }
 0x2e6   :  { %v3242_v56 = vpop.f32.mrf.mxu1  ;;  %4105 = vmatmul.mubr.bf16.gmra.mxu0 %v3689_v17  ;;  %v3282_v62 = vadd.f32 %v8670_v60, %v8932_v63  ;;  %v8944_v17 = vpop.f32.mrf.mxu0  ;;  %v3296_v43 = vadd.f32 %v8725_v53, %v8932_v63  ;;  %v3294_v60 = vadd.f32 %v8710_v26, %v8927_v46 }
 0x2e7   :  { %v3243_v30 = vadd.f32 %v3242_v56, %v3050_v37 }
 0x2e8   :  { %v3244_v54 = vpop.f32.mrf.mxu1 }
 0x2e9   :  { %v3245_v21 = vadd.f32 %v3244_v54, %v3052_v40  ;;  %v3693_v59 = vpack.c.bf16 %v3243_v30, %v3239_v48  ;;  %v8946_v30 = vpop.f32.mrf.mxu0  ;;  %v3292_v48 = vadd.f32 %v8703_v2, %v8932_v63 }
 0x2ea   :  { %v3474_v24 = vpop.f32.mrf.mxu1 }
 0x2eb   :  { %v3694_v39 = vpack.c.bf16 %v3245_v21, %v3241_v14  ;;  %v3475_v40 = vadd.f32 %v3474_v24, %v3282_v62  ;;  %v3298_v21 = vadd.f32 %v8730_v55, %v8927_v46  ;;  %v8956_v24 = vpop.f32.mrf.mxu0  ;;  %v3306_v55 = vadd.f32 %v8757_v49, %v8932_v63  ;;  %v8968_v62 = vpop.permute.xlu1 %4543 }
 0x2ec   :  { %v3476_v52 = vpop.f32.mrf.mxu1 }
 0x2ed   :  { %4112 = vmatprep.mubr.bf16.mxu0 %v3694_v39  ;;  %v3477_v56 = vadd.f32 %v3476_v52, %v3284_v29  ;;  %v8958_v52 = vpop.permute.xlu0 %4456  ;;  %v3304_v29 = vadd.f32 %v8746_v13, %v8927_v46 }
 0x2ee   :  { %v3478_v57 = vpop.f32.mrf.mxu1  ;;  %4113 = vmatmul.mubr.bf16.gmra.mxu0 %v3693_v59  ;;  %10344 = vst [vmem:[#allocation22_spill] sm:$0xff] %v8958_v52 }
 0x2ef   :  { %v3479_v34 = vadd.f32 %v3478_v57, %v3286_v0  ;;  %v8960_v0 = vpop.f32.mrf.mxu0 }
 0x2f0   :  { %v3480_v37 = vpop.f32.mrf.mxu1 }
 0x2f1   :  { %v3481_v45 = vadd.f32 %v3480_v37, %v3288_v50  ;;  %v3635_v54 = vpack.c.bf16 %v3479_v34, %v3475_v40  ;;  %v3308_v50 = vadd.f32 %v8762_v35, %v8927_v46  ;;  %v3302_v34 = vadd.f32 %v8735_v23, %v8932_v63  ;;  %v8972_v37 = vpop.f32.mrf.mxu0  ;;  %v8974_v49 = vpop.permute.xlu0 %4466 }
 0x2f2   :  { %v3484_v38 = vpop.f32.mrf.mxu1  ;;  %10345 = vst [vmem:[#allocation17_spill] sm:$0xff] %v8974_v49  ;;  %v3316_v23 = vadd.f32 %v8789_v31, %v8932_v63 }
 0x2f3   :  { %v3636_v11 = vpack.c.bf16 %v3481_v45, %v3477_v56  ;;  %v3485_v58 = vadd.f32 %v3484_v38, %v3292_v48  ;;  %v8976_v13 = vpop.f32.mrf.mxu0  ;;  %v3318_v48 = vadd.f32 %v8798_v18, %v8927_v46 }
 0x2f4   :  { %v3486_v14 = vpop.f32.mrf.mxu1 }
 0x2f5   :  { %4153 = vmatprep.mubr.bf16.mxu1 %v3636_v11  ;;  %v3487_v36 = vadd.f32 %v3486_v14, %v3294_v60 }
 0x2f6   :  { %v3488_v51 = vpop.f32.mrf.mxu1  ;;  %4154 = vmatmul.mubr.bf16.vlgmr.msra.gmra.mxu1 %v3635_v54 }
 0x2f7   :  { %v3489_v61 = vadd.f32 %v3488_v51, %v3296_v43  ;;  %v8978_v51 = vpop.permute.xlu1 %4547 }
 0x2f8   :  { %v3490_v1 = vpop.f32.mrf.mxu1 }
 0x2f9   :  { %v3491_v39 = vadd.f32 %v3490_v1, %v3298_v21  ;;  %v3639_v26 = vpack.c.bf16 %v3489_v61, %v3485_v58  ;;  %v3314_v21 = vadd.f32 %v8778_v44, %v8927_v46  ;;  %v8986_v61 = vpop.permute.xlu0 %4539  ;;  %v3312_v1 = vadd.f32 %v8771_v5, %v8932_v63 }
 0x2fa   :  { %v3494_v59 = vpop.f32.mrf.mxu1  ;;  %v3326_v5 = vadd.f32 %v8825_v25, %v8932_v63 }
 0x2fb   :  { %v3640_v53 = vpack.c.bf16 %v3491_v39, %v3487_v36  ;;  %v3495_v11 = vadd.f32 %v3494_v59, %v3302_v34  ;;  %v8990_v36 = vpop.f32.mrf.mxu0  ;;  %v3324_v34 = vadd.f32 %v8810_v19, %v8927_v46 }
 0x2fc   :  { %v3496_v57 = vpop.f32.mrf.mxu1 }
 0x2fd   :  { %4161 = vmatprep.mubr.bf16.mxu1 %v3640_v53  ;;  %v3497_v40 = vadd.f32 %v3496_v57, %v3304_v29  ;;  %v8992_v57 = vpop.permute.xlu1 %4555  ;;  %v8994_v44 = vpop.f32.mrf.mxu0 }
 0x2fe   :  { %v3498_v2 = vpop.f32.mrf.mxu1  ;;  %4162 = vmatmul.mubr.bf16.gmra.mxu1 %v3639_v26  ;;  %v8996_v29 = vpop.permute.xlu0 %4551 }
 0x2ff   :  { %v3499_v56 = vadd.f32 %v3498_v2, %v3306_v55 }
 0x300   :  { %v3500_v45 = vpop.f32.mrf.mxu1 }
 0x301   :  { %v3501_v38 = vadd.f32 %v3500_v45, %v3308_v50  ;;  %v3643_v43 = vpack.c.bf16 %v3499_v56, %v3495_v11  ;;  %v3328_v56 = vadd.f32 %v8830_v15, %v8927_v46  ;;  %v3322_v45 = vadd.f32 %v8803_v9, %v8932_v63 }
 0x302   :  { %v3504_v54 = vpop.f32.mrf.mxu1  ;;  %v3336_v9 = vadd.f32 %v8857_v32, %v8932_v63 }
 0x303   :  { %v3644_v14 = vpack.c.bf16 %v3501_v38, %v3497_v40  ;;  %v3505_v31 = vadd.f32 %v3504_v54, %v3312_v1  ;;  %v9006_v40 = vpop.f32.mrf.mxu0  ;;  %v9008_v54 = vpop.permute.xlu1 %4563  ;;  %v3334_v1 = vadd.f32 %v8846_v12, %v8927_v46 }
 0x304   :  { %v3506_v35 = vpop.f32.mrf.mxu1 }
 0x305   :  { %4169 = vmatprep.mubr.bf16.mxu1 %v3644_v14  ;;  %v3507_v59 = vadd.f32 %v3506_v35, %v3314_v21  ;;  %v9012_v19 = vpop.f32.mrf.mxu0 }
 0x306   :  { %v3508_v60 = vpop.f32.mrf.mxu1  ;;  %4170 = vmatmul.mubr.bf16.gmra.mxu1 %v3643_v43 }
 0x307   :  { %v3509_v39 = vadd.f32 %v3508_v60, %v3316_v23  ;;  %v9010_v23 = vpop.permute.xlu0 %4559 }
 0x308   :  { %v3510_v58 = vpop.f32.mrf.mxu1 }
 0x309   :  { %v3511_v53 = vadd.f32 %v3510_v58, %v3318_v48  ;;  %v3647_v2 = vpack.c.bf16 %v3509_v39, %v3505_v31  ;;  %v3338_v39 = vadd.f32 %v8862_v4, %v8927_v46  ;;  %v9020_v58 = vpop.permute.xlu1 %4571 }
 0x30a   :  { %v3514_v26 = vpop.f32.mrf.mxu1 }
 0x30b   :  { %v3648_v55 = vpack.c.bf16 %v3511_v53, %v3507_v59  ;;  %v3515_v25 = vadd.f32 %v3514_v26, %v3322_v45  ;;  %v3332_v59 = vadd.f32 %v8835_v8, %v8932_v63  ;;  %v9024_v53 = vpop.f32.mrf.mxu0  ;;  %v3346_v8 = vadd.f32 %v8886_v10, %v8932_v63 }
 0x30c   :  { %v3516_v18 = vpop.f32.mrf.mxu1 }
 0x30d   :  { %4177 = vmatprep.mubr.bf16.mxu1 %v3648_v55  ;;  %v3517_v14 = vadd.f32 %v3516_v18, %v3324_v34  ;;  %v9026_v55 = vpop.permute.xlu0 %4567  ;;  %v9028_v12 = vpop.f32.mrf.mxu0 }
 0x30e   :  { %v3518_v50 = vpop.f32.mrf.mxu1  ;;  %4178 = vmatmul.mubr.bf16.gmra.mxu1 %v3647_v2 }
 0x30f   :  { %v3519_v38 = vadd.f32 %v3518_v50, %v3326_v5 }
 0x310   :  { %v3520_v11 = vpop.f32.mrf.mxu1 }
 0x311   :  { %v3521_v43 = vadd.f32 %v3520_v11, %v3328_v56  ;;  %v3651_v21 = vpack.c.bf16 %v3519_v38, %v3515_v25  ;;  %v9030_v56 = vpop.permute.xlu1 %4579  ;;  %v3344_v38 = vadd.f32 %v8878_v22, %v8927_v46  ;;  %v3348_v11 = vadd.f32 %v8888_v47, %v8927_v46  ;;  %v9042_v25 = vpop.f32.mrf.mxu0 }
 0x312   :  { %v3524_v35 = vpop.f32.mrf.mxu1 }
 0x313   :  { %v3652_v60 = vpack.c.bf16 %v3521_v43, %v3517_v14  ;;  %v3525_v18 = vadd.f32 %v3524_v35, %v3332_v59  ;;  %v9038_v14 = vpop.permute.xlu0 %4575  ;;  %v3342_v43 = vadd.f32 %v8871_v42, %v8932_v63  ;;  %v9046_v22 = vpop.f32.mrf.mxu0  ;;  %v3356_v42 = vadd.f32 %v8910_v16, %v8932_v63 }
 0x314   :  { %v3526_v15 = vpop.f32.mrf.mxu1 }
 0x315   :  { %4185 = vmatprep.mubr.bf16.mxu1 %v3652_v60  ;;  %v3527_v32 = vadd.f32 %v3526_v15, %v3334_v1 }
 0x316   :  { %v3528_v48 = vpop.f32.mrf.mxu1  ;;  %4186 = vmatmul.mubr.bf16.gmra.mxu1 %v3651_v21 }
 0x317   :  { %v3529_v31 = vadd.f32 %v3528_v48, %v3336_v9  ;;  %v9044_v48 = vpop.permute.xlu1 %4587  ;;  %v9048_v59 = vpop.permute.xlu0 %4583 }
 0x318   :  { %v3530_v26 = vpop.f32.mrf.mxu1 }
 0x319   :  { %v3531_v2 = vadd.f32 %v3530_v26, %v3338_v39  ;;  %v3655_v34 = vpack.c.bf16 %v3529_v31, %v3525_v18  ;;  %v3354_v26 = vadd.f32 %v8900_v6, %v8927_v46  ;;  %v9058_v18 = vpop.f32.mrf.mxu0 }
 0x31a   :  { %v3534_v5 = vpop.f32.mrf.mxu1 }
 0x31b   :  { %v3656_v50 = vpack.c.bf16 %v3531_v2, %v3527_v32  ;;  %v3535_v10 = vadd.f32 %v3534_v5, %v3342_v43  ;;  %v3358_v32 = vadd.f32 %v8912_v28, %v8927_v46  ;;  %v3352_v2 = vadd.f32 %v8898_v27, %v8932_v63  ;;  %v9064_v6 = vpop.f32.mrf.mxu0 }
 0x31c   :  { %v3536_v4 = vpop.f32.mrf.mxu1  ;;  %v3366_v27 = vadd.f32 %v8944_v17, %v8932_v63 }
 0x31d   :  { %4193 = vmatprep.mubr.bf16.mxu1 %v3656_v50  ;;  %v3537_v21 = vadd.f32 %v3536_v4, %v3344_v38  ;;  %v9062_v38 = vpop.permute.xlu0 %4591 }
 0x31e   :  { %v3538_v45 = vpop.f32.mrf.mxu1  ;;  %4194 = vmatmul.mubr.bf16.gmra.mxu1 %v3655_v34  ;;  %v9060_v34 = vpop.permute.xlu1 %4595 }
 0x31f   :  { %v3539_v35 = vadd.f32 %v3538_v45, %v3346_v8 }
 0x320   :  { %v3540_v60 = vpop.f32.mrf.mxu1 }
 0x321   :  { %v3541_v15 = vadd.f32 %v3540_v60, %v3348_v11  ;;  %v3659_v39 = vpack.c.bf16 %v3539_v35, %v3535_v10  ;;  %v3364_v60 = vadd.f32 %v8934_v41, %v8927_v46  ;;  %v3362_v10 = vadd.f32 %v8922_v7, %v8932_v63 }
 0x322   :  { %v3544_v9 = vpop.f32.mrf.mxu1  ;;  %v3376_v7 = vadd.f32 %v8972_v37, %v8932_v63 }
 0x323   :  { %v3660_v1 = vpack.c.bf16 %v3541_v15, %v3537_v21  ;;  %v3545_v16 = vadd.f32 %v3544_v9, %v3352_v2  ;;  %v3368_v21 = vadd.f32 %v8946_v30, %v8927_v46  ;;  %v9072_v15 = vpop.permute.xlu1 %4603  ;;  %v9076_v9 = vpop.f32.mrf.mxu0 }
 0x324   :  { %v3546_v47 = vpop.f32.mrf.mxu1  ;;  %10346 = vst [vmem:[#allocation28_spill] sm:$0xff] %v9072_v15 }
 0x325   :  { %4201 = vmatprep.mubr.bf16.mxu1 %v3660_v1  ;;  %v3547_v4 = vadd.f32 %v3546_v47, %v3354_v26  ;;  %v9078_v47 = vpop.permute.xlu0 %4599  ;;  %v9080_v41 = vpop.f32.mrf.mxu0 }
 0x326   :  { %v3548_v31 = vpop.f32.mrf.mxu1  ;;  %4202 = vmatmul.mubr.bf16.gmra.mxu1 %v3659_v39  ;;  %10347 = vst [vmem:[#allocation38_spill] sm:$0xff] %v9078_v47 }
 0x327   :  { %v3549_v5 = vadd.f32 %v3548_v31, %v3356_v42 }
 0x328   :  { %v3550_v50 = vpop.f32.mrf.mxu1 }
 0x329   :  { %v3551_v8 = vadd.f32 %v3550_v50, %v3358_v32  ;;  %v3663_v43 = vpack.c.bf16 %v3549_v5, %v3545_v16  ;;  %v9082_v5 = vpop.permute.xlu1 %4611  ;;  %v9090_v16 = vpop.permute.xlu0 %4607 }
 0x32a   :  { %v3554_v45 = vpop.f32.mrf.mxu1  ;;  %10348 = vst [vmem:[#allocation37_spill] sm:$0xff] %v9082_v5  ;;  %10349 = vst [vmem:[#allocation8_spill] sm:$0xff] %v9090_v16 }
 0x32b   :  { %v3664_v11 = vpack.c.bf16 %v3551_v8, %v3547_v4  ;;  %v3555_v31 = vadd.f32 %v3554_v45, %v3362_v10  ;;  %v3374_v4 = vadd.f32 %v8960_v0, %v8927_v46  ;;  %v3378_v8 = vadd.f32 %v8976_v13, %v8927_v46 }
 0x32c   :  { %v3556_v28 = vpop.f32.mrf.mxu1  ;;  %v3372_v45 = vadd.f32 %v8956_v24, %v8932_v63  ;;  %v3386_v24 = vadd.f32 %v9006_v40, %v8932_v63 }
 0x32d   :  { %4209 = vmatprep.mubr.bf16.mxu1 %v3664_v11  ;;  %v3557_v17 = vadd.f32 %v3556_v28, %v3364_v60  ;;  %v9094_v11 = vpop.f32.mrf.mxu0 }
 0x32e   :  { %v3558_v35 = vpop.f32.mrf.mxu1  ;;  %4210 = vmatmul.mubr.bf16.gmra.mxu1 %v3663_v43 }
 0x32f   :  { %v3559_v1 = vadd.f32 %v3558_v35, %v3366_v27  ;;  %v9098_v0 = vpop.f32.mrf.mxu0 }
 0x330   :  { %v3560_v39 = vpop.f32.mrf.mxu1 }
 0x331   :  { %v3561_v42 = vadd.f32 %v3560_v39, %v3368_v21  ;;  %v3667_v2 = vpack.c.bf16 %v3559_v1, %v3555_v31  ;;  %v9096_v21 = vpop.permute.xlu1 %4619  ;;  %v9100_v39 = vpop.permute.xlu0 %4615  ;;  %v3388_v31 = vadd.f32 %v9012_v19, %v8927_v46  ;;  %v3396_v19 = vadd.f32 %v9042_v25, %v8932_v63 }
 0x332   :  { %v3564_v26 = vpop.f32.mrf.mxu1  ;;  %10350 = vst [vmem:[#allocation30_spill] sm:$0xff] %v9096_v21  ;;  %10351 = vst [vmem:[#allocation45_spill] sm:$0xff] %v9100_v39 }
 0x333   :  { %v3668_v32 = vpack.c.bf16 %v3561_v42, %v3557_v17  ;;  %v3565_v37 = vadd.f32 %v3564_v26, %v3372_v45  ;;  %v3384_v42 = vadd.f32 %v8994_v44, %v8927_v46  ;;  %v3382_v26 = vadd.f32 %v8990_v36, %v8932_v63 }
 0x334   :  { %v3566_v30 = vpop.f32.mrf.mxu1 }
 0x335   :  { %4217 = vmatprep.mubr.bf16.mxu1 %v3668_v32  ;;  %v3567_v27 = vadd.f32 %v3566_v30, %v3374_v4  ;;  %v3415_v32 = vpop.f32.mrf.mxu0  ;;  %v9112_v45 = vpop.permute.xlu0 %4623 }
 0x336   :  { %v3568_v50 = vpop.f32.mrf.mxu1  ;;  %4218 = vmatmul.mubr.bf16.gmra.mxu1 %v3667_v2  ;;  %10353 = vst [vmem:[#allocation47_spill] sm:$0xff] %v9112_v45 }
 0x337   :  { %v3569_v43 = vadd.f32 %v3568_v50, %v3376_v7  ;;  %v9110_v7 = vpop.permute.xlu1 %4627 }
 0x338   :  { %v3570_v28 = vpop.f32.mrf.mxu1  ;;  %10352 = vst [vmem:[#allocation46_spill] sm:$0xff] %v9110_v7 }
 0x339   :  { %v3571_v35 = vadd.f32 %v3570_v28, %v3378_v8  ;;  %v3671_v1 = vpack.c.bf16 %v3569_v43, %v3565_v37  ;;  %v3417_v28 = vpop.f32.mrf.mxu0  ;;  %v3398_v37 = vadd.f32 %v9046_v22, %v8927_v46  ;;  %v3406_v22 = vadd.f32 %v9076_v9, %v8932_v63 }
 0x33a   :  { %v3574_v60 = vpop.f32.mrf.mxu1 }
 0x33b   :  { %v3672_v10 = vpack.c.bf16 %v3571_v35, %v3567_v27  ;;  %v3575_v8 = vadd.f32 %v3574_v60, %v3382_v26  ;;  %v3394_v35 = vadd.f32 %v9028_v12, %v8927_v46  ;;  %v9120_v60 = vpop.permute.xlu1 %4635 }
 0x33c   :  { %v3576_v13 = vpop.f32.mrf.mxu1  ;;  %10354 = vst [vmem:[#allocation48_spill] sm:$0xff] %v9120_v60 }
 0x33d   :  { %4225 = vmatprep.mubr.bf16.mxu1 %v3672_v10  ;;  %v3577_v50 = vadd.f32 %v3576_v13, %v3384_v42  ;;  %v3392_v10 = vadd.f32 %v9024_v53, %v8932_v63 }
 0x33e   :  { %v3578_v17 = vpop.f32.mrf.mxu1  ;;  %4226 = vmatmul.mubr.bf16.gmra.mxu1 %v3671_v1  ;;  %v3421_v1 = vpop.f32.mrf.mxu0 }
 0x33f   :  { %v3579_v2 = vadd.f32 %v3578_v17, %v3386_v24  ;;  %v9124_v17 = vpop.permute.xlu0 %4631 }
 0x340   :  { %v3580_v30 = vpop.f32.mrf.mxu1  ;;  %10355 = vst [vmem:[#allocation49_spill] sm:$0xff] %v9124_v17 }
 0x341   :  { %v3581_v4 = vadd.f32 %v3580_v30, %v3388_v31  ;;  %v3675_v44 = vpack.c.bf16 %v3579_v2, %v3575_v8  ;;  %v3423_v30 = vpop.f32.mrf.mxu0  ;;  %v3404_v8 = vadd.f32 %v9064_v6, %v8927_v46 }
 0x342   :  { %v3584_v40 = vpop.f32.mrf.mxu1 }
 0x343   :  { %v3676_v43 = vpack.c.bf16 %v3581_v4, %v3577_v50  ;;  %v3585_v31 = vadd.f32 %v3584_v40, %v3392_v10  ;;  %v9126_v4 = vpop.permute.xlu1 %4643  ;;  %v9134_v40 = vpop.permute.xlu0 %4639 }
 0x344   :  { %v3586_v27 = vpop.f32.mrf.mxu1  ;;  %10356 = vst [vmem:[#allocation50_spill] sm:$0xff] %v9126_v4  ;;  %10357 = vst [vmem:[#allocation51_spill] sm:$0xff] %v9134_v40 }
 0x345   :  { %4233 = vmatprep.mubr.bf16.mxu1 %v3676_v43  ;;  %v3587_v42 = vadd.f32 %v3586_v27, %v3394_v35  ;;  %v3408_v43 = vadd.f32 %v9080_v41, %v8927_v46  ;;  %v3425_v27 = vpop.f32.mrf.mxu0  ;;  %v3416_v41 = vadd.f32 %v3415_v32, %v8932_v63 }
 0x346   :  { %v3588_v36 = vpop.f32.mrf.mxu1  ;;  %4234 = vmatmul.mubr.bf16.gmra.mxu1 %v3675_v44  ;;  %v3402_v44 = vadd.f32 %v9058_v18, %v8932_v63  ;;  %v3414_v18 = vadd.f32 %v9098_v0, %v8927_v46 }
 0x347   :  { %v3589_v13 = vadd.f32 %v3588_v36, %v3396_v19 }
 0x348   :  { %v3590_v24 = vpop.f32.mrf.mxu1 }
 0x349   :  { %v3591_v25 = vadd.f32 %v3590_v24, %v3398_v37  ;;  %v3679_v12 = vpack.c.bf16 %v3589_v13, %v3585_v31  ;;  %v9138_v13 = vpop.permute.xlu1 %4651  ;;  %v9140_v31 = vpop.permute.xlu0 %4647 }
 0x34a   :  { %v3594_v26 = vpop.f32.mrf.mxu1  ;;  %10358 = vst [vmem:[#allocation52_spill] sm:$0xff] %v9138_v13  ;;  %10359 = vst [vmem:[#allocation53_spill] sm:$0xff] %v9140_v31 }
 0x34b   :  { %v3680_v2 = vpack.c.bf16 %v3591_v25, %v3587_v42  ;;  %v3595_v10 = vadd.f32 %v3594_v26, %v3402_v44  ;;  %v3427_v42 = vpop.f32.mrf.mxu0  ;;  %v3412_v26 = vadd.f32 %v9094_v11, %v8932_v63  ;;  %v3424_v11 = vadd.f32 %v3423_v30, %v8927_v46 }
 0x34c   :  { %v3596_v50 = vpop.f32.mrf.mxu1 }
 0x34d   :  { %4241 = vmatprep.mubr.bf16.mxu1 %v3680_v2  ;;  %v3597_v35 = vadd.f32 %v3596_v50, %v3404_v8  ;;  %v3431_v50 = vpop.f32.mrf.mxu0  ;;  %v9148_v8 = vpop.permute.xlu1 %4659 }
 0x34e   :  { %v3598_v53 = vpop.f32.mrf.mxu1  ;;  %4242 = vmatmul.mubr.bf16.gmra.mxu1 %v3679_v12  ;;  %v3418_v12 = vadd.f32 %v3417_v28, %v8927_v46  ;;  %10360 = vst [vmem:[#allocation54_spill] sm:$0xff] %v9148_v8  ;;  %v9150_v32 = vpop.permute.xlu0 %4655  ;;  %v3426_v28 = vadd.f32 %v3425_v27, %v8932_v63 }
 0x34f   :  { %v3599_v19 = vadd.f32 %v3598_v53, %v3406_v22  ;;  %10361 = vst [vmem:[#allocation55_spill] sm:$0xff] %v9150_v32 }
 0x350   :  { %v3600_v36 = vpop.f32.mrf.mxu1 }
 0x351   :  { %v3601_v37 = vadd.f32 %v3600_v36, %v3408_v43  ;;  %v3683_v6 = vpack.c.bf16 %v3599_v19, %v3595_v10 }
 0x352   :  { %v3604_v9 = vpop.f32.mrf.mxu1 }
 0x353   :  { %v3684_v24 = vpack.c.bf16 %v3601_v37, %v3597_v35  ;;  %v3605_v19 = vadd.f32 %v3604_v9, %v3412_v26  ;;  %v3433_v37 = vpop.f32.mrf.mxu0  ;;  %v3422_v9 = vadd.f32 %v3421_v1, %v8932_v63 }
 0x354   :  { %v3606_v25 = vpop.f32.mrf.mxu1 }
 0x355   :  { %4249 = vmatprep.mubr.bf16.mxu1 %v3684_v24  ;;  %v3607_v43 = vadd.f32 %v3606_v25, %v3414_v18  ;;  %v3435_v25 = vpop.f32.mrf.mxu0 }
 0x356   :  { %v3608_v2 = vpop.f32.mrf.mxu1  ;;  %4250 = vmatmul.mubr.bf16.gmra.mxu1 %v3683_v6  ;;  %v3428_v6 = vadd.f32 %v3427_v42, %v8927_v46  ;;  %v3436_v1 = vadd.f32 %v3435_v25, %v8932_v63 }
 0x357   :  { %v3609_v22 = vadd.f32 %v3608_v2, %v3416_v41  ;;  %v9155_v41 = vpop.permute.xlu1 %4859 }
 0x358   :  { %v3610_v53 = vpop.f32.mrf.mxu1 }
 0x359   :  { %v3611_v44 = vadd.f32 %v3610_v53, %v3418_v12  ;;  %v3687_v10 = vpack.c.bf16 %v3609_v22, %v3605_v19  ;;  %v9158_v12 = vpop.permute.xlu0 %4663 }
 0x35a   :  { %v3614_v36 = vpop.f32.mrf.mxu1  ;;  %10362 = vst [vmem:[#allocation56_spill] sm:$0xff] %v9158_v12 }
 0x35b   :  { %v3688_v35 = vpack.c.bf16 %v3611_v44, %v3607_v43  ;;  %v3615_v53 = vadd.f32 %v3614_v36, %v3422_v9  ;;  %v3437_v44 = vpop.f32.mrf.mxu0  ;;  %v9160_v30 = vpop.permute.xlu1 %4867  ;;  %v3432_v36 = vadd.f32 %v3431_v50, %v8932_v63 }
 0x35c   :  { %v3616_v0 = vpop.f32.mrf.mxu1 }
 0x35d   :  { %4257 = vmatprep.mubr.bf16.mxu1 %v3688_v35  ;;  %v3617_v26 = vadd.f32 %v3616_v0, %v3424_v11  ;;  %v9162_v42 = vpop.permute.xlu0 %4863  ;;  %v3438_v0 = vadd.f32 %v3437_v44, %v8927_v46 }
 0x35e   :  { %v3618_v24 = vpop.f32.mrf.mxu1  ;;  %4258 = vmatmul.mubr.bf16.gmra.mxu1 %v3687_v10 }
 0x35f   :  { %v3619_v2 = vadd.f32 %v3618_v24, %v3426_v28  ;;  %v3434_v28 = vadd.f32 %v3433_v37, %v8927_v46 }
 0x360   :  { %v3620_v18 = vpop.f32.mrf.mxu1 }
 0x361   :  { %v3621_v22 = vadd.f32 %v3620_v18, %v3428_v6  ;;  %v3691_v19 = vpack.c.bf16 %v3619_v2, %v3615_v53  ;;  %v9168_v18 = vpop.permute.xlu1 %4871  ;;  %v5946_v53 = vpop.f32.mrf.mxu0 }
 0x362   :  { %v3624_v43 = vpop.f32.mrf.mxu1 }
 0x363   :  { %v3692_v27 = vpack.c.bf16 %v3621_v22, %v3617_v26  ;;  %v3625_v2 = vadd.f32 %v3624_v43, %v3432_v36  ;;  %v9170_v26 = vpop.permute.xlu0 %4875 }
 0x364   :  { %v3626_v35 = vpop.f32.mrf.mxu1 }
 0x365   :  { %4265 = vmatprep.mubr.bf16.mxu1 %v3692_v27  ;;  %v3627_v6 = vadd.f32 %v3626_v35, %v3434_v28  ;;  %v5947_v27 = vpop.f32.mrf.mxu0  ;;  %v9172_v37 = vpop.permute.xlu1 %4879 }
 0x366   :  { %v3628_v10 = vpop.f32.mrf.mxu1  ;;  %4266 = vmatmul.mubr.bf16.gmra.mxu1 %v3691_v19  ;;  %v5948_v39 = vadd.f32 %v5947_v27, %v5946_v53 }
 0x367   :  { %v3629_v24 = vadd.f32 %v3628_v10, %v3436_v1  ;;  %v9174_v46 = vpop.permute.xlu0 %4883  ;;  %v5949_v63 = vpop.f32.mrf.mxu0 }
 0x368   :  { %v3630_v11 = vpop.f32.mrf.mxu1 }
 0x369   :  { %v3631_v9 = vadd.f32 %v3630_v11, %v3438_v0  ;;  %v3695_v25 = vpack.c.bf16 %v3629_v24, %v3625_v2  ;;  %v9176_v50 = vpop.permute.xlu1 %4887  ;;  %v5950_v43 = vpop.f32.mrf.mxu0 }
 0x36b   :  { %v3696_v22 = vpack.c.bf16 %v3631_v9, %v3627_v6  ;;  %v9178_v44 = vpop.permute.xlu0 %4891  ;;  %v5952_v19 = vpop.f32.mrf.mxu0 }
 0x36d   :  { %4273 = vmatprep.mubr.bf16.mxu1 %v3696_v22  ;;  %v9180_v35 = vpop.permute.xlu1 %4895  ;;  %v5953_v10 = vpop.f32.mrf.mxu0 }
 0x36e   :  { %4274 = vmatmul.mubr.bf16.gmra.mxu1 %v3695_v25 }
 0x36f   :  { %v9182_v1 = vpop.permute.xlu0 %4899  ;;  %v9188_v36 = vpop.f32.mrf.mxu0 }
 0x371   :  { %v9184_v28 = vpop.permute.xlu1 %4903  ;;  %v5956_v24 = vpop.f32.mrf.mxu0 }
 0x373   :  { %v9186_v0 = vpop.permute.xlu0 %4907  ;;  %v9194_v9 = vpop.f32.mrf.mxu0 }
 0x375   :  { %v9190_v11 = vpop.permute.xlu1 %4911  ;;  %v9200_v25 = vpop.f32.mrf.mxu0 }
 0x377   :  { %v9192_v6 = vpop.permute.xlu0 %4915  ;;  %v9202_v49 = vpop.f32.mrf.mxu0 }
 0x379   :  { %v9196_v2 = vpop.permute.xlu1 %4919  ;;  %v9208_v8 = vpop.f32.mrf.mxu0 }
 0x37a   :  { %10363 = vst [vmem:[#allocation57_spill] sm:$0xff] %v9196_v2 }
 0x37b   :  { %v9198_v22 = vpop.permute.xlu0 %4923  ;;  %v9214_v31 = vpop.f32.mrf.mxu0 }
 0x37c   :  { %10364 = vst [vmem:[#allocation58_spill] sm:$0xff] %v9198_v22 }
 0x37d   :  { %v9204_v52 = vpop.permute.xlu1 %4927  ;;  %v9216_v4 = vpop.f32.mrf.mxu0 }
 0x37e   :  { %10365 = vst [vmem:[#allocation59_spill] sm:$0xff] %v9204_v52 }
 0x37f   :  { %v9206_v12 = vpop.permute.xlu0 %4931  ;;  %v9222_v17 = vpop.f32.mrf.mxu0 }
 0x380   :  { %10366 = vst [vmem:[#allocation60_spill] sm:$0xff] %v9206_v12  ;;  %v5951_v12 = vadd.f32 %v5950_v43, %v5949_v63  ;;  %v5954_v43 = vadd.f32 %v5953_v10, %v5952_v19  ;;  %v5957_v10 = vadd.f32 %v5956_v24, %v9188_v36 }
 0x381   :  { %v9210_v32 = vpop.permute.xlu1 %4935  ;;  %v9228_v45 = vpop.f32.mrf.mxu0 }
 0x382   :  { %10367 = vst [vmem:[#allocation61_spill] sm:$0xff] %v9210_v32 }
 0x383   :  { %v9212_v13 = vpop.permute.xlu0 %4939  ;;  %v9230_v3 = vpop.f32.mrf.mxu0 }
 0x384   :  { %10368 = vst [vmem:[#allocation62_spill] sm:$0xff] %v9212_v13 }
 0x385   :  { %v9218_v40 = vpop.permute.xlu1 %4943  ;;  %v9236_v32 = vpop.f32.mrf.mxu0 }
 0x386   :  { %10369 = vst [vmem:[#allocation63_spill] sm:$0xff] %v9218_v40 }
 0x387   :  { %v9220_v60 = vpop.permute.xlu0 %4947 }
 0x388   :  { %10370 = vst [vmem:[#allocation64_spill] sm:$0xff] %v9220_v60  ;;  %v9242_v60 = vpop.f32.mrf.mxu0 }
 0x389   :  { %v9224_v7 = vpop.permute.xlu1 %4951 }
 0x38a   :  { %10371 = vst [vmem:[#allocation65_spill] sm:$0xff] %v9224_v7  ;;  %v9249_v5 = vpop.f32.mrf.mxu0 }
 0x38b   :  { %v9226_v33 = vpop.permute.xlu0 %4955 }
 0x38c   :  { %10372 = vst [vmem:[#allocation66_spill] sm:$0xff] %v9226_v33  ;;  %v9247_v33 = vld [vmem:[%s10072_s7] ss:$0 sm:$0xff]  ;;  %v9258_v53 = vpop.f32.mrf.mxu0 }
 0x38d   :  { %v9232_v21 = vpop.permute.xlu1 %4959  ;;  %v3998_v22 = vadd.f32 %v5951_v12, %v9247_v33  ;;  %v4003_v19 = vadd.f32 %v5954_v43, %v9247_v33  ;;  %v4006_v36 = vadd.f32 %v5957_v10, %v9247_v33 }
 0x38e   :  { %10373 = vst [vmem:[#allocation67_spill] sm:$0xff] %v9232_v21 }
 0x38f   :  { %v9234_v13 = vpop.permute.xlu0 %4963 }
 0x390   :  { %10374 = vst [vmem:[#allocation68_spill] sm:$0xff] %v9234_v13  ;;  %v3995_v13 = vadd.f32 %v5948_v39, %v9247_v33 }
 0x391   :  { %v9238_v20 = vpop.permute.xlu1 %4967 }
 0x392   :  { %10375 = vst [vmem:[#allocation69_spill] sm:$0xff] %v9238_v20 }
 0x393   :  { %v9240_v40 = vpop.permute.xlu0 %4971 }
 0x394   :  { %10376 = vst [vmem:[#allocation70_spill] sm:$0xff] %v9240_v40 }
 0x395   :  { %v9252_v52 = vpop.permute.xlu1 %4975 }
 0x396   :  { %10377 = vst [vmem:[#allocation71_spill] sm:$0xff] %v9252_v52 }
 0x397   :  { %v9254_v20 = vpop.permute.xlu0 %4979 }
 0x399   :  { %v9265_v52 = vpop.permute.xlu1 %4983 }
 0x3b6   :  { %v6058_v7 = vpop.f32.mrf.mxu1 }
 0x3b8   :  { %v6059_v21 = vpop.f32.mrf.mxu1 }
 0x3b9   :  { %v6060_v40 = vadd.f32 %v6059_v21, %v6058_v7  ;;  %v5180_v21 = vpop.permute.xlu0 %5179 }
 0x3ba   :  { %v6061_v16 = vpop.f32.mrf.mxu1 }
 0x3bb   :  { %v9256_v15 = vadd.f32 %v6060_v40, %v3995_v13 }
 0x3bc   :  { %v6062_v27 = vpop.f32.mrf.mxu1 }
 0x3bd   :  { %v6063_v2 = vadd.f32 %v6062_v27, %v6061_v16  ;;  %v4986_v47 = vmul.f32 %v9155_v41, %v9256_v15  ;;  %v4666_v39 = vmul.f32 %v8986_v61, %v9256_v15  ;;  %v9271_v16 = vpop.f32.mrf.mxu0  ;;  %v5306_v41 = vmul.f32 %v5180_v21, %v9256_v15 }
 0x3be   :  { %v6064_v63 = vpop.f32.mrf.mxu1 }
 0x3bf   :  { %v9267_v7 = vadd.f32 %v6063_v2, %v3998_v22  ;;  %5050 = vrot.lane.b32.xlu0 %v4986_v47, %s6784_s28  ;;  %4730 = vrot.lane.b32.xlu1 %v4666_v39, %s6785_s29  ;;  %v5184_v2 = vpop.permute.xlu1 %5183  ;;  %v9280_v47 = vpop.f32.mrf.mxu0 }
 0x3c0   :  { %v6065_v40 = vpop.f32.mrf.mxu1 }
 0x3c1   :  { %v6066_v13 = vadd.f32 %v6065_v40, %v6064_v63  ;;  %v4667_v61 = vmul.f32 %v8968_v62, %v9267_v7  ;;  %v5307_v62 = vmul.f32 %v5184_v2, %v9267_v7  ;;  %v4987_v63 = vmul.f32 %v9162_v42, %v9267_v7  ;;  %v9290_v24 = vpop.f32.mrf.mxu0 }
 0x3c2   :  { %v6067_v12 = vpop.f32.mrf.mxu1  ;;  %v5960_v42 = vadd.f32 %v9200_v25, %v9194_v9  ;;  %v5963_v9 = vadd.f32 %v9208_v8, %v9202_v49  ;;  %v5192_v25 = vpop.permute.xlu0 %5191 }
 0x3c3   :  { %4732 = vrot.lane.b32.xlu0 %v4667_v61, %s6785_s29  ;;  %5370 = vrot.lane.b32.xlu1 %v5306_v41, %s6786_s30  ;;  %v9282_v27 = vadd.f32 %v6066_v13, %v4003_v19  ;;  %v9302_v19 = vpop.f32.mrf.mxu0 }
 0x3c4   :  { %v6068_v22 = vpop.f32.mrf.mxu1 }
 0x3c5   :  { %v6069_v39 = vadd.f32 %v6068_v22, %v6067_v12  ;;  %v4988_v13 = vmul.f32 %v9160_v30, %v9282_v27  ;;  %v4668_v61 = vmul.f32 %v8978_v51, %v9282_v27  ;;  %v5188_v12 = vpop.permute.xlu1 %5187  ;;  %v4011_v51 = vadd.f32 %v5960_v42, %v9247_v33 }
 0x3c6   :  { %v6070_v43 = vpop.f32.mrf.mxu1  ;;  %v5308_v30 = vmul.f32 %v5188_v12, %v9282_v27 }
 0x3c7   :  { %5372 = vrot.lane.b32.xlu0 %v5307_v62, %s6786_s30  ;;  %5052 = vrot.lane.b32.xlu1 %v4987_v63, %s6784_s28  ;;  %v9292_v40 = vadd.f32 %v6069_v39, %v4006_v36  ;;  %v9312_v62 = vpop.f32.mrf.mxu0 }
 0x3c8   :  { %v6071_v21 = vpop.f32.mrf.mxu1 }
 0x3c9   :  { %v6072_v2 = vadd.f32 %v6071_v21, %v6070_v43  ;;  %v4669_v22 = vmul.f32 %v8996_v29, %v9292_v40  ;;  %v5309_v29 = vmul.f32 %v5192_v25, %v9292_v40  ;;  %v4989_v21 = vmul.f32 %v9168_v18, %v9292_v40  ;;  %v9322_v49 = vpop.f32.mrf.mxu0 }
 0x3ca   :  { %v6073_v41 = vpop.f32.mrf.mxu1  ;;  %v5966_v18 = vadd.f32 %v9216_v4, %v9214_v31  ;;  %v5969_v4 = vadd.f32 %v9228_v45, %v9222_v17  ;;  %v5200_v31 = vpop.permute.xlu0 %5199 }
 0x3cb   :  { %5054 = vrot.lane.b32.xlu0 %v4988_v13, %s6784_s28  ;;  %4734 = vrot.lane.b32.xlu1 %v4668_v61, %s6785_s29  ;;  %v9314_v43 = vadd.f32 %v6072_v2, %v4011_v51  ;;  %v4014_v61 = vadd.f32 %v5963_v9, %v9247_v33  ;;  %v5196_v2 = vpop.permute.xlu1 %5195 }
 0x3cc   :  { %v6074_v10 = vpop.f32.mrf.mxu1 }
 0x3cd   :  { %v6075_v36 = vadd.f32 %v6074_v10, %v6073_v41  ;;  %v4990_v41 = vmul.f32 %v9170_v26, %v9314_v43  ;;  %v4670_v12 = vmul.f32 %v8992_v57, %v9314_v43  ;;  %v5310_v26 = vmul.f32 %v5196_v2, %v9314_v43 }
 0x3ce   :  { %v6076_v39 = vpop.f32.mrf.mxu1  ;;  %v4019_v57 = vadd.f32 %v5966_v18, %v9247_v33 }
 0x3cf   :  { %4736 = vrot.lane.b32.xlu0 %v4669_v22, %s6785_s29  ;;  %5374 = vrot.lane.b32.xlu1 %v5308_v30, %s6786_s30  ;;  %v9324_v42 = vadd.f32 %v6075_v36, %v4014_v61  ;;  %v9334_v22 = vpop.f32.mrf.mxu0  ;;  %v5204_v2 = vpop.permute.xlu1 %5203 }
 0x3d0   :  { %v6077_v63 = vpop.f32.mrf.mxu1 }
 0x3d1   :  { %v6078_v51 = vadd.f32 %v6077_v63, %v6076_v39  ;;  %v4671_v9 = vmul.f32 %v9010_v23, %v9324_v42  ;;  %v9344_v36 = vpop.f32.mrf.mxu0  ;;  %v5311_v23 = vmul.f32 %v5200_v31, %v9324_v42 }
 0x3d2   :  { %v6079_v13 = vpop.f32.mrf.mxu1 }
 0x3d3   :  { %5376 = vrot.lane.b32.xlu0 %v5309_v29, %s6786_s30  ;;  %5056 = vrot.lane.b32.xlu1 %v4989_v21, %s6784_s28  ;;  %v9346_v39 = vadd.f32 %v6078_v51, %v4019_v57  ;;  %v4991_v21 = vmul.f32 %v9172_v37, %v9324_v42  ;;  %v9354_v45 = vpop.f32.mrf.mxu0  ;;  %v5972_v37 = vadd.f32 %v9236_v32, %v9230_v3 }
 0x3d4   :  { %v6080_v8 = vpop.f32.mrf.mxu1  ;;  %v5975_v3 = vadd.f32 %v9249_v5, %v9242_v60  ;;  %v5212_v5 = vpop.permute.xlu1 %5211 }
 0x3d5   :  { %v6081_v63 = vadd.f32 %v6080_v8, %v6079_v13  ;;  %v4992_v13 = vmul.f32 %v9174_v46, %v9346_v39  ;;  %v4672_v8 = vmul.f32 %v9008_v54, %v9346_v39  ;;  %v9366_v51 = vpop.f32.mrf.mxu0  ;;  %v4027_v31 = vadd.f32 %v5972_v37, %v9247_v33 }
 0x3d6   :  { %v6082_v10 = vpop.f32.mrf.mxu1 }
 0x3d7   :  { %5058 = vrot.lane.b32.xlu0 %v4990_v41, %s6784_s28  ;;  %4738 = vrot.lane.b32.xlu1 %v4670_v12, %s6785_s29  ;;  %v4022_v41 = vadd.f32 %v5969_v4, %v9247_v33  ;;  %v5312_v4 = vmul.f32 %v5204_v2, %v9346_v39  ;;  %v9378_v32 = vpop.f32.mrf.mxu0  ;;  %v5978_v2 = vadd.f32 %v9271_v16, %v9258_v53 }
 0x3d8   :  { %v6083_v30 = vpop.f32.mrf.mxu1  ;;  %v5981_v16 = vadd.f32 %v9290_v24, %v9280_v47 }
 0x3d9   :  { %v9356_v12 = vadd.f32 %v6081_v63, %v4022_v41  ;;  %v6084_v57 = vadd.f32 %v6083_v30, %v6082_v10  ;;  %v4030_v41 = vadd.f32 %v5975_v3, %v9247_v33  ;;  %v9388_v60 = vpop.f32.mrf.mxu0  ;;  %v4035_v53 = vadd.f32 %v5978_v2, %v9247_v33 }
 0x3da   :  { %v6085_v25 = vpop.f32.mrf.mxu1  ;;  %v4038_v47 = vadd.f32 %v5981_v16, %v9247_v33  ;;  %v5984_v2 = vadd.f32 %v9312_v62, %v9302_v19 }
 0x3db   :  { %4740 = vrot.lane.b32.xlu0 %v4671_v9, %s6785_s29  ;;  %5378 = vrot.lane.b32.xlu1 %v5310_v26, %s6786_s30  ;;  %v5208_v26 = vpop.permute.xlu0 %5207  ;;  %v4673_v46 = vmul.f32 %v9026_v55, %v9356_v12  ;;  %v9380_v10 = vadd.f32 %v6084_v57, %v4027_v31 }
 0x3dc   :  { %v6086_v29 = vpop.f32.mrf.mxu1  ;;  %v5313_v55 = vmul.f32 %v5208_v26, %v9356_v12  ;;  %v9402_v26 = vpop.f32.mrf.mxu0  ;;  %v4043_v62 = vadd.f32 %v5984_v2, %v9247_v33 }
 0x3dd   :  { %v6087_v30 = vadd.f32 %v6086_v29, %v6085_v25  ;;  %v4994_v25 = vmul.f32 %v9178_v44, %v9380_v10 }
 0x3de   :  { %v6088_v61 = vpop.f32.mrf.mxu1 }
 0x3df   :  { %5380 = vrot.lane.b32.xlu0 %v5311_v23, %s6786_s30  ;;  %5060 = vrot.lane.b32.xlu1 %v4991_v21, %s6784_s28  ;;  %v4993_v23 = vmul.f32 %v9176_v50, %v9356_v12  ;;  %v9390_v37 = vadd.f32 %v6087_v30, %v4030_v41  ;;  %v4674_v50 = vmul.f32 %v9020_v58, %v9380_v10  ;;  %v9416_v30 = vpop.f32.mrf.mxu0 }
 0x3e0   :  { %v6089_v17 = vpop.f32.mrf.mxu1  ;;  %v5314_v58 = vmul.f32 %v5212_v5, %v9380_v10 }
 0x3e1   :  { %v6090_v31 = vadd.f32 %v6089_v17, %v6088_v61  ;;  %v4675_v44 = vmul.f32 %v9038_v14, %v9390_v37 }
 0x3e2   :  { %v6091_v18 = vpop.f32.mrf.mxu1 }
 0x3e3   :  { %5062 = vrot.lane.b32.xlu0 %v4992_v13, %s6784_s28  ;;  %4742 = vrot.lane.b32.xlu1 %v4672_v8, %s6785_s29  ;;  %v5216_v13 = vpop.permute.xlu0 %5215  ;;  %v9420_v61 = vadd.f32 %v6090_v31, %v4035_v53 }
 0x3e4   :  { %v6092_v9 = vpop.f32.mrf.mxu1  ;;  %v5315_v17 = vmul.f32 %v5216_v13, %v9390_v37 }
 0x3e5   :  { %v6093_v14 = vadd.f32 %v6092_v9, %v6091_v18  ;;  %v4996_v9 = vmul.f32 %v9182_v1, %v9420_v61 }
 0x3e6   :  { %v9371_v54 = vpop.f32.mrf.mxu1 }
 0x3e7   :  { %4744 = vrot.lane.b32.xlu0 %v4673_v46, %s6785_s29  ;;  %5382 = vrot.lane.b32.xlu1 %v5312_v4, %s6786_s30  ;;  %v5224_v46 = vpop.permute.xlu0 %5223  ;;  %v5220_v4 = vpop.permute.xlu1 %5219  ;;  %v9434_v18 = vadd.f32 %v6093_v14, %v4038_v47  ;;  %v5987_v14 = vadd.f32 %v9334_v22, %v9322_v49 }
 0x3e8   :  { %v6095_v63 = vpop.f32.mrf.mxu1  ;;  %v5316_v16 = vmul.f32 %v5220_v4, %v9420_v61 }
 0x3e9   :  { %v6096_v1 = vadd.f32 %v6095_v63, %v9371_v54  ;;  %v4997_v63 = vmul.f32 %v9184_v28, %v9434_v18  ;;  %v4046_v47 = vadd.f32 %v5987_v14, %v9247_v33 }
 0x3ea   :  { %v6097_v21 = vpop.f32.mrf.mxu1 }
 0x3eb   :  { %5384 = vrot.lane.b32.xlu0 %v5313_v55, %s6786_s30  ;;  %5064 = vrot.lane.b32.xlu1 %v4993_v23, %s6784_s28  ;;  %v4995_v23 = vmul.f32 %v9180_v35, %v9390_v37  ;;  %v5232_v24 = vpop.permute.xlu0 %5231  ;;  %v5228_v5 = vpop.permute.xlu1 %5227  ;;  %v4676_v35 = vmul.f32 %v9030_v56, %v9420_v61  ;;  %v4677_v56 = vmul.f32 %v9048_v59, %v9434_v18 }
 0x3ec   :  { %v6098_v8 = vpop.f32.mrf.mxu1  ;;  %v5317_v59 = vmul.f32 %v5224_v46, %v9434_v18 }
 0x3ed   :  { %v6099_v54 = vadd.f32 %v6098_v8, %v6097_v21 }
 0x3ee   :  { %v9396_v29 = vpop.f32.mrf.mxu1 }
 0x3ef   :  { %5066 = vrot.lane.b32.xlu0 %v4994_v25, %s6784_s28  ;;  %4746 = vrot.lane.b32.xlu1 %v4674_v50, %s6785_s29  ;;  %v9430_v25 = vpop.f32.mrf.mxu0  ;;  %v9452_v53 = vpop.permute.xlu1 %5235  ;;  %v9483_v21 = vadd.f32 %v6099_v54, %v4046_v47  ;;  %v5996_v47 = vadd.f32 %v9402_v26, %v9388_v60 }
 0x3f0   :  { %v9404_v57 = vpop.f32.mrf.mxu1 }
 0x3f1   :  { %v9446_v31 = vpop.f32.mrf.mxu0  ;;  %v4059_v26 = vadd.f32 %v5996_v47, %v9247_v33 }
 0x3f2   :  { %v9409_v3 = vpop.f32.mrf.mxu1 }
 0x3f3   :  { %4748 = vrot.lane.b32.xlu0 %v4675_v44, %s6785_s29  ;;  %5386 = vrot.lane.b32.xlu1 %v5314_v58, %s6786_s30  ;;  %v9450_v58 = vpop.permute.xlu0 %5239  ;;  %v9477_v49 = vpop.permute.xlu1 %5243 }
 0x3f4   :  { %v9418_v55 = vpop.f32.mrf.mxu1 }
 0x3f6   :  { %v9425_v41 = vpop.f32.mrf.mxu1 }
 0x3f7   :  { %5388 = vrot.lane.b32.xlu0 %v5315_v17, %s6786_s30  ;;  %5068 = vrot.lane.b32.xlu1 %v4995_v23, %s6784_s28  ;;  %v9465_v17 = vpop.f32.mrf.mxu0  ;;  %v9467_v23 = vadd.f32 %v6096_v1, %v4043_v62 }
 0x3f8   :  { %v9432_v50 = vpop.f32.mrf.mxu1 }
 0x3f9   :  { %v9481_v22 = vpop.f32.mrf.mxu0  ;;  %v4998_v8 = vmul.f32 %v9186_v0, %v9467_v23  ;;  %v4678_v28 = vmul.f32 %v9044_v48, %v9467_v23  ;;  %v6102_v0 = vadd.f32 %v9404_v57, %v9396_v29  ;;  %v4679_v48 = vmul.f32 %v9062_v38, %v9483_v21 }
 0x3fa   :  { %v9440_v13 = vpop.f32.mrf.mxu1  ;;  %v6105_v38 = vadd.f32 %v9418_v55, %v9409_v3  ;;  %v5319_v29 = vmul.f32 %v5232_v24, %v9483_v21  ;;  %v4999_v57 = vmul.f32 %v9190_v11, %v9483_v21 }
 0x3fb   :  { %5070 = vrot.lane.b32.xlu0 %v4996_v9, %s6784_s28  ;;  %4750 = vrot.lane.b32.xlu1 %v4676_v35, %s6785_s29  ;;  %v9475_v9 = vpop.permute.xlu0 %5247  ;;  %v5990_v35 = vadd.f32 %v9354_v45, %v9344_v36  ;;  %v9495_v2 = vpop.f32.mrf.mxu0  ;;  %v5993_v45 = vadd.f32 %v9378_v32, %v9366_v51 }
 0x3fc   :  { %v9448_v44 = vpop.f32.mrf.mxu1 }
 0x3fd   :  { %v4051_v36 = vadd.f32 %v5990_v35, %v9247_v33  ;;  %v9513_v14 = vpop.f32.mrf.mxu0  ;;  %v4054_v51 = vadd.f32 %v5993_v45, %v9247_v33 }
 0x3fe   :  { %v9458_v19 = vpop.f32.mrf.mxu1 }
 0x3ff   :  { %4752 = vrot.lane.b32.xlu0 %v4677_v56, %s6785_s29  ;;  %5390 = vrot.lane.b32.xlu1 %v5316_v16, %s6786_s30  ;;  %v9497_v1 = vpop.permute.xlu0 %5255  ;;  %v9499_v56 = vpop.permute.xlu1 %5251  ;;  %v5318_v16 = vmul.f32 %v5228_v5, %v9467_v23  ;;  %v9515_v54 = vadd.f32 %v6102_v0, %v4051_v36  ;;  %v9533_v3 = vadd.f32 %v6105_v38, %v4054_v51 }
 0x400   :  { %v9472_v4 = vpop.f32.mrf.mxu1 }
 0x401   :  { %v5000_v55 = vmul.f32 %v9192_v6, %v9515_v54  ;;  %v4680_v11 = vmul.f32 %v9060_v34, %v9515_v54  ;;  %v6108_v6 = vadd.f32 %v9432_v50, %v9425_v41  ;;  %v10378_v34 = vld [vmem:[#allocation38_spill] sm:$0xff]  ;;  %v6111_v41 = vadd.f32 %v9448_v44, %v9440_v13 }
 0x402   :  { %v9489_v46 = vpop.f32.mrf.mxu1  ;;  %v4681_v0 = vmul.f32 %v10378_v34, %v9533_v3  ;;  %v5321_v50 = vmul.f32 %v9450_v58, %v9533_v3  ;;  %v10380_v44 = vld [vmem:[#allocation58_spill] sm:$0xff] }
 0x403   :  { %5392 = vrot.lane.b32.xlu0 %v5317_v59, %s6786_s30  ;;  %5072 = vrot.lane.b32.xlu1 %v4997_v63, %s6784_s28  ;;  %v9525_v32 = vpop.permute.xlu0 %5263  ;;  %v9527_v59 = vpop.permute.xlu1 %5259  ;;  %v9564_v45 = vadd.f32 %v6108_v6, %v4059_v26  ;;  %v6002_v6 = vadd.f32 %v9465_v17, %v9446_v31  ;;  %v6114_v26 = vadd.f32 %v9472_v4, %v9458_v19 }
 0x404   :  { %v9506_v62 = vpop.f32.mrf.mxu1  ;;  %v9531_v63 = vpop.f32.mrf.mxu0 }
 0x405   :  { %v5002_v58 = vmul.f32 %v10380_v44, %v9564_v45  ;;  %v4067_v17 = vadd.f32 %v6002_v6, %v9247_v33  ;;  %v6117_v4 = vadd.f32 %v9506_v62, %v9489_v46  ;;  %v10387_v6 = vld [vmem:[#allocation37_spill] sm:$0xff] }
 0x406   :  { %v9522_v5 = vpop.f32.mrf.mxu1 }
 0x407   :  { %5074 = vrot.lane.b32.xlu0 %v4998_v8, %s6784_s28  ;;  %4754 = vrot.lane.b32.xlu1 %v4678_v28, %s6785_s29  ;;  %v9545_v8 = vpop.f32.mrf.mxu0  ;;  %v9547_v28 = vpop.permute.xlu0 %5271  ;;  %v9614_v19 = vadd.f32 %v6114_v26, %v4067_v17 }
 0x408   :  { %v9539_v24 = vpop.f32.mrf.mxu1  ;;  %v9549_v35 = vpop.permute.xlu1 %5267 }
 0x409   :  { %v6010_v36 = vpop.f32.mrf.mxu0  ;;  %10383 = vst [vmem:[#allocation38_spill] sm:$0xff] %v9614_v19  ;;  %v4684_v26 = vmul.f32 %v10387_v6, %v9614_v19 }
 0x40a   :  { %v9557_v60 = vpop.f32.mrf.mxu1 }
 0x40b   :  { %4756 = vrot.lane.b32.xlu0 %v4679_v48, %s6785_s29  ;;  %5394 = vrot.lane.b32.xlu1 %v5318_v16, %s6786_s30  ;;  %v5320_v48 = vmul.f32 %v9452_v53, %v9515_v54  ;;  %v5999_v16 = vadd.f32 %v9430_v25, %v9416_v30  ;;  %v10379_v53 = vld [vmem:[#allocation57_spill] sm:$0xff]  ;;  %v9573_v30 = vpop.permute.xlu0 %5279  ;;  %v9579_v51 = vpop.f32.mrf.mxu0 }
 0x40c   :  { %v5001_v38 = vmul.f32 %v10379_v53, %v9533_v3  ;;  %v9575_v25 = vpop.permute.xlu1 %5275  ;;  %v6005_v53 = vadd.f32 %v9495_v2, %v9481_v22 }
 0x40d   :  { %v9593_v34 = vpop.f32.mrf.mxu0 }
 0x40e   :  { %v4070_v22 = vadd.f32 %v6005_v53, %v9247_v33 }
 0x40f   :  { %5396 = vrot.lane.b32.xlu0 %v5319_v29, %s6786_s30  ;;  %5076 = vrot.lane.b32.xlu1 %v4999_v57, %s6784_s28  ;;  %v6122_v29 = vpop.f32.mrf.mxu1  ;;  %v4062_v57 = vadd.f32 %v5999_v16, %v9247_v33  ;;  %v10382_v16 = vld [vmem:[#allocation8_spill] sm:$0xff] }
 0x410   :  { %v9631_v46 = vadd.f32 %v6117_v4, %v4070_v22  ;;  %v6120_v4 = vadd.f32 %v9539_v24, %v9522_v5  ;;  %v6011_v22 = vadd.f32 %v6010_v36, %v9545_v8  ;;  %v10389_v5 = vld [vmem:[#allocation13_spill] sm:$0xff]  ;;  %v6123_v6 = vadd.f32 %v6122_v29, %v9557_v60 }
 0x411   :  { %v9581_v13 = vadd.f32 %v6111_v41, %v4062_v57  ;;  %v9587_v47 = vpop.f32.mrf.mxu1  ;;  %v10384_v57 = vld [vmem:[#allocation59_spill] sm:$0xff]  ;;  %v4474_v24 = vmul.f32 %v10389_v5, %v9256_v15  ;;  %v10390_v8 = vld [vmem:[#allocation61_spill] sm:$0xff]  ;;  %v10391_v5 = vld [vmem:[#allocation62_spill] sm:$0xff] }
 0x412   :  { %10385 = vst [vmem:[#allocation57_spill] sm:$0xff] %v9631_v46  ;;  %v5005_v36 = vmul.f32 %v10390_v8, %v9631_v46  ;;  %v10393_v8 = vld [vmem:[#allocation39_spill] sm:$0xff] }
 0x413   :  { %5078 = vrot.lane.b32.xlu0 %v5000_v55, %s6784_s28  ;;  %4758 = vrot.lane.b32.xlu1 %v4680_v11, %s6785_s29  ;;  %v10381_v55 = vld [vmem:[#allocation28_spill] sm:$0xff]  ;;  %v4683_v41 = vmul.f32 %v10382_v16, %v9581_v13  ;;  %v9605_v31 = vpop.f32.mrf.mxu1  ;;  %v5003_v44 = vmul.f32 %v10384_v57, %v9581_v13 }
 0x414   :  { %v4682_v11 = vmul.f32 %v10381_v55, %v9564_v45 }
 0x417   :  { %4760 = vrot.lane.b32.xlu0 %v4681_v0, %s6785_s29  ;;  %5398 = vrot.lane.b32.xlu1 %v5320_v48, %s6786_s30  ;;  %v9595_v0 = vpop.permute.xlu0 %5287  ;;  %v9597_v48 = vpop.permute.xlu1 %5283 }
 0x41b   :  { %5400 = vrot.lane.b32.xlu0 %v5321_v50, %s6786_s30  ;;  %5080 = vrot.lane.b32.xlu1 %v5001_v38, %s6784_s28  ;;  %v5322_v50 = vmul.f32 %v9477_v49, %v9564_v45  ;;  %v9612_v38 = vpop.f32.mrf.mxu0  ;;  %v5323_v49 = vmul.f32 %v9475_v9, %v9581_v13  ;;  %v9625_v2 = vpop.permute.xlu0 %5295  ;;  %v10386_v9 = vld [vmem:[#allocation60_spill] sm:$0xff] }
 0x41c   :  { %v9627_v55 = vpop.permute.xlu1 %5291  ;;  %v5004_v62 = vmul.f32 %v10386_v9, %v9614_v19 }
 0x41f   :  { %5082 = vrot.lane.b32.xlu0 %v5002_v58, %s6784_s28  ;;  %4762 = vrot.lane.b32.xlu1 %v4682_v11, %s6785_s29  ;;  %v9622_v58 = vpop.f32.mrf.mxu1  ;;  %v6016_v11 = vpop.f32.mrf.mxu0 }
 0x420   :  { %v9643_v17 = vpop.permute.xlu0 %5303  ;;  %v9645_v53 = vpop.permute.xlu1 %5299 }
 0x421   :  { %v6128_v16 = vpop.f32.mrf.mxu1 }
 0x423   :  { %4764 = vrot.lane.b32.xlu0 %v4683_v41, %s6785_s29  ;;  %5402 = vrot.lane.b32.xlu1 %v5322_v50, %s6786_s30  ;;  %v6008_v41 = vadd.f32 %v9531_v63, %v9513_v14  ;;  %v9641_v50 = vpop.f32.mrf.mxu0  ;;  %v9653_v14 = vpop.f32.mrf.mxu1 }
 0x425   :  { %v4075_v63 = vadd.f32 %v6008_v41, %v9247_v33  ;;  %v9659_v9 = vpop.f32.mrf.mxu0  ;;  %v5325_v41 = vmul.f32 %v9497_v1, %v9631_v46  ;;  %v9682_v1 = vld [vmem:[%s10073_s8] ss:$0 sm:$0xff] }
 0x427   :  { %5404 = vrot.lane.b32.xlu0 %v5323_v49, %s6786_s30  ;;  %5084 = vrot.lane.b32.xlu1 %v5003_v44, %s6784_s28  ;;  %v10388_v49 = vld [vmem:[#allocation45_spill] sm:$0xff]  ;;  %v5324_v44 = vmul.f32 %v9499_v56, %v9614_v19  ;;  %v9675_v15 = vpop.f32.mrf.mxu0 }
 0x428   :  { %v4685_v57 = vmul.f32 %v10388_v49, %v9631_v46  ;;  %v9670_v49 = vpop.f32.mrf.mxu1 }
 0x42b   :  { %5086 = vrot.lane.b32.xlu0 %v5004_v62, %s6784_s28  ;;  %4766 = vrot.lane.b32.xlu1 %v4684_v26, %s6785_s29  ;;  %v9663_v62 = vadd.f32 %v6120_v4, %v4075_v63 }
 0x42f   :  { %4768 = vrot.lane.b32.xlu0 %v4685_v57, %s6785_s29  ;;  %5406 = vrot.lane.b32.xlu1 %v5324_v44, %s6786_s30  ;;  %v4078_v44 = vadd.f32 %v6011_v22, %v9247_v33  ;;  %v10392_v22 = vld [vmem:[#allocation30_spill] sm:$0xff] }
 0x431   :  { %v5051_v56 = vpop.permute.xlu0 %5050  ;;  %v4731_v26 = vpop.permute.xlu1 %4730  ;;  %v9677_v29 = vadd.f32 %v6123_v6, %v4078_v44 }
 0x432   :  { %v4826_v57 = vadd.f32 %v4731_v26, %v4474_v24  ;;  %v5006_v24 = vmul.f32 %v10391_v5, %v9663_v62  ;;  %v4686_v26 = vmul.f32 %v10392_v22, %v9663_v62  ;;  %v6126_v22 = vadd.f32 %v9605_v31, %v9587_v47 }
 0x433   :  { %5408 = vrot.lane.b32.xlu0 %v5325_v41, %s6786_s30  ;;  %5088 = vrot.lane.b32.xlu1 %v5005_v36, %s6784_s28  ;;  %v9688_v41 = vpop.f32.mrf.mxu1  ;;  %v6014_v36 = vadd.f32 %v9593_v34, %v9579_v51  ;;  %v5326_v51 = vmul.f32 %v9527_v59, %v9663_v62  ;;  %v10395_v59 = vld [vmem:[#allocation24_spill] sm:$0xff] }
 0x434   :  { %v5146_v60 = vadd.f32 %v5051_v56, %v4826_v57  ;;  %v4475_v56 = vmul.f32 %v10393_v8, %v9267_v7  ;;  %v6022_v57 = vpop.f32.mrf.mxu0  ;;  %v10394_v7 = vld [vmem:[#allocation47_spill] sm:$0xff] }
 0x435   :  { %v4733_v4 = vpop.permute.xlu0 %4732  ;;  %v5371_v63 = vpop.permute.xlu1 %5370 }
 0x436   :  { %v5466_v6 = vadd.f32 %v5371_v63, %v5146_v60  ;;  %v4827_v44 = vadd.f32 %v4733_v4, %v4475_v56  ;;  %v4687_v60 = vmul.f32 %v10394_v7, %v9677_v29  ;;  %v6134_v34 = vpop.f32.mrf.mxu1  ;;  %v4083_v63 = vadd.f32 %v6014_v36, %v9247_v33  ;;  %v9711_v47 = vpop.f32.mrf.mxu0 }
 0x437   :  { %5090 = vrot.lane.b32.xlu0 %v5006_v24, %s6784_s28  ;;  %4770 = vrot.lane.b32.xlu1 %v4686_v26, %s6785_s29  ;;  %v6017_v24 = vadd.f32 %v6016_v11, %v9612_v38  ;;  %v4476_v26 = vmul.f32 %v10395_v59, %v9282_v27  ;;  %v6129_v56 = vadd.f32 %v6128_v16, %v9622_v58  ;;  %v10396_v38 = vld [vmem:[#allocation63_spill] sm:$0xff] }
 0x438   :  { %v5505_v5 = vadd.f32 %v9682_v1, %v5466_v6  ;;  %v9715_v8 = vadd.f32 %v6126_v22, %v4083_v63  ;;  %v5327_v36 = vmul.f32 %v9525_v32, %v9677_v29  ;;  %v5007_v11 = vmul.f32 %v10396_v38, %v9677_v29  ;;  %v6025_v27 = vpop.f32.mrf.mxu0 }
 0x439   :  { %v5373_v46 = vpop.permute.xlu0 %5372  ;;  %v5053_v19 = vpop.permute.xlu1 %5052  ;;  %v4086_v7 = vadd.f32 %v6017_v24, %v9247_v33  ;;  %v6132_v38 = vadd.f32 %v9670_v49, %v9653_v14 }
 0x43a   :  { %5538 = vst.msk [vmem:[%s10074_s9] sm:$0xff] %vm5537_vm0, %v5505_v5  ;;  %v5147_v4 = vadd.f32 %v5053_v19, %v4827_v44  ;;  %v9722_v44 = vpop.f32.mrf.mxu1 }
 0x43b   :  { %4772 = vrot.lane.b32.xlu0 %v4687_v60, %s6785_s29  ;;  %5410 = vrot.lane.b32.xlu1 %v5326_v51, %s6786_s30  ;;  %v9732_v58 = vadd.f32 %v6129_v56, %v4086_v7  ;;  %v10397_v60 = vld [vmem:[#allocation64_spill] sm:$0xff]  ;;  %v6027_v56 = vpop.f32.mrf.mxu0  ;;  %v5328_v7 = vmul.f32 %v9549_v35, %v9715_v8 }
 0x43c   :  { %v5467_v31 = vadd.f32 %v5373_v46, %v5147_v4  ;;  %v5008_v51 = vmul.f32 %v10397_v60, %v9715_v8  ;;  %v10398_v4 = vld [vmem:[#allocation46_spill] sm:$0xff]  ;;  %v6137_v24 = vpop.f32.mrf.mxu1 }
 0x43d   :  { %v5055_v6 = vpop.permute.xlu0 %5054  ;;  %v4735_v19 = vpop.permute.xlu1 %4734  ;;  %v4688_v63 = vmul.f32 %v10398_v4, %v9715_v8 }
 0x43e   :  { %v5506_v5 = vadd.f32 %v9682_v1, %v5467_v31  ;;  %v4828_v46 = vadd.f32 %v4735_v19, %v4476_v26  ;;  %v10399_v31 = vld [vmem:[#allocation33_spill] sm:$0xff]  ;;  %v6020_v19 = vadd.f32 %v9659_v9, %v9641_v50  ;;  %v6139_v50 = vpop.f32.mrf.mxu1  ;;  %v6028_v14 = vpop.f32.mrf.mxu0 }
 0x43f   :  { %5412 = vrot.lane.b32.xlu0 %v5327_v36, %s6786_s30  ;;  %5092 = vrot.lane.b32.xlu1 %v5007_v11, %s6784_s28  ;;  %v4477_v59 = vmul.f32 %v10399_v31, %v9292_v40  ;;  %v5329_v31 = vmul.f32 %v9547_v28, %v9732_v58 }
 0x440   :  { %5539 = vst.msk [vmem:[%s10074_s9 + $0x8] sm:$0xff] %vm5537_vm0, %v5506_v5  ;;  %v5148_v32 = vadd.f32 %v5055_v6, %v4828_v46  ;;  %v10400_v46 = vld [vmem:[#allocation49_spill] sm:$0xff] }
 0x441   :  { %v4737_v16 = vpop.permute.xlu0 %4736  ;;  %v5375_v22 = vpop.permute.xlu1 %5374  ;;  %v4689_v40 = vmul.f32 %v10400_v46, %v9732_v58 }
 0x442   :  { %v5468_v26 = vadd.f32 %v5375_v22, %v5148_v32  ;;  %v4829_v6 = vadd.f32 %v4737_v16, %v4477_v59  ;;  %v4091_v32 = vadd.f32 %v6020_v19, %v9247_v33  ;;  %v6023_v16 = vadd.f32 %v6022_v57, %v9675_v15  ;;  %v10401_v22 = vld [vmem:[#allocation15_spill] sm:$0xff]  ;;  %v10402_v15 = vld [vmem:[#allocation65_spill] sm:$0xff]  ;;  %v6140_v59 = vpop.f32.mrf.mxu1 }
 0x443   :  { %5094 = vrot.lane.b32.xlu0 %v5008_v51, %s6784_s28  ;;  %4774 = vrot.lane.b32.xlu1 %v4688_v63, %s6785_s29  ;;  %v4478_v35 = vmul.f32 %v10401_v22, %v9314_v43  ;;  %v6135_v51 = vadd.f32 %v6134_v34, %v9688_v41  ;;  %v5009_v57 = vmul.f32 %v10402_v15, %v9732_v58  ;;  %v6030_v43 = vpop.f32.mrf.mxu0 }
 0x444   :  { %v5507_v36 = vadd.f32 %v9682_v1, %v5468_v26  ;;  %v9761_v60 = vadd.f32 %v6132_v38, %v4091_v32  ;;  %v10403_v38 = vld [vmem:[#allocation66_spill] sm:$0xff] }
 0x445   :  { %v5377_v11 = vpop.permute.xlu0 %5376  ;;  %v5057_v5 = vpop.permute.xlu1 %5056 }
 0x446   :  { %5540 = vst.msk [vmem:[%s10074_s9 + $0x10] sm:$0xff] %vm5537_vm0, %v5507_v36  ;;  %v5149_v9 = vadd.f32 %v5057_v5, %v4829_v6  ;;  %v4094_v6 = vadd.f32 %v6023_v16, %v9247_v33  ;;  %v10404_v5 = vld [vmem:[#allocation48_spill] sm:$0xff]  ;;  %v6026_v16 = vadd.f32 %v6025_v27, %v9711_v47 }
 0x447   :  { %4776 = vrot.lane.b32.xlu0 %v4689_v40, %s6785_s29  ;;  %5414 = vrot.lane.b32.xlu1 %v5328_v7, %s6786_s30  ;;  %v4690_v46 = vmul.f32 %v10404_v5, %v9761_v60  ;;  %v6142_v40 = vpop.f32.mrf.mxu1  ;;  %v10405_v7 = vld [vmem:[#allocation32_spill] sm:$0xff] }
 0x448   :  { %v5469_v49 = vadd.f32 %v5377_v11, %v5149_v9  ;;  %v9776_v41 = vadd.f32 %v6135_v51, %v4094_v6  ;;  %v5010_v11 = vmul.f32 %v10403_v38, %v9761_v60  ;;  %v4479_v9 = vmul.f32 %v10405_v7, %v9324_v42 }
 0x449   :  { %v5059_v4 = vpop.permute.xlu0 %5058  ;;  %v4739_v63 = vpop.permute.xlu1 %4738  ;;  %v6138_v51 = vadd.f32 %v6137_v24, %v9722_v44  ;;  %v5330_v42 = vmul.f32 %v9575_v25, %v9761_v60  ;;  %v4099_v27 = vadd.f32 %v6026_v16, %v9247_v33 }
 0x44a   :  { %v5508_v26 = vadd.f32 %v9682_v1, %v5469_v49  ;;  %v4830_v19 = vadd.f32 %v4739_v63, %v4478_v35  ;;  %v6031_v49 = vpop.f32.mrf.mxu0  ;;  %v5331_v38 = vmul.f32 %v9573_v30, %v9776_v41 }
 0x44b   :  { %5416 = vrot.lane.b32.xlu0 %v5329_v31, %s6786_s30  ;;  %5096 = vrot.lane.b32.xlu1 %v5009_v57, %s6784_s28  ;;  %v10406_v31 = vld [vmem:[#allocation51_spill] sm:$0xff]  ;;  %v6143_v57 = vpop.f32.mrf.mxu1  ;;  %v9802_v25 = vadd.f32 %v6138_v51, %v4099_v27 }
 0x44c   :  { %5541 = vst.msk [vmem:[%s10074_s9 + $0x18] sm:$0xff] %vm5537_vm0, %v5508_v26  ;;  %v5150_v28 = vadd.f32 %v5059_v4, %v4830_v19  ;;  %v4691_v15 = vmul.f32 %v10406_v31, %v9776_v41  ;;  %v6029_v26 = vadd.f32 %v6028_v14, %v6027_v56  ;;  %v6033_v44 = vpop.f32.mrf.mxu0  ;;  %v10407_v19 = vld [vmem:[#allocation18_spill] sm:$0xff] }
 0x44d   :  { %v4741_v34 = vpop.permute.xlu0 %4740  ;;  %v5379_v36 = vpop.permute.xlu1 %5378  ;;  %v4480_v6 = vmul.f32 %v10407_v19, %v9346_v39 }
 0x44e   :  { %v5470_v32 = vadd.f32 %v5379_v36, %v5150_v28  ;;  %v4831_v22 = vadd.f32 %v4741_v34, %v4479_v9  ;;  %v6141_v28 = vadd.f32 %v6140_v59, %v6139_v50  ;;  %v6145_v14 = vpop.f32.mrf.mxu1  ;;  %v4102_v7 = vadd.f32 %v6029_v26, %v9247_v33  ;;  %v6034_v39 = vpop.f32.mrf.mxu0 }
 0x44f   :  { %5098 = vrot.lane.b32.xlu0 %v5010_v11, %s6784_s28  ;;  %4778 = vrot.lane.b32.xlu1 %v4690_v46, %s6785_s29  ;;  %v10408_v11 = vld [vmem:[#allocation67_spill] sm:$0xff]  ;;  %v6144_v26 = vadd.f32 %v6143_v57, %v6142_v40 }
 0x450   :  { %v5509_v35 = vadd.f32 %v9682_v1, %v5470_v32  ;;  %v5011_v56 = vmul.f32 %v10408_v11, %v9776_v41  ;;  %v9816_v50 = vadd.f32 %v6141_v28, %v4102_v7  ;;  %v10409_v32 = vld [vmem:[#allocation68_spill] sm:$0xff]  ;;  %v6146_v51 = vpop.f32.mrf.mxu1 }
 0x451   :  { %v5381_v4 = vpop.permute.xlu0 %5380  ;;  %v5061_v63 = vpop.permute.xlu1 %5060  ;;  %v5012_v16 = vmul.f32 %v10409_v32, %v9802_v25 }
 0x452   :  { %5542 = vst.msk [vmem:[%s10074_s9 + $0x20] sm:$0xff] %vm5537_vm0, %v5509_v35  ;;  %v5151_v47 = vadd.f32 %v5061_v63, %v4831_v22  ;;  %v10410_v22 = vld [vmem:[#allocation50_spill] sm:$0xff]  ;;  %v5333_v7 = vmul.f32 %v9595_v0, %v9816_v50 }
 0x453   :  { %4780 = vrot.lane.b32.xlu0 %v4691_v15, %s6785_s29  ;;  %5418 = vrot.lane.b32.xlu1 %v5330_v42, %s6786_s30  ;;  %v4692_v35 = vmul.f32 %v10410_v22, %v9802_v25  ;;  %v6032_v15 = vadd.f32 %v6031_v49, %v6030_v43  ;;  %v6036_v42 = vpop.f32.mrf.mxu0 }
 0x454   :  { %v5471_v24 = vadd.f32 %v5381_v4, %v5151_v47  ;;  %v10411_v4 = vld [vmem:[#allocation40_spill] sm:$0xff] }
 0x455   :  { %v5063_v34 = vpop.permute.xlu0 %5062  ;;  %v4743_v36 = vpop.permute.xlu1 %4742  ;;  %v4481_v63 = vmul.f32 %v10411_v4, %v9356_v12  ;;  %v4107_v49 = vadd.f32 %v6032_v15, %v9247_v33 }
 0x456   :  { %v5510_v5 = vadd.f32 %v9682_v1, %v5471_v24  ;;  %v4832_v46 = vadd.f32 %v4743_v36, %v4480_v6  ;;  %v10412_v6 = vld [vmem:[#allocation53_spill] sm:$0xff]  ;;  %v6148_v12 = vpop.f32.mrf.mxu1  ;;  %v6035_v36 = vadd.f32 %v6034_v39, %v6033_v44  ;;  %v6037_v40 = vpop.f32.mrf.mxu0 }
 0x457   :  { %5420 = vrot.lane.b32.xlu0 %v5331_v38, %s6786_s30  ;;  %5100 = vrot.lane.b32.xlu1 %v5011_v56, %s6784_s28  ;;  %v4693_v28 = vmul.f32 %v10412_v6, %v9816_v50  ;;  %v10413_v38 = vld [vmem:[#allocation20_spill] sm:$0xff]  ;;  %v6147_v56 = vadd.f32 %v6146_v51, %v6145_v14 }
 0x458   :  { %5543 = vst.msk [vmem:[%s10074_s9 + $0x28] sm:$0xff] %vm5537_vm0, %v5510_v5  ;;  %v5152_v30 = vadd.f32 %v5063_v34, %v4832_v46  ;;  %v5332_v34 = vmul.f32 %v9597_v48, %v9802_v25  ;;  %v4482_v11 = vmul.f32 %v10413_v38, %v9380_v10  ;;  %v9840_v48 = vadd.f32 %v6144_v26, %v4107_v49  ;;  %v6149_v39 = vpop.f32.mrf.mxu1  ;;  %v6039_v10 = vpop.f32.mrf.mxu0 }
 0x459   :  { %v4745_v59 = vpop.permute.xlu0 %4744  ;;  %v5383_v9 = vpop.permute.xlu1 %5382  ;;  %v4110_v32 = vadd.f32 %v6035_v36, %v9247_v33  ;;  %v10416_v33 = vld [vmem:[#allocation52_spill] sm:$0xff]  ;;  %v6150_v6 = vadd.f32 %v6149_v39, %v6148_v12 }
 0x45a   :  { %v5472_v31 = vadd.f32 %v5383_v9, %v5152_v30  ;;  %v4833_v47 = vadd.f32 %v4745_v59, %v4481_v63  ;;  %v10414_v30 = vld [vmem:[#allocation69_spill] sm:$0xff]  ;;  %v4694_v4 = vmul.f32 %v10416_v33, %v9840_v48  ;;  %v6151_v63 = vpop.f32.mrf.mxu1  ;;  %v6040_v26 = vpop.f32.mrf.mxu0  ;;  %v5334_v36 = vmul.f32 %v9627_v55, %v9840_v48  ;;  %v10419_v55 = vld [vmem:[#allocation23_spill] sm:$0xff] }
 0x45b   :  { %5102 = vrot.lane.b32.xlu0 %v5012_v16, %s6784_s28  ;;  %4782 = vrot.lane.b32.xlu1 %v4692_v35, %s6785_s29  ;;  %v5013_v44 = vmul.f32 %v10414_v30, %v9816_v50  ;;  %v9854_v14 = vadd.f32 %v6147_v56, %v4110_v32  ;;  %v10415_v35 = vld [vmem:[#allocation70_spill] sm:$0xff] }
 0x45c   :  { %v5511_v27 = vadd.f32 %v9682_v1, %v5472_v31  ;;  %v5014_v51 = vmul.f32 %v10415_v35, %v9840_v48  ;;  %v10417_v31 = vld [vmem:[#allocation16_spill] sm:$0xff] }
 0x45d   :  { %v5385_v24 = vpop.permute.xlu0 %5384  ;;  %v5065_v19 = vpop.permute.xlu1 %5064  ;;  %v4483_v15 = vmul.f32 %v10417_v31, %v9390_v37  ;;  %v5335_v30 = vmul.f32 %v9625_v2, %v9854_v14 }
 0x45e   :  { %5544 = vst.msk [vmem:[%s10074_s9 + $0x30] sm:$0xff] %vm5537_vm0, %v5511_v27  ;;  %v5153_v43 = vadd.f32 %v5065_v19, %v4833_v47  ;;  %v6038_v27 = vadd.f32 %v6037_v40, %v6036_v42  ;;  %v6152_v37 = vpop.f32.mrf.mxu1  ;;  %v6731_v40 = vld [vmem:[%s10072_s7] ss:$0 sm:$0xff] }
 0x45f   :  { %4784 = vrot.lane.b32.xlu0 %v4693_v28, %s6785_s29  ;;  %5422 = vrot.lane.b32.xlu1 %v5332_v34, %s6786_s30 }
 0x460   :  { %v5473_v57 = vadd.f32 %v5385_v24, %v5153_v43  ;;  %v10418_v43 = vld [vmem:[#allocation55_spill] sm:$0xff]  ;;  %v4115_v12 = vadd.f32 %v6731_v40, %v6038_v27  ;;  %v10423_v27 = vld [vmem:[#allocation56_spill] sm:$0xff] }
 0x461   :  { %v5067_v5 = vpop.permute.xlu0 %5066  ;;  %v4747_v46 = vpop.permute.xlu1 %4746  ;;  %v4695_v49 = vmul.f32 %v10418_v43, %v9854_v14 }
 0x462   :  { %v5512_v59 = vadd.f32 %v9682_v1, %v5473_v57  ;;  %v4834_v9 = vadd.f32 %v4747_v46, %v4482_v11  ;;  %v6041_v57 = vadd.f32 %v6040_v26, %v6039_v10  ;;  %v4484_v11 = vmul.f32 %v10419_v55, %v9420_v61 }
 0x463   :  { %5424 = vrot.lane.b32.xlu0 %v5333_v7, %s6786_s30  ;;  %5104 = vrot.lane.b32.xlu1 %v5013_v44, %s6784_s28  ;;  %v9880_v56 = vadd.f32 %v6150_v6, %v4115_v12  ;;  %v10420_v44 = vld [vmem:[#allocation71_spill] sm:$0xff] }
 0x464   :  { %5545 = vst.msk [vmem:[%s10074_s9 + $0x38] sm:$0xff] %vm5537_vm0, %v5512_v59  ;;  %v5154_v0 = vadd.f32 %v5067_v5, %v4834_v9  ;;  %v6153_v5 = vadd.f32 %v6152_v37, %v6151_v63  ;;  %v5015_v39 = vmul.f32 %v10420_v44, %v9854_v14  ;;  %v4118_v32 = vadd.f32 %v6731_v40, %v6041_v57 }
 0x465   :  { %v4749_v16 = vpop.permute.xlu0 %4748  ;;  %v5387_v22 = vpop.permute.xlu1 %5386 }
 0x466   :  { %v5474_v47 = vadd.f32 %v5387_v22, %v5154_v0  ;;  %v4835_v24 = vadd.f32 %v4749_v16, %v4483_v15  ;;  %v9893_v10 = vadd.f32 %v6153_v5, %v4118_v32  ;;  %v5016_v16 = vmul.f32 %v9254_v20, %v9880_v56  ;;  %v10421_v22 = vld [vmem:[#allocation54_spill] sm:$0xff] }
 0x467   :  { %5106 = vrot.lane.b32.xlu0 %v5014_v51, %s6784_s28  ;;  %4786 = vrot.lane.b32.xlu1 %v4694_v4, %s6785_s29  ;;  %v4696_v35 = vmul.f32 %v10421_v22, %v9880_v56  ;;  %v10422_v51 = vld [vmem:[#allocation19_spill] sm:$0xff] }
 0x468   :  { %v5513_v19 = vadd.f32 %v9682_v1, %v5474_v47  ;;  %v4485_v33 = vmul.f32 %v10422_v51, %v9434_v18  ;;  %v4697_v26 = vmul.f32 %v10423_v27, %v9893_v10  ;;  %v5017_v20 = vmul.f32 %v9265_v52, %v9893_v10 }
 0x469   :  { %v5389_v28 = vpop.permute.xlu0 %5388  ;;  %v5069_v34 = vpop.permute.xlu1 %5068  ;;  %v5337_v43 = vmul.f32 %v9643_v17, %v9893_v10  ;;  %v5336_v52 = vmul.f32 %v9645_v53, %v9880_v56  ;;  %v10425_v17 = vld [vmem:[#allocation21_spill] sm:$0xff] }
 0x46a   :  { %5546 = vst.msk [vmem:[%s10074_s9 + $0x40] sm:$0xff] %vm5537_vm0, %v5513_v19  ;;  %v5155_v42 = vadd.f32 %v5069_v34, %v4835_v24  ;;  %v10424_v19 = vld [vmem:[#allocation25_spill] sm:$0xff]  ;;  %v4487_v40 = vmul.f32 %v10425_v17, %v9483_v21 }
 0x46b   :  { %4788 = vrot.lane.b32.xlu0 %v4695_v49, %s6785_s29  ;;  %5426 = vrot.lane.b32.xlu1 %v5334_v36, %s6786_s30  ;;  %v4486_v6 = vmul.f32 %v10424_v19, %v9467_v23 }
 0x46c   :  { %v5475_v38 = vadd.f32 %v5389_v28, %v5155_v42 }
 0x46d   :  { %v5071_v46 = vpop.permute.xlu0 %5070  ;;  %v4751_v7 = vpop.permute.xlu1 %4750 }
 0x46e   :  { %v5514_v59 = vadd.f32 %v9682_v1, %v5475_v38  ;;  %v4836_v9 = vadd.f32 %v4751_v7, %v4484_v11 }
 0x46f   :  { %5428 = vrot.lane.b32.xlu0 %v5335_v30, %s6786_s30  ;;  %5108 = vrot.lane.b32.xlu1 %v5015_v39, %s6784_s28 }
 0x470   :  { %5547 = vst.msk [vmem:[%s10074_s9 + $0x48] sm:$0xff] %vm5537_vm0, %v5514_v59  ;;  %v5156_v61 = vadd.f32 %v5071_v46, %v4836_v9  ;;  %v10426_v46 = vld [vmem:[#allocation12_spill] sm:$0xff] }
 0x471   :  { %v4753_v2 = vpop.permute.xlu0 %4752  ;;  %v5391_v0 = vpop.permute.xlu1 %5390  ;;  %v4488_v7 = vmul.f32 %v10426_v46, %v9515_v54 }
 0x472   :  { %v5476_v4 = vadd.f32 %v5391_v0, %v5156_v61  ;;  %v4837_v63 = vadd.f32 %v4753_v2, %v4485_v33  ;;  %v10427_v61 = vld [vmem:[#allocation42_spill] sm:$0xff] }
 0x473   :  { %5110 = vrot.lane.b32.xlu0 %v5016_v16, %s6784_s28  ;;  %4790 = vrot.lane.b32.xlu1 %v4696_v35, %s6785_s29  ;;  %v4489_v2 = vmul.f32 %v10427_v61, %v9533_v3 }
 0x474   :  { %v5515_v31 = vadd.f32 %v9682_v1, %v5476_v4  ;;  %v10428_v4 = vld [vmem:[#allocation11_spill] sm:$0xff] }
 0x475   :  { %v5393_v15 = vpop.permute.xlu0 %5392  ;;  %v5073_v47 = vpop.permute.xlu1 %5072 }
 0x476   :  { %5548 = vst.msk [vmem:[%s10074_s9 + $0x50] sm:$0xff] %vm5537_vm0, %v5515_v31  ;;  %v5157_v18 = vadd.f32 %v5073_v47, %v4837_v63  ;;  %v4490_v63 = vmul.f32 %v10428_v4, %v9564_v45 }
 0x477   :  { %4792 = vrot.lane.b32.xlu0 %v4697_v26, %s6785_s29  ;;  %5112 = vrot.lane.b32.xlu1 %v5017_v20, %s6784_s28 }
 0x478   :  { %v5477_v24 = vadd.f32 %v5393_v15, %v5157_v18  ;;  %v10429_v18 = vld [vmem:[#allocation44_spill] sm:$0xff] }
 0x479   :  { %v5075_v28 = vpop.permute.xlu0 %5074  ;;  %v4755_v34 = vpop.permute.xlu1 %4754 }
 0x47a   :  { %v5516_v49 = vadd.f32 %v9682_v1, %v5477_v24  ;;  %v4838_v36 = vadd.f32 %v4755_v34, %v4486_v6  ;;  %v4491_v24 = vmul.f32 %v10429_v18, %v9581_v13 }
 0x47b   :  { %5432 = vrot.lane.b32.xlu0 %v5337_v43, %s6786_s30  ;;  %5430 = vrot.lane.b32.xlu1 %v5336_v52, %s6786_s30 }
 0x47c   :  { %5549 = vst.msk [vmem:[%s10074_s9 + $0x58] sm:$0xff] %vm5537_vm0, %v5516_v49  ;;  %v5158_v23 = vadd.f32 %v5075_v28, %v4838_v36  ;;  %v10430_v49 = vld [vmem:[#allocation38_spill] sm:$0xff]  ;;  %v10431_v36 = vld [vmem:[#allocation29_spill] sm:$0xff] }
 0x47d   :  { %v4757_v37 = vpop.permute.xlu0 %4756  ;;  %v5395_v42 = vpop.permute.xlu1 %5394 }
 0x47e   :  { %v5478_v12 = vadd.f32 %v5395_v42, %v5158_v23  ;;  %v4839_v53 = vadd.f32 %v4757_v37, %v4487_v40  ;;  %v4492_v23 = vmul.f32 %v10431_v36, %v10430_v49 }
 0x480   :  { %v5517_v57 = vadd.f32 %v9682_v1, %v5478_v12 }
 0x481   :  { %v5397_v38 = vpop.permute.xlu0 %5396  ;;  %v5077_v55 = vpop.permute.xlu1 %5076 }
 0x482   :  { %5550 = vst.msk [vmem:[%s10074_s9 + $0x60] sm:$0xff] %vm5537_vm0, %v5517_v57  ;;  %v5159_v11 = vadd.f32 %v5077_v55, %v4839_v53  ;;  %v10432_v57 = vld [vmem:[#allocation57_spill] sm:$0xff] }
 0x484   :  { %v5479_v5 = vadd.f32 %v5397_v38, %v5159_v11  ;;  %v10433_v38 = vld [vmem:[#allocation27_spill] sm:$0xff] }
 0x485   :  { %v5079_v30 = vpop.permute.xlu0 %5078  ;;  %v4759_v44 = vpop.permute.xlu1 %4758  ;;  %v4493_v55 = vmul.f32 %v10433_v38, %v10432_v57  ;;  %v10439_v57 = vld [vmem:[#allocation35_spill] sm:$0xff] }
 0x486   :  { %v5518_v21 = vadd.f32 %v9682_v1, %v5479_v5  ;;  %v4840_v39 = vadd.f32 %v4759_v44, %v4488_v7  ;;  %v4499_v38 = vmul.f32 %v10439_v57, %v9776_v41 }
 0x488   :  { %5551 = vst.msk [vmem:[%s10074_s9 + $0x68] sm:$0xff] %vm5537_vm0, %v5518_v21  ;;  %v5160_v59 = vadd.f32 %v5079_v30, %v4840_v39  ;;  %v10434_v39 = vld [vmem:[#allocation9_spill] sm:$0xff] }
 0x489   :  { %v4761_v9 = vpop.permute.xlu0 %4760  ;;  %v5399_v32 = vpop.permute.xlu1 %5398 }
 0x48a   :  { %v5480_v0 = vadd.f32 %v5399_v32, %v5160_v59  ;;  %v4841_v16 = vadd.f32 %v4761_v9, %v4489_v2  ;;  %v4494_v59 = vmul.f32 %v10434_v39, %v9663_v62 }
 0x48c   :  { %v5519_v54 = vadd.f32 %v9682_v1, %v5480_v0 }
 0x48d   :  { %v5401_v22 = vpop.permute.xlu0 %5400  ;;  %v5081_v35 = vpop.permute.xlu1 %5080 }
 0x48e   :  { %5552 = vst.msk [vmem:[%s10074_s9 + $0x70] sm:$0xff] %vm5537_vm0, %v5519_v54  ;;  %v5161_v51 = vadd.f32 %v5081_v35, %v4841_v16 }
 0x490   :  { %v5481_v33 = vadd.f32 %v5401_v22, %v5161_v51  ;;  %v10435_v22 = vld [vmem:[#allocation34_spill] sm:$0xff] }
 0x491   :  { %v5083_v31 = vpop.permute.xlu0 %5082  ;;  %v4763_v15 = vpop.permute.xlu1 %4762  ;;  %v4495_v35 = vmul.f32 %v10435_v22, %v9677_v29 }
 0x492   :  { %v5520_v3 = vadd.f32 %v9682_v1, %v5481_v33  ;;  %v4842_v47 = vadd.f32 %v4763_v15, %v4490_v63 }
 0x494   :  { %5553 = vst.msk [vmem:[%s10074_s9 + $0x78] sm:$0xff] %vm5537_vm0, %v5520_v3  ;;  %v5162_v27 = vadd.f32 %v5083_v31, %v4842_v47  ;;  %v10436_v3 = vld [vmem:[#allocation31_spill] sm:$0xff] }
 0x495   :  { %v4765_v26 = vpop.permute.xlu0 %4764  ;;  %v5403_v20 = vpop.permute.xlu1 %5402  ;;  %v4496_v47 = vmul.f32 %v10436_v3, %v9715_v8 }
 0x496   :  { %v5482_v19 = vadd.f32 %v5403_v20, %v5162_v27  ;;  %v4843_v6 = vadd.f32 %v4765_v26, %v4491_v24 }
 0x498   :  { %v5521_v45 = vadd.f32 %v9682_v1, %v5482_v19 }
 0x499   :  { %v5405_v28 = vpop.permute.xlu0 %5404  ;;  %v5085_v34 = vpop.permute.xlu1 %5084 }
 0x49a   :  { %5554 = vst.msk [vmem:[%s10074_s9 + $0x80] sm:$0xff] %vm5537_vm0, %v5521_v45  ;;  %v5163_v43 = vadd.f32 %v5085_v34, %v4843_v6  ;;  %v10437_v6 = vld [vmem:[#allocation14_spill] sm:$0xff] }
 0x49b   :  { %v4497_v45 = vmul.f32 %v10437_v6, %v9732_v58 }
 0x49c   :  { %v5483_v52 = vadd.f32 %v5405_v28, %v5163_v43 }
 0x49d   :  { %v5087_v37 = vpop.permute.xlu0 %5086  ;;  %v4767_v42 = vpop.permute.xlu1 %4766 }
 0x49e   :  { %v5522_v13 = vadd.f32 %v9682_v1, %v5483_v52  ;;  %v4844_v17 = vadd.f32 %v4767_v42, %v4492_v23  ;;  %v10438_v23 = vld [vmem:[#allocation41_spill] sm:$0xff] }
 0x4a0   :  { %5555 = vst.msk [vmem:[%s10074_s9 + $0x88] sm:$0xff] %vm5537_vm0, %v5522_v13  ;;  %v5164_v40 = vadd.f32 %v5087_v37, %v4844_v17  ;;  %v4498_v37 = vmul.f32 %v10438_v23, %v9761_v60 }
 0x4a1   :  { %v4769_v12 = vpop.permute.xlu0 %4768  ;;  %v5407_v53 = vpop.permute.xlu1 %5406 }
 0x4a2   :  { %v5484_v11 = vadd.f32 %v5407_v53, %v5164_v40  ;;  %v4845_v5 = vadd.f32 %v4769_v12, %v4493_v55 }
 0x4a4   :  { %v5523_v46 = vadd.f32 %v9682_v1, %v5484_v11 }
 0x4a5   :  { %v5409_v7 = vpop.permute.xlu0 %5408  ;;  %v5089_v30 = vpop.permute.xlu1 %5088 }
 0x4a6   :  { %5556 = vst.msk [vmem:[%s10074_s9 + $0x90] sm:$0xff] %vm5537_vm0, %v5523_v46  ;;  %v5165_v44 = vadd.f32 %v5089_v30, %v4845_v5 }
 0x4a8   :  { %v5485_v21 = vadd.f32 %v5409_v7, %v5165_v44  ;;  %v10440_v44 = vld [vmem:[#allocation36_spill] sm:$0xff] }
 0x4a9   :  { %v5091_v9 = vpop.permute.xlu0 %5090  ;;  %v4771_v32 = vpop.permute.xlu1 %4770 }
 0x4aa   :  { %v5524_v61 = vadd.f32 %v9682_v1, %v5485_v21  ;;  %v4846_v2 = vadd.f32 %v4771_v32, %v4494_v59  ;;  %v4500_v21 = vmul.f32 %v10440_v44, %v9802_v25 }
 0x4ac   :  { %5557 = vst.msk [vmem:[%s10074_s9 + $0x98] sm:$0xff] %vm5537_vm0, %v5524_v61  ;;  %v5166_v0 = vadd.f32 %v5091_v9, %v4846_v2 }
 0x4ad   :  { %v4773_v16 = vpop.permute.xlu0 %4772  ;;  %v5411_v54 = vpop.permute.xlu1 %5410 }
 0x4ae   :  { %v5486_v51 = vadd.f32 %v5411_v54, %v5166_v0  ;;  %v4847_v33 = vadd.f32 %v4773_v16, %v4495_v35  ;;  %v10441_v0 = vld [vmem:[#allocation26_spill] sm:$0xff] }
 0x4af   :  { %v4501_v16 = vmul.f32 %v10441_v0, %v9816_v50 }
 0x4b0   :  { %v5525_v62 = vadd.f32 %v9682_v1, %v5486_v51 }
 0x4b1   :  { %v5413_v4 = vpop.permute.xlu0 %5412  ;;  %v5093_v63 = vpop.permute.xlu1 %5092 }
 0x4b2   :  { %5558 = vst.msk [vmem:[%s10074_s9 + $0xa0] sm:$0xff] %vm5537_vm0, %v5525_v62  ;;  %v5167_v31 = vadd.f32 %v5093_v63, %v4847_v33 }
 0x4b4   :  { %v5487_v15 = vadd.f32 %v5413_v4, %v5167_v31  ;;  %v10442_v4 = vld [vmem:[#allocation22_spill] sm:$0xff] }
 0x4b5   :  { %v5095_v27 = vpop.permute.xlu0 %5094  ;;  %v4775_v26 = vpop.permute.xlu1 %4774  ;;  %v4502_v63 = vmul.f32 %v10442_v4, %v9840_v48 }
 0x4b6   :  { %v5526_v29 = vadd.f32 %v9682_v1, %v5487_v15  ;;  %v4848_v20 = vadd.f32 %v4775_v26, %v4496_v47 }
 0x4b8   :  { %5559 = vst.msk [vmem:[%s10074_s9 + $0xa8] sm:$0xff] %vm5537_vm0, %v5526_v29  ;;  %v5168_v18 = vadd.f32 %v5095_v27, %v4848_v20  ;;  %v10443_v29 = vld [vmem:[#allocation10_spill] sm:$0xff] }
 0x4b9   :  { %v4777_v24 = vpop.permute.xlu0 %4776  ;;  %v5415_v19 = vpop.permute.xlu1 %5414  ;;  %v4503_v20 = vmul.f32 %v10443_v29, %v9854_v14 }
 0x4ba   :  { %v5488_v28 = vadd.f32 %v5415_v19, %v5168_v18  ;;  %v4849_v34 = vadd.f32 %v4777_v24, %v4497_v45 }
 0x4bc   :  { %v5527_v8 = vadd.f32 %v9682_v1, %v5488_v28 }
 0x4bd   :  { %v5417_v43 = vpop.permute.xlu0 %5416  ;;  %v5097_v52 = vpop.permute.xlu1 %5096 }
 0x4be   :  { %5560 = vst.msk [vmem:[%s10074_s9 + $0xb0] sm:$0xff] %vm5537_vm0, %v5527_v8  ;;  %v5169_v49 = vadd.f32 %v5097_v52, %v4849_v34  ;;  %v10444_v52 = vld [vmem:[#allocation17_spill] sm:$0xff] }
 0x4bf   :  { %v4504_v14 = vmul.f32 %v10444_v52, %v9880_v56 }
 0x4c0   :  { %v5489_v36 = vadd.f32 %v5417_v43, %v5169_v49 }
 0x4c1   :  { %v5099_v42 = vpop.permute.xlu0 %5098  ;;  %v4779_v13 = vpop.permute.xlu1 %4778 }
 0x4c2   :  { %v5528_v58 = vadd.f32 %v9682_v1, %v5489_v36  ;;  %v4850_v17 = vadd.f32 %v4779_v13, %v4498_v37  ;;  %v10445_v36 = vld [vmem:[#allocation43_spill] sm:$0xff] }
 0x4c3   :  { %v4505_v23 = vmul.f32 %v10445_v36, %v9893_v10 }
 0x4c4   :  { %5561 = vst.msk [vmem:[%s10074_s9 + $0xb8] sm:$0xff] %vm5537_vm0, %v5528_v58  ;;  %v5170_v40 = vadd.f32 %v5099_v42, %v4850_v17 }
 0x4c5   :  { %v4781_v12 = vpop.permute.xlu0 %4780  ;;  %v5419_v53 = vpop.permute.xlu1 %5418 }
 0x4c6   :  { %v5490_v55 = vadd.f32 %v5419_v53, %v5170_v40  ;;  %v4851_v11 = vadd.f32 %v4781_v12, %v4499_v38 }
 0x4c8   :  { %v5529_v60 = vadd.f32 %v9682_v1, %v5490_v55 }
 0x4c9   :  { %v5421_v5 = vpop.permute.xlu0 %5420  ;;  %v5101_v46 = vpop.permute.xlu1 %5100 }
 0x4ca   :  { %5562 = vst.msk [vmem:[%s10074_s9 + $0xc0] sm:$0xff] %vm5537_vm0, %v5529_v60  ;;  %v5171_v7 = vadd.f32 %v5101_v46, %v4851_v11 }
 0x4cc   :  { %v5491_v30 = vadd.f32 %v5421_v5, %v5171_v7 }
 0x4cd   :  { %v5103_v39 = vpop.permute.xlu0 %5102  ;;  %v4783_v59 = vpop.permute.xlu1 %4782 }
 0x4ce   :  { %v5530_v41 = vadd.f32 %v9682_v1, %v5491_v30  ;;  %v4852_v9 = vadd.f32 %v4783_v59, %v4500_v21 }
 0x4d0   :  { %5563 = vst.msk [vmem:[%s10074_s9 + $0xc8] sm:$0xff] %vm5537_vm0, %v5530_v41  ;;  %v5172_v32 = vadd.f32 %v5103_v39, %v4852_v9 }
 0x4d1   :  { %v4785_v61 = vpop.permute.xlu0 %4784  ;;  %v5423_v2 = vpop.permute.xlu1 %5422 }
 0x4d2   :  { %v5492_v54 = vadd.f32 %v5423_v2, %v5172_v32  ;;  %v4853_v22 = vadd.f32 %v4785_v61, %v4501_v16 }
 0x4d4   :  { %v5531_v25 = vadd.f32 %v9682_v1, %v5492_v54 }
 0x4d5   :  { %v5425_v35 = vpop.permute.xlu0 %5424  ;;  %v5105_v51 = vpop.permute.xlu1 %5104 }
 0x4d6   :  { %5564 = vst.msk [vmem:[%s10074_s9 + $0xd0] sm:$0xff] %vm5537_vm0, %v5531_v25  ;;  %v5173_v33 = vadd.f32 %v5105_v51, %v4853_v22 }
 0x4d8   :  { %v5493_v62 = vadd.f32 %v5425_v35, %v5173_v33 }
 0x4d9   :  { %v5107_v31 = vpop.permute.xlu0 %5106  ;;  %v4787_v15 = vpop.permute.xlu1 %4786 }
 0x4da   :  { %v5532_v50 = vadd.f32 %v9682_v1, %v5493_v62  ;;  %v4854_v3 = vadd.f32 %v4787_v15, %v4502_v63 }
 0x4dc   :  { %5565 = vst.msk [vmem:[%s10074_s9 + $0xd8] sm:$0xff] %vm5537_vm0, %v5532_v50  ;;  %v5174_v47 = vadd.f32 %v5107_v31, %v4854_v3 }
 0x4dd   :  { %v4789_v27 = vpop.permute.xlu0 %4788  ;;  %v5427_v26 = vpop.permute.xlu1 %5426 }
 0x4de   :  { %v5494_v18 = vadd.f32 %v5427_v26, %v5174_v47  ;;  %v4855_v24 = vadd.f32 %v4789_v27, %v4503_v20 }
 0x4e0   :  { %v5533_v48 = vadd.f32 %v9682_v1, %v5494_v18 }
 0x4e1   :  { %v5429_v19 = vpop.permute.xlu0 %5428  ;;  %v5109_v6 = vpop.permute.xlu1 %5108 }
 0x4e2   :  { %5566 = vst.msk [vmem:[%s10074_s9 + $0xe0] sm:$0xff] %vm5537_vm0, %v5533_v48  ;;  %v5175_v45 = vadd.f32 %v5109_v6, %v4855_v24 }
 0x4e4   :  { %v5495_v28 = vadd.f32 %v5429_v19, %v5175_v45 }
 0x4e5   :  { %v5111_v34 = vpop.permute.xlu0 %5110  ;;  %v4791_v8 = vpop.permute.xlu1 %4790 }
 0x4e6   :  { %v5534_v43 = vadd.f32 %v9682_v1, %v5495_v28  ;;  %v4856_v49 = vadd.f32 %v4791_v8, %v4504_v14 }
 0x4e8   :  { %5567 = vst.msk [vmem:[%s10074_s9 + $0xe8] sm:$0xff] %vm5537_vm0, %v5534_v43  ;;  %v5176_v17 = vadd.f32 %v5111_v34, %v4856_v49 }
 0x4e9   :  { %v4793_v37 = vpop.permute.xlu0 %4792  ;;  %v5113_v42 = vpop.permute.xlu1 %5112 }
 0x4ea   :  { %v4857_v13 = vadd.f32 %v4793_v37, %v4505_v23 }
 0x4ec   :  { %v5177_v58 = vadd.f32 %v5113_v42, %v4857_v13 }
 0x4ed   :  { %v5433_v40 = vpop.permute.xlu0 %5432  ;;  %v5431_v12 = vpop.permute.xlu1 %5430 }
 0x4ee   :  { %v5497_v53 = vadd.f32 %v5433_v40, %v5177_v58  ;;  %v5496_v57 = vadd.f32 %v5431_v12, %v5176_v17 }
 0x4f0   :  { %v5536_v56 = vadd.f32 %v9682_v1, %v5497_v53  ;;  %v5535_v38 = vadd.f32 %v9682_v1, %v5496_v57 }
 0x4f2   :  { %5569 = vst.msk [vmem:[%s10074_s9 + $0xf8] sm:$0xff] %vm5537_vm0, %v5536_v56  ;;  %5568 = vst.msk [vmem:[%s10074_s9 + $0xf0] sm:$0xff] %vm5537_vm0, %v5535_v38 }
 0x4f3   :  { %5574 = vsyncpa [#allocation3], 1 }
 0x4f4   :  { %5575 = vsyncpa [#allocation5], 1 }

</bundles_post_ra>
